<compile_context>
chip_gen: v6e
topology: v6e:2x2x1
jax: 0.10.0
libtpu: 0.0.40
codegen_flags: <defaults>
</compile_context>

<pallas_src>
import jax
import jax.numpy as jnp
from jax.experimental import pallas as pl
from jax.experimental.pallas import tpu as pltpu

_NOUT = 7      # classifier logits
_NPAD = 128    # lane-dense padded output width


def _round_up(x, m):
    return ((x + m - 1) // m) * m


def _multimodal_kernel(
    img_ref, aud_ref, txt_ref,            # batch-tiled inputs (f32)
    w1_ref, b1_ref, w2_ref, b2_ref,       # audio MLP params (w bf16, b f32)
    wi_ref, bi_ref,                       # image head params (w bf16, b f32)
    wc_i_ref, wc_a_ref, wc_t_ref, bc_ref, # split classifier (w bf16, b f32, padded to 128)
    out_ref,                              # output [TM, 128] f32
):
    # ---- audio branch: fc1 -> ReLU -> fc2 (bf16 matmuls, f32 accum/elementwise) ----
    aud = aud_ref[...]                                                     # [TM, 128] f32
    h = jnp.dot(aud.astype(jnp.bfloat16), w1_ref[...],
                preferred_element_type=jnp.float32) + b1_ref[...]          # [TM, 256] f32
    h = jnp.maximum(h, 0.0)
    audio_feat = jnp.dot(h.astype(jnp.bfloat16), w2_ref[...],
                         preferred_element_type=jnp.float32) + b2_ref[...] # [TM, 768] f32

    # ---- image branch: ReLU(backbone features) -> fc ----
    img = jnp.maximum(img_ref[...], 0.0)                                   # [TM, 2048] f32
    image_feat = jnp.dot(img.astype(jnp.bfloat16), wi_ref[...],
                         preferred_element_type=jnp.float32) + bi_ref[...] # [TM, 768] f32

    # ---- text branch: BERT [CLS] embedding passes through ----
    txt = txt_ref[...]                                                     # [TM, 768] f32

    # ---- fusion + classifier: split-weight partial matmuls (no [TM, 2304] concat) ----
    out = jnp.dot(image_feat.astype(jnp.bfloat16), wc_i_ref[...],
                  preferred_element_type=jnp.float32)
    out = out + jnp.dot(audio_feat.astype(jnp.bfloat16), wc_a_ref[...],
                        preferred_element_type=jnp.float32)
    out = out + jnp.dot(txt.astype(jnp.bfloat16), wc_t_ref[...],
                        preferred_element_type=jnp.float32)
    out_ref[...] = out + bc_ref[...]                                       # [TM, 128] f32


def multimodal_forward(image_feats, audio, text_cls, params, *, max_tm=512):
    """image_feats: [B,2048], audio: [B,128], text_cls: [B,768] -> [B,7]."""
    B = image_feats.shape[0]
    (w1, b1, w2, b2, wi, bi, wc, bc) = params

    # Batch tile: multiple of 8 (f32 sublane), capped so the working set stays
    # well under v7x's 64 MiB VMEM even with f32 input tiles.
    TM = min(max_tm, _round_up(B, 8))
    B_pad = _round_up(B, TM)

    def pad_rows(x):
        return jnp.pad(x, ((0, B_pad - B), (0, 0))) if B_pad != B else x

    img_p = pad_rows(image_feats)
    aud_p = pad_rows(audio)
    txt_p = pad_rows(text_cls)

    # bf16 weights for the MXU; biases stay f32 (added after f32 accumulation).
    w1_b = w1.astype(jnp.bfloat16)
    w2_b = w2.astype(jnp.bfloat16)
    wi_b = wi.astype(jnp.bfloat16)
    # Split the classifier weight to avoid the concat, pad out-dim 7 -> 128 so
    # the output stores are lane-dense (unmasked).
    wc_b = wc.astype(jnp.bfloat16)
    pad_out = ((0, 0), (0, _NPAD - _NOUT))
    wc_img = jnp.pad(wc_b[0:768], pad_out)
    wc_aud = jnp.pad(wc_b[768:1536], pad_out)
    wc_txt = jnp.pad(wc_b[1536:2304], pad_out)
    bc_p = jnp.pad(bc, pad_out)

    grid = (pl.cdiv(B_pad, TM),)

    def batch_tile(feat):
        return pl.BlockSpec((TM, feat), lambda i: (i, 0))

    def resident(shape):
        # Same block every grid step -> weights stay resident, no re-DMA.
        return pl.BlockSpec(shape, lambda i: (0, 0))

    out_pad = pl.pallas_call(
        _multimodal_kernel,
        out_shape=jax.ShapeDtypeStruct((B_pad, _NPAD), jnp.float32),
        grid=grid,
        in_specs=[
            batch_tile(2048),            # image features
            batch_tile(128),             # audio
            batch_tile(768),             # text [CLS]
            resident((128, 256)),        # w1
            resident((1, 256)),          # b1
            resident((256, 768)),        # w2
            resident((1, 768)),          # b2
            resident((2048, 768)),       # wi
            resident((1, 768)),          # bi
            resident((768, _NPAD)),      # wc_img
            resident((768, _NPAD)),      # wc_aud
            resident((768, _NPAD)),      # wc_txt
            resident((1, _NPAD)),        # bc
        ],
        out_specs=batch_tile(_NPAD),
        compiler_params=pltpu.CompilerParams(
            dimension_semantics=("parallel",),
            vmem_limit_bytes=48 * 1024 * 1024,
        ),
    )(img_p, aud_p, txt_p, w1_b, b1, w2_b, b2, wi_b, bi, wc_img, wc_aud, wc_txt, bc_p)

    return out_pad[:B, :_NOUT]


def init_params(key):
    """Deterministic parameter init; weights stored as [in, out] (x @ W + b), f32."""
    ks = jax.random.split(key, 8)
    scale = 0.02
    w1 = scale * jax.random.normal(ks[0], (128, 256), jnp.float32)
    b1 = scale * jax.random.normal(ks[1], (1, 256), jnp.float32)
    w2 = scale * jax.random.normal(ks[2], (256, 768), jnp.float32)
    b2 = scale * jax.random.normal(ks[3], (1, 768), jnp.float32)
    wi = scale * jax.random.normal(ks[4], (2048, 768), jnp.float32)
    bi = scale * jax.random.normal(ks[5], (1, 768), jnp.float32)
    wc = scale * jax.random.normal(ks[6], (768 * 3, 7), jnp.float32)
    bc = scale * jax.random.normal(ks[7], (1, 7), jnp.float32)
    return (w1, b1, w2, b2, wi, bi, wc, bc)


def _reference(image_feats, audio, text_cls, params):
    (w1, b1, w2, b2, wi, bi, wc, bc) = params
    audio_feat = jnp.maximum(audio @ w1 + b1, 0.0) @ w2 + b2
    image_feat = jnp.maximum(image_feats, 0.0) @ wi + bi
    combined = jnp.concatenate([image_feat, audio_feat, text_cls], axis=1)
    return combined @ wc + bc


if __name__ == "__main__":
    key = jax.random.PRNGKey(0)
    k_img, k_aud, k_txt, k_par = jax.random.split(key, 4)

    B = 2
    image_feats = jax.random.normal(k_img, (B, 2048), jnp.float32)  # ImageNet trunk output
    audio = jax.random.normal(k_aud, (B, 128), jnp.float32)
    text_cls = jax.random.normal(k_txt, (B, 768), jnp.float32)      # BERT [CLS] embedding

    params = init_params(k_par)

    out = multimodal_forward(image_feats, audio, text_cls, params)
    out = jax.block_until_ready(out)

    ref = _reference(image_feats, audio, text_cls, params)
    assert out.shape == (B, _NOUT)
    # bf16 matmul inputs vs f32 reference -> modest tolerance
    assert jnp.allclose(out, ref, atol=2e-2, rtol=2e-2), (
        f"max abs err {float(jnp.max(jnp.abs(out - ref)))}")

    print("KERNEL_OK")
</pallas_src>

<mosaic_0001>
module attributes {stable_mosaic.version = 11 : i64} {
  func.func @_multimodal_kernel(%arg0: i32, %arg1: memref<8x2048xf32, #tpu.memory_space<vmem>>, %arg2: memref<8x128xf32, #tpu.memory_space<vmem>>, %arg3: memref<8x768xf32, #tpu.memory_space<vmem>>, %arg4: memref<128x256xbf16, #tpu.memory_space<vmem>>, %arg5: memref<1x256xf32, #tpu.memory_space<vmem>>, %arg6: memref<256x768xbf16, #tpu.memory_space<vmem>>, %arg7: memref<1x768xf32, #tpu.memory_space<vmem>>, %arg8: memref<2048x768xbf16, #tpu.memory_space<vmem>>, %arg9: memref<1x768xf32, #tpu.memory_space<vmem>>, %arg10: memref<768x128xbf16, #tpu.memory_space<vmem>>, %arg11: memref<768x128xbf16, #tpu.memory_space<vmem>>, %arg12: memref<768x128xbf16, #tpu.memory_space<vmem>>, %arg13: memref<1x128xf32, #tpu.memory_space<vmem>>, %arg14: memref<8x128xf32, #tpu.memory_space<vmem>>) attributes {dimension_semantics = [#tpu.dimension_semantics<parallel>], iteration_bounds = array<i64: 1>, scalar_prefetch = 0 : i64, scratch_operands = 0 : i64, tpu.core_type = #tpu.core_type<tc>, window_params = [{transform_indices = @transform_0, window_bounds = array<i64: 8, 2048>}, {transform_indices = @transform_1, window_bounds = array<i64: 8, 128>}, {transform_indices = @transform_2, window_bounds = array<i64: 8, 768>}, {pipeline_mode = #tpu.pipeline_mode<synchronous>, transform_indices = @transform_3, window_bounds = array<i64: 128, 256>}, {pipeline_mode = #tpu.pipeline_mode<synchronous>, transform_indices = @transform_4, window_bounds = array<i64: 1, 256>}, {pipeline_mode = #tpu.pipeline_mode<synchronous>, transform_indices = @transform_5, window_bounds = array<i64: 256, 768>}, {pipeline_mode = #tpu.pipeline_mode<synchronous>, transform_indices = @transform_6, window_bounds = array<i64: 1, 768>}, {pipeline_mode = #tpu.pipeline_mode<synchronous>, transform_indices = @transform_7, window_bounds = array<i64: 2048, 768>}, {pipeline_mode = #tpu.pipeline_mode<synchronous>, transform_indices = @transform_8, window_bounds = array<i64: 1, 768>}, {pipeline_mode = #tpu.pipeline_mode<synchronous>, transform_indices = @transform_9, window_bounds = array<i64: 768, 128>}, {pipeline_mode = #tpu.pipeline_mode<synchronous>, transform_indices = @transform_10, window_bounds = array<i64: 768, 128>}, {pipeline_mode = #tpu.pipeline_mode<synchronous>, transform_indices = @transform_11, window_bounds = array<i64: 768, 128>}, {pipeline_mode = #tpu.pipeline_mode<synchronous>, transform_indices = @transform_12, window_bounds = array<i64: 1, 128>}, {transform_indices = @transform_13, window_bounds = array<i64: 8, 128>}]} {
    %c0 = arith.constant 0 : index
    %c0_0 = arith.constant 0 : index
    %0 = vector.load %arg2[%c0, %c0_0] : memref<8x128xf32, #tpu.memory_space<vmem>>, vector<8x128xf32>
    %1 = arith.truncf %0 : vector<8x128xf32> to vector<8x128xbf16>
    %c0_1 = arith.constant 0 : index
    %c0_2 = arith.constant 0 : index
    %2 = vector.load %arg4[%c0_1, %c0_2] : memref<128x256xbf16, #tpu.memory_space<vmem>>, vector<128x256xbf16>
    %cst = arith.constant dense<0.000000e+00> : vector<8x256xf32>
    %3 = tpu.matmul %1, %2, %cst {dimension_numbers = #tpu.dot_dimension_numbers<[1], [0], [0], [1], [0, 0, 1, 1], [], []>} : vector<8x128xbf16>, vector<128x256xbf16>, vector<8x256xf32> -> vector<8x256xf32>
    %c0_3 = arith.constant 0 : index
    %c0_4 = arith.constant 0 : index
    %4 = vector.load %arg5[%c0_3, %c0_4] : memref<1x256xf32, #tpu.memory_space<vmem>>, vector<1x256xf32>
    %5 = vector.broadcast %4 : vector<1x256xf32> to vector<8x256xf32>
    %6 = arith.addf %3, %5 : vector<8x256xf32>
    %cst_5 = arith.constant 0.000000e+00 : f32
    %7 = vector.broadcast %cst_5 : f32 to vector<8x256xf32>
    %8 = arith.maximumf %6, %7 : vector<8x256xf32>
    %9 = arith.truncf %8 : vector<8x256xf32> to vector<8x256xbf16>
    %c0_6 = arith.constant 0 : index
    %c0_7 = arith.constant 0 : index
    %10 = vector.load %arg6[%c0_6, %c0_7] : memref<256x768xbf16, #tpu.memory_space<vmem>>, vector<256x768xbf16>
    %cst_8 = arith.constant dense<0.000000e+00> : vector<8x768xf32>
    %11 = tpu.matmul %9, %10, %cst_8 {dimension_numbers = #tpu.dot_dimension_numbers<[1], [0], [0], [1], [0, 0, 1, 1], [], []>} : vector<8x256xbf16>, vector<256x768xbf16>, vector<8x768xf32> -> vector<8x768xf32>
    %c0_9 = arith.constant 0 : index
    %c0_10 = arith.constant 0 : index
    %12 = vector.load %arg7[%c0_9, %c0_10] : memref<1x768xf32, #tpu.memory_space<vmem>>, vector<1x768xf32>
    %13 = vector.broadcast %12 : vector<1x768xf32> to vector<8x768xf32>
    %14 = arith.addf %11, %13 : vector<8x768xf32>
    %c0_11 = arith.constant 0 : index
    %c0_12 = arith.constant 0 : index
    %15 = vector.load %arg1[%c0_11, %c0_12] : memref<8x2048xf32, #tpu.memory_space<vmem>>, vector<8x2048xf32>
    %cst_13 = arith.constant 0.000000e+00 : f32
    %16 = vector.broadcast %cst_13 : f32 to vector<8x2048xf32>
    %17 = arith.maximumf %15, %16 : vector<8x2048xf32>
    %18 = arith.truncf %17 : vector<8x2048xf32> to vector<8x2048xbf16>
    %c0_14 = arith.constant 0 : index
    %c0_15 = arith.constant 0 : index
    %19 = vector.load %arg8[%c0_14, %c0_15] : memref<2048x768xbf16, #tpu.memory_space<vmem>>, vector<2048x768xbf16>
    %cst_16 = arith.constant dense<0.000000e+00> : vector<8x768xf32>
    %20 = tpu.matmul %18, %19, %cst_16 {dimension_numbers = #tpu.dot_dimension_numbers<[1], [0], [0], [1], [0, 0, 1, 1], [], []>} : vector<8x2048xbf16>, vector<2048x768xbf16>, vector<8x768xf32> -> vector<8x768xf32>
    %c0_17 = arith.constant 0 : index
    %c0_18 = arith.constant 0 : index
    %21 = vector.load %arg9[%c0_17, %c0_18] : memref<1x768xf32, #tpu.memory_space<vmem>>, vector<1x768xf32>
    %22 = vector.broadcast %21 : vector<1x768xf32> to vector<8x768xf32>
    %23 = arith.addf %20, %22 : vector<8x768xf32>
    %c0_19 = arith.constant 0 : index
    %c0_20 = arith.constant 0 : index
    %24 = vector.load %arg3[%c0_19, %c0_20] : memref<8x768xf32, #tpu.memory_space<vmem>>, vector<8x768xf32>
    %25 = arith.truncf %23 : vector<8x768xf32> to vector<8x768xbf16>
    %c0_21 = arith.constant 0 : index
    %c0_22 = arith.constant 0 : index
    %26 = vector.load %arg10[%c0_21, %c0_22] : memref<768x128xbf16, #tpu.memory_space<vmem>>, vector<768x128xbf16>
    %cst_23 = arith.constant dense<0.000000e+00> : vector<8x128xf32>
    %27 = tpu.matmul %25, %26, %cst_23 {dimension_numbers = #tpu.dot_dimension_numbers<[1], [0], [0], [1], [0, 0, 1, 1], [], []>} : vector<8x768xbf16>, vector<768x128xbf16>, vector<8x128xf32> -> vector<8x128xf32>
    %28 = arith.truncf %14 : vector<8x768xf32> to vector<8x768xbf16>
    %c0_24 = arith.constant 0 : index
    %c0_25 = arith.constant 0 : index
    %29 = vector.load %arg11[%c0_24, %c0_25] : memref<768x128xbf16, #tpu.memory_space<vmem>>, vector<768x128xbf16>
    %cst_26 = arith.constant dense<0.000000e+00> : vector<8x128xf32>
    %30 = tpu.matmul %28, %29, %cst_26 {dimension_numbers = #tpu.dot_dimension_numbers<[1], [0], [0], [1], [0, 0, 1, 1], [], []>} : vector<8x768xbf16>, vector<768x128xbf16>, vector<8x128xf32> -> vector<8x128xf32>
    %31 = arith.addf %27, %30 : vector<8x128xf32>
    %32 = arith.truncf %24 : vector<8x768xf32> to vector<8x768xbf16>
    %c0_27 = arith.constant 0 : index
    %c0_28 = arith.constant 0 : index
    %33 = vector.load %arg12[%c0_27, %c0_28] : memref<768x128xbf16, #tpu.memory_space<vmem>>, vector<768x128xbf16>
    %cst_29 = arith.constant dense<0.000000e+00> : vector<8x128xf32>
    %34 = tpu.matmul %32, %33, %cst_29 {dimension_numbers = #tpu.dot_dimension_numbers<[1], [0], [0], [1], [0, 0, 1, 1], [], []>} : vector<8x768xbf16>, vector<768x128xbf16>, vector<8x128xf32> -> vector<8x128xf32>
    %35 = arith.addf %31, %34 : vector<8x128xf32>
    %c0_30 = arith.constant 0 : index
    %c0_31 = arith.constant 0 : index
    %36 = vector.load %arg13[%c0_30, %c0_31] : memref<1x128xf32, #tpu.memory_space<vmem>>, vector<1x128xf32>
    %37 = vector.broadcast %36 : vector<1x128xf32> to vector<8x128xf32>
    %38 = arith.addf %35, %37 : vector<8x128xf32>
    %c0_32 = arith.constant 0 : index
    %c0_33 = arith.constant 0 : index
    %39 = vector.load %arg14[%c0_32, %c0_33] : memref<8x128xf32, #tpu.memory_space<vmem>>, vector<8x128xf32>
    tpu.vector_store %arg14[%c0_32, %c0_33], %38 {strides = array<i32>} : memref<8x128xf32, #tpu.memory_space<vmem>>, vector<8x128xf32>,
    return
  }
  func.func @transform_0(%arg0: i32) -> (i32, i32) {
    %c0_i32 = arith.constant 0 : i32
    %c0_i32_0 = arith.constant 0 : i32
    return %arg0, %c0_i32 : i32, i32
  }
  func.func @transform_1(%arg0: i32) -> (i32, i32) {
    %c0_i32 = arith.constant 0 : i32
    %c0_i32_0 = arith.constant 0 : i32
    return %arg0, %c0_i32 : i32, i32
  }
  func.func @transform_2(%arg0: i32) -> (i32, i32) {
    %c0_i32 = arith.constant 0 : i32
    %c0_i32_0 = arith.constant 0 : i32
    return %arg0, %c0_i32 : i32, i32
  }
  func.func @transform_3(%arg0: i32) -> (i32, i32) {
    %c0_i32 = arith.constant 0 : i32
    %c0_i32_0 = arith.constant 0 : i32
    %c0_i32_1 = arith.constant 0 : i32
    return %c0_i32, %c0_i32_0 : i32, i32
  }
  func.func @transform_4(%arg0: i32) -> (i32, i32) {
    %c0_i32 = arith.constant 0 : i32
    %c0_i32_0 = arith.constant 0 : i32
    %c0_i32_1 = arith.constant 0 : i32
    return %c0_i32, %c0_i32_0 : i32, i32
  }
  func.func @transform_5(%arg0: i32) -> (i32, i32) {
    %c0_i32 = arith.constant 0 : i32
    %c0_i32_0 = arith.constant 0 : i32
    %c0_i32_1 = arith.constant 0 : i32
    return %c0_i32, %c0_i32_0 : i32, i32
  }
  func.func @transform_6(%arg0: i32) -> (i32, i32) {
    %c0_i32 = arith.constant 0 : i32
    %c0_i32_0 = arith.constant 0 : i32
    %c0_i32_1 = arith.constant 0 : i32
    return %c0_i32, %c0_i32_0 : i32, i32
  }
  func.func @transform_7(%arg0: i32) -> (i32, i32) {
    %c0_i32 = arith.constant 0 : i32
    %c0_i32_0 = arith.constant 0 : i32
    %c0_i32_1 = arith.constant 0 : i32
    return %c0_i32, %c0_i32_0 : i32, i32
  }
  func.func @transform_8(%arg0: i32) -> (i32, i32) {
    %c0_i32 = arith.constant 0 : i32
    %c0_i32_0 = arith.constant 0 : i32
    %c0_i32_1 = arith.constant 0 : i32
    return %c0_i32, %c0_i32_0 : i32, i32
  }
  func.func @transform_9(%arg0: i32) -> (i32, i32) {
    %c0_i32 = arith.constant 0 : i32
    %c0_i32_0 = arith.constant 0 : i32
    %c0_i32_1 = arith.constant 0 : i32
    return %c0_i32, %c0_i32_0 : i32, i32
  }
  func.func @transform_10(%arg0: i32) -> (i32, i32) {
    %c0_i32 = arith.constant 0 : i32
    %c0_i32_0 = arith.constant 0 : i32
    %c0_i32_1 = arith.constant 0 : i32
    return %c0_i32, %c0_i32_0 : i32, i32
  }
  func.func @transform_11(%arg0: i32) -> (i32, i32) {
    %c0_i32 = arith.constant 0 : i32
    %c0_i32_0 = arith.constant 0 : i32
    %c0_i32_1 = arith.constant 0 : i32
    return %c0_i32, %c0_i32_0 : i32, i32
  }
  func.func @transform_12(%arg0: i32) -> (i32, i32) {
    %c0_i32 = arith.constant 0 : i32
    %c0_i32_0 = arith.constant 0 : i32
    %c0_i32_1 = arith.constant 0 : i32
    return %c0_i32, %c0_i32_0 : i32, i32
  }
  func.func @transform_13(%arg0: i32) -> (i32, i32) {
    %c0_i32 = arith.constant 0 : i32
    %c0_i32_0 = arith.constant 0 : i32
    return %arg0, %c0_i32 : i32, i32
  }
}

</mosaic_0001>

<bundles_post_ra>
// kernel: tpu_custom_call.1
= control target key start
LH: loop header
LB: loop body
LE: loop exit
PB: predicated region body
PF: predicated region fallthrough
CT: control target
= control target key end

     0   :  { %18 = vsyncpa [#allocation3], 0  ;;  %s11704_s0 = inlined_call_operand.hbm [shape: f32[8,2048], index: 0, kind: input, shape index: {}]   ;;  %s11705_s1 = inlined_call_operand.hbm [shape: f32[8,128], index: 1, kind: input, shape index: {}]   ;;  %s11706_s2 = inlined_call_operand.hbm [shape: f32[8,768], index: 2, kind: input, shape index: {}]   ;;  %s11707_s3 = inlined_call_operand.hbm [shape: bf16[128,256], index: 3, kind: input, shape index: {}]   ;;  %s11708_s4 = inlined_call_operand.hbm [shape: f32[1,256], index: 4, kind: input, shape index: {}]   ;;  %s11709_s5 = inlined_call_operand.hbm [shape: bf16[256,768], index: 5, kind: input, shape index: {}]   ;;  %s11710_s6 = inlined_call_operand.hbm [shape: f32[1,768], index: 6, kind: input, shape index: {}]   ;;  %s11711_s7 = inlined_call_operand.hbm [shape: bf16[2048,768], index: 7, kind: input, shape index: {}]   ;;  %s11712_s8 = inlined_call_operand.hbm [shape: f32[1,768], index: 8, kind: input, shape index: {}]   ;;  %s11713_s9 = inlined_call_operand.hbm [shape: bf16[768,128], index: 9, kind: input, shape index: {}]   ;;  %s11714_s10 = inlined_call_operand.hbm [shape: bf16[768,128], index: 10, kind: input, shape index: {}]   ;;  %s11715_s11 = inlined_call_operand.hbm [shape: bf16[768,128], index: 11, kind: input, shape index: {}]   ;;  %s11716_s12 = inlined_call_operand.hbm [shape: f32[1,128], index: 12, kind: input, shape index: {}]   ;;  %s11717_s13 = inlined_call_operand.hbm [shape: f32[8,128], index: 13, kind: output, shape index: {}]  }
   0x1   :  { %19 = vsyncpa [#allocation6], 0 }
   0x2   :  { %20 = vsyncpa [#allocation9], 0 }
   0x3   :  { %21 = vsyncpa [#allocation12], 0 }
   0x4   :  { %22 = vsyncpa [#allocation15], 0 }
   0x5   :  { %23 = vsyncpa [#allocation18], 0 }
   0x6   :  { %24 = vsyncpa [#allocation21], 0 }
   0x7   :  { %25 = vsyncpa [#allocation4], 0  ;;  %s11339_s25 = smov [#allocation5]   ;;  %s11340_s27 = smov [#allocation8]  }
   0x8   :  { %s42_s26 = sshll.u32 %s11339_s25, 4  ;;  %s61_s28 = sshll.u32 %s11340_s27, 4  ;;  %s43_s26 = int_to_ptr.vmem [resolvable:$true] %s42_s26  ;;  %s62_s28 = int_to_ptr.vmem [resolvable:$true] %s61_s28 }
   0x9   :  { %s11051_s29 = scalar_lea.vmem %s43_s26, 128  ;;  %p11056_p1 = scmp.lt.s32.totalorder %s43_s26, %s43_s26 }
   0xa   :  { %p11052_p0 = scmp.ne.s32.totalorder %s43_s26, %s11051_s29  ;;  %p11057_p2 = scmp.lt.s32.totalorder %s11051_s29, %s11051_s29 }
   0xc   :  { %p11058_p3 = por %p11057_p2, %p11056_p1 }
   0xe   :  { %p11059_p4 = pnand %p11058_p3, %p11052_p0 }
  0x10   :  { %11062 = shalt.err (!%p11059_p4)
}
  0x11   :  { %45 = dma.hbm_to_vmem [thread:$0]  %s11705_s1, 128, %s43_s26, [#allocation6]  }
  0x12   :  { %s11071_s15 = scalar_lea.vmem %s62_s28, 2048  ;;  %p11076_p6 = scmp.lt.s32.totalorder %s62_s28, %s62_s28 }
  0x13   :  { %p11072_p5 = scmp.ne.s32.totalorder %s62_s28, %s11071_s15  ;;  %p11077_p7 = scmp.lt.s32.totalorder %s11071_s15, %s11071_s15 }
  0x15   :  { %p11078_p8 = por %p11077_p7, %p11076_p6 }
  0x17   :  { %p11079_p9 = pnand %p11078_p8, %p11072_p5 }
  0x19   :  { %11082 = shalt.err (!%p11079_p9)
}
  0x1a   :  { %s11341_s16 = smov 128   ;;  %s11342_s17 = smov 8  }
  0x1b   :  { %67 = dma.hbm_to_vmem [thread:$0]  %s11707_s3, 2048, %s62_s28, [#allocation9], %s11341_s16, %s11341_s16, %s11342_s17  }
  0x1c   :  { %s11343_s20 = smov [#allocation11]  }
  0x1d   :  { %s83_s21 = sshll.u32 %s11343_s20, 4  ;;  %s84_s21 = int_to_ptr.vmem [resolvable:$true] %s83_s21 }
  0x1e   :  { %s11091_s22 = scalar_lea.vmem %s84_s21, 12288  ;;  %p11096_p11 = scmp.lt.s32.totalorder %s84_s21, %s84_s21 }
  0x1f   :  { %p11092_p10 = scmp.ne.s32.totalorder %s84_s21, %s11091_s22  ;;  %p11097_p12 = scmp.lt.s32.totalorder %s11091_s22, %s11091_s22 }
  0x21   :  { %p11098_p13 = por %p11097_p12, %p11096_p11 }
  0x23   :  { %p11099_p0 = pnand %p11098_p13, %p11092_p10 }
  0x25   :  { %11102 = shalt.err (!%p11099_p0)
}
  0x26   :  { %s11344_s1 = smov 384   ;;  %s11345_s23 = smov 24  }
  0x27   :  { %89 = dma.hbm_to_vmem [thread:$0]  %s11709_s5, 12288, %s84_s21, [#allocation12], %s11344_s1, %s11344_s1, %s11345_s23  }
  0x28   :  { %s11346_s26 = smov [#allocation14]   ;;  %s11347_s3 = smov [#allocation17]  }
  0x29   :  { %s105_s27 = sshll.u32 %s11346_s26, 4  ;;  %s127_s28 = sshll.u32 %s11347_s3, 4  ;;  %s106_s27 = int_to_ptr.vmem [resolvable:$true] %s105_s27  ;;  %s128_s28 = int_to_ptr.vmem [resolvable:$true] %s127_s28 }
  0x2a   :  { %s11111_s29 = scalar_lea.vmem %s106_s27, 98304  ;;  %p11116_p2 = scmp.lt.s32.totalorder %s106_s27, %s106_s27 }
  0x2b   :  { %p11112_p1 = scmp.ne.s32.totalorder %s106_s27, %s11111_s29  ;;  %p11117_p3 = scmp.lt.s32.totalorder %s11111_s29, %s11111_s29 }
  0x2d   :  { %p11118_p4 = por %p11117_p3, %p11116_p2 }
  0x2f   :  { %p11119_p5 = pnand %p11118_p4, %p11112_p1 }
  0x31   :  { %11122 = shalt.err (!%p11119_p5)
}
  0x32   :  { %111 = dma.hbm_to_vmem [thread:$0]  %s11711_s7, 98304, %s106_s27, [#allocation15], %s11344_s1, %s11344_s1, %s11345_s23  }
  0x33   :  { %s11131_s15 = scalar_lea.vmem %s128_s28, 6144  ;;  %p11136_p7 = scmp.lt.s32.totalorder %s128_s28, %s128_s28 }
  0x34   :  { %p11132_p6 = scmp.ne.s32.totalorder %s128_s28, %s11131_s15  ;;  %p11137_p8 = scmp.lt.s32.totalorder %s11131_s15, %s11131_s15 }
  0x36   :  { %p11138_p9 = por %p11137_p8, %p11136_p7 }
  0x38   :  { %p11139_p10 = pnand %p11138_p9, %p11132_p6 }
  0x3a   :  { %11142 = shalt.err (!%p11139_p10)
}
  0x3b   :  { %s11348_s5 = smov 64   ;;  %s11349_s16 = smov 4  }
  0x3c   :  { %133 = dma.hbm_to_vmem [thread:$0]  %s11713_s9, 6144, %s128_s28, [#allocation18], %s11348_s5, %s11348_s5, %s11349_s16  }
  0x3d   :  { %s11350_s19 = smov [#allocation20]   ;;  %s11351_s7 = smov [#allocation2]  }
  0x3e   :  { %s151_s20 = sshll.u32 %s11350_s19, 4  ;;  %s32_s21 = sshll.u32 %s11351_s7, 4  ;;  %s152_s20 = int_to_ptr.vmem [resolvable:$true] %s151_s20  ;;  %s33_s21 = int_to_ptr.vmem [resolvable:$true] %s32_s21 }
  0x3f   :  { %s11151_s22 = scalar_lea.vmem %s152_s20, 6144  ;;  %p11156_p12 = scmp.lt.s32.totalorder %s152_s20, %s152_s20 }
  0x40   :  { %p11152_p11 = scmp.ne.s32.totalorder %s152_s20, %s11151_s22  ;;  %p11157_p13 = scmp.lt.s32.totalorder %s11151_s22, %s11151_s22 }
  0x42   :  { %p11158_p0 = por %p11157_p13, %p11156_p12 }
  0x44   :  { %p11159_p1 = pnand %p11158_p0, %p11152_p11 }
  0x46   :  { %11162 = shalt.err (!%p11159_p1)
}
  0x47   :  { %157 = dma.hbm_to_vmem [thread:$0]  %s11715_s11, 6144, %s152_s20, [#allocation21], %s11348_s5, %s11348_s5, %s11349_s16  }
  0x48   :  { %s11171_s9 = scalar_lea.vmem %s33_s21, 2048  ;;  %p11176_p3 = scmp.lt.s32.totalorder %s33_s21, %s33_s21 }
  0x49   :  { %p11172_p2 = scmp.ne.s32.totalorder %s33_s21, %s11171_s9  ;;  %p11177_p4 = scmp.lt.s32.totalorder %s11171_s9, %s11171_s9 }
  0x4b   :  { %p11178_p5 = por %p11177_p4, %p11176_p3 }
  0x4d   :  { %p11179_p6 = pnand %p11178_p5, %p11172_p2 }
  0x4f   :  { %11182 = shalt.err (!%p11179_p6)
}
  0x50   :  { %35 = dma.hbm_to_vmem [thread:$0]  %s11704_s0, 2048, %s33_s21, [#allocation3]  }
  0x51   :  { %s11352_s26 = smov [#allocation7]   ;;  %s11353_s3 = smov [#allocation10]  }
  0x52   :  { %s52_s27 = sshll.u32 %s11352_s26, 4  ;;  %s74_s28 = sshll.u32 %s11353_s3, 4  ;;  %s53_s27 = int_to_ptr.vmem [resolvable:$true] %s52_s27  ;;  %s75_s28 = int_to_ptr.vmem [resolvable:$true] %s74_s28 }
  0x53   :  { %s11191_s29 = scalar_lea.vmem %s53_s27, 768  ;;  %p11196_p8 = scmp.lt.s32.totalorder %s53_s27, %s53_s27 }
  0x54   :  { %p11192_p7 = scmp.ne.s32.totalorder %s53_s27, %s11191_s29  ;;  %p11197_p9 = scmp.lt.s32.totalorder %s11191_s29, %s11191_s29 }
  0x56   :  { %p11198_p10 = por %p11197_p9, %p11196_p8 }
  0x58   :  { %p11199_p11 = pnand %p11198_p10, %p11192_p7 }
  0x5a   :  { %11202 = shalt.err (!%p11199_p11)
}
  0x5b   :  { %55 = dma.hbm_to_vmem [thread:$0]  %s11706_s2, 768, %s53_s27, [#allocation6]  }
  0x5c   :  { %s11211_s14 = scalar_lea.vmem %s75_s28, 32  ;;  %p11216_p13 = scmp.lt.s32.totalorder %s75_s28, %s75_s28 }
  0x5d   :  { %p11212_p12 = scmp.ne.s32.totalorder %s75_s28, %s11211_s14  ;;  %p11217_p0 = scmp.lt.s32.totalorder %s11211_s14, %s11211_s14 }
  0x5f   :  { %p11218_p1 = por %p11217_p0, %p11216_p13 }
  0x61   :  { %p11219_p2 = pnand %p11218_p1, %p11212_p12 }
  0x63   :  { %11222 = shalt.err (!%p11219_p2)
}
  0x64   :  { %77 = dma.hbm_to_vmem [thread:$0]  %s11708_s4, 32, %s75_s28, [#allocation9]  }
  0x65   :  { %s11354_s17 = smov [#allocation13]   ;;  %s11355_s19 = smov [#allocation16]  }
  0x66   :  { %s96_s18 = sshll.u32 %s11354_s17, 4  ;;  %s118_s20 = sshll.u32 %s11355_s19, 4  ;;  %s97_s18 = int_to_ptr.vmem [resolvable:$true] %s96_s18  ;;  %s119_s20 = int_to_ptr.vmem [resolvable:$true] %s118_s20 }
  0x67   :  { %s11231_s7 = scalar_lea.vmem %s97_s18, 96  ;;  %p11236_p4 = scmp.lt.s32.totalorder %s97_s18, %s97_s18 }
  0x68   :  { %p11232_p3 = scmp.ne.s32.totalorder %s97_s18, %s11231_s7  ;;  %p11237_p5 = scmp.lt.s32.totalorder %s11231_s7, %s11231_s7 }
  0x6a   :  { %p11238_p6 = por %p11237_p5, %p11236_p4 }
  0x6c   :  { %p11239_p7 = pnand %p11238_p6, %p11232_p3 }
  0x6e   :  { %11242 = shalt.err (!%p11239_p7)
}
  0x6f   :  { %99 = dma.hbm_to_vmem [thread:$0]  %s11710_s6, 96, %s97_s18, [#allocation12]  }
  0x70   :  { %s11251_s22 = scalar_lea.vmem %s119_s20, 96  ;;  %p11256_p9 = scmp.lt.s32.totalorder %s119_s20, %s119_s20 }
  0x71   :  { %p11252_p8 = scmp.ne.s32.totalorder %s119_s20, %s11251_s22  ;;  %p11257_p10 = scmp.lt.s32.totalorder %s11251_s22, %s11251_s22 }
  0x73   :  { %p11258_p11 = por %p11257_p10, %p11256_p9 }
  0x75   :  { %p11259_p12 = pnand %p11258_p11, %p11252_p8 }
  0x77   :  { %11262 = shalt.err (!%p11259_p12)
}
  0x78   :  { %121 = dma.hbm_to_vmem [thread:$0]  %s11712_s8, 96, %s119_s20, [#allocation15]  }
  0x79   :  { %s11356_s23 = smov [#allocation19]   ;;  %s11357_s24 = smov [#allocation22]  }
  0x7a   :  { %s139_s9 = sshll.u32 %s11356_s23, 4  ;;  %s164_s25 = sshll.u32 %s11357_s24, 4  ;;  %s140_s9 = int_to_ptr.vmem [resolvable:$true] %s139_s9  ;;  %s165_s25 = int_to_ptr.vmem [resolvable:$true] %s164_s25 }
  0x7b   :  { %s11271_s26 = scalar_lea.vmem %s140_s9, 6144  ;;  %p11276_p0 = scmp.lt.s32.totalorder %s140_s9, %s140_s9 }
  0x7c   :  { %p11272_p13 = scmp.ne.s32.totalorder %s140_s9, %s11271_s26  ;;  %p11277_p1 = scmp.lt.s32.totalorder %s11271_s26, %s11271_s26 }
  0x7e   :  { %p11278_p2 = por %p11277_p1, %p11276_p0 }
  0x80   :  { %p11279_p3 = pnand %p11278_p2, %p11272_p13 }
  0x82   :  { %11282 = shalt.err (!%p11279_p3)
}
  0x83   :  { %145 = dma.hbm_to_vmem [thread:$0]  %s11714_s10, 6144, %s140_s9, [#allocation18], %s11348_s5, %s11348_s5, %s11349_s16  }
  0x84   :  { %s11291_s8 = scalar_lea.vmem %s165_s25, 16  ;;  %s11295_s3 = scalar_lea.vmem %s165_s25, 32 }
  0x85   :  { %p11292_p4 = scmp.ne.s32.totalorder %s165_s25, %s11291_s8  ;;  %p11296_p5 = scmp.lt.s32.totalorder %s165_s25, %s165_s25 }
  0x86   :  { %p11297_p6 = scmp.lt.s32.totalorder %s11295_s3, %s11291_s8 }
  0x88   :  { %p11298_p7 = por %p11297_p6, %p11296_p5 }
  0x8a   :  { %p11299_p8 = pnand %p11298_p7, %p11292_p4 }
  0x8c   :  { %11302 = shalt.err (!%p11299_p8)
}
  0x8d   :  { %167 = dma.hbm_to_vmem [thread:$0]  %s11716_s12, 16, %s165_s25, [#allocation21]  }
  0x8e   :  { %11323 = dma.done.wait [#allocation3], 2048  }
  0x8f   :  { %11324 = vsyncadd [#allocation3], 4294965248 }
  0x90   :  { %11325 = dma.done.wait [#allocation6], 896  }
  0x91   :  { %11326 = vsyncadd [#allocation6], 4294966400 }
  0x92   :  { %11327 = dma.done.wait [#allocation9], 2080  }
  0x93   :  { %11328 = vsyncadd [#allocation9], 4294965216 }
  0x94   :  { %11329 = dma.done.wait [#allocation12], 12384  }
  0x95   :  { %11330 = vsyncadd [#allocation12], 4294954912 }
  0x96   :  { %11331 = dma.done.wait [#allocation15], 98400  }
  0x97   :  { %11332 = vsyncadd [#allocation15], 4294868896 }
  0x98   :  { %11333 = dma.done.wait [#allocation18], 12288  }
  0x99   :  { %11334 = vsyncadd [#allocation18], 4294955008 }
  0x9a   :  { %11335 = dma.done.wait [#allocation21], 6160  }
  0x9b   :  { %11336 = vsyncadd [#allocation21], 4294961136  ;;  %v11358_v0 = vmov 0   ;;  %v9577_v1 = vld [vmem:[#allocation8 + $0x74] ss:$8 sps:$4 sm:$0xff]   ;;  %v208_v26 = vld [vmem:[#allocation5] sm:$0xff] }
  0x9c   :  { %350 = vmatprep.mubr.bf16.mxu0 %v11358_v0  ;;  %v9579_v2 = vld [vmem:[#allocation8 + $0x70] ss:$8 sps:$4 sm:$0xff]   ;;  %318 = vmatprep.subr.bf16.mxu0 %v9577_v1  ;;  %v9580_v3 = vld [vmem:[#allocation8 + $0x64] ss:$8 sps:$4 sm:$0xff]   ;;  %v9582_v4 = vld [vmem:[#allocation8 + $0x60] ss:$8 sps:$4 sm:$0xff]   ;;  %v209_v30 = vpack.c.bf16 %v208_v26, %v208_v26 }
  0x9d   :  { %319 = vmatpush1.bf16.msra.mxu0 %v9579_v2  ;;  %v9583_v5 = vld [vmem:[#allocation8 + $0x54] ss:$8 sps:$4 sm:$0xff]   ;;  %v9585_v6 = vld [vmem:[#allocation8 + $0x50] ss:$8 sps:$4 sm:$0xff]   ;;  %v9586_v7 = vld [vmem:[#allocation8 + $0x44] ss:$8 sps:$4 sm:$0xff]  }
  0x9e   :  { %320 = vmatprep.subr.bf16.mxu0 %v9580_v3  ;;  %v9588_v8 = vld [vmem:[#allocation8 + $0x40] ss:$8 sps:$4 sm:$0xff]   ;;  %v9601_v9 = vld [vmem:[#allocation11 + $0x154] ss:$24 sps:$4 sm:$0xff]   ;;  %v9603_v31 = vld [vmem:[#allocation11 + $0x158] ss:$24 sps:$4 sm:$0xff]  }
  0x9f   :  { %v9589_v10 = vld [vmem:[#allocation8 + $0x34] ss:$8 sps:$4 sm:$0xff]   ;;  %971 = vmatprep.subr.bf16.mxu1 %v9601_v9  ;;  %v9591_v13 = vld [vmem:[#allocation8 + $0x30] ss:$8 sps:$4 sm:$0xff]   ;;  %v9592_v14 = vld [vmem:[#allocation8 + $0x24] ss:$8 sps:$4 sm:$0xff]  }
  0xa0   :  { %v9606_v11 = vld [vmem:[#allocation11 + $0x150] ss:$24 sps:$4 sm:$0xff]   ;;  %v9607_v12 = vld [vmem:[#allocation11 + $0x124] ss:$24 sps:$4 sm:$0xff]   ;;  %v9612_v15 = vld [vmem:[#allocation11 + $0x120] ss:$24 sps:$4 sm:$0xff]  }
  0xa1   :  { %321 = vmatpush1.bf16.msra.mxu0 %v9582_v4  ;;  %972 = vmatpush1.bf16.msra.mxu1 %v9606_v11  ;;  %v9613_v16 = vld [vmem:[#allocation11 + $0xf4] ss:$24 sps:$4 sm:$0xff]   ;;  %v9594_v17 = vld [vmem:[#allocation8 + $0x20] ss:$8 sps:$4 sm:$0xff]   ;;  %v9615_v39 = vld [vmem:[#allocation11 + $0xf8] ss:$24 sps:$4 sm:$0xff]  }
  0xa2   :  { %322 = vmatprep.subr.bf16.mxu0 %v9583_v5  ;;  %973 = vmatprep.subr.bf16.mxu1 %v9607_v12  ;;  %v9595_v18 = vld [vmem:[#allocation8 + $0x14] ss:$8 sps:$4 sm:$0xff]   ;;  %v9597_v21 = vld [vmem:[#allocation8 + $0x10] ss:$8 sps:$4 sm:$0xff]   ;;  %v9598_v22 = vld [vmem:[#allocation8 + $0x4] ss:$8 sps:$4 sm:$0xff]  }
  0xa3   :  { %v9618_v19 = vld [vmem:[#allocation11 + $0xf0] ss:$24 sps:$4 sm:$0xff]   ;;  %v9619_v20 = vld [vmem:[#allocation11 + $0xc4] ss:$24 sps:$4 sm:$0xff]   ;;  %v9624_v23 = vld [vmem:[#allocation11 + $0xc0] ss:$24 sps:$4 sm:$0xff]  }
  0xa4   :  { %v9625_v24 = vld [vmem:[#allocation11 + $0x94] ss:$24 sps:$4 sm:$0xff]   ;;  %v9600_v25 = vld [vmem:[#allocation8] ss:$8 sps:$4 sm:$0xff]   ;;  %v9627_v47 = vld [vmem:[#allocation11 + $0x98] ss:$24 sps:$4 sm:$0xff]  }
  0xa5   :  { %323 = vmatpush1.bf16.msra.mxu0 %v9585_v6  ;;  %974 = vmatpush1.bf16.msra.mxu1 %v9612_v15  ;;  %v9605_v27 = vld [vmem:[#allocation11 + $0x15c] ss:$24 sps:$4 sm:$0xff]   ;;  %v9630_v28 = vld [vmem:[#allocation11 + $0x90] ss:$24 sps:$4 sm:$0xff]   ;;  %v9611_v32 = vld [vmem:[#allocation11 + $0x12c] ss:$24 sps:$4 sm:$0xff]  }
  0xa6   :  { %324 = vmatprep.subr.bf16.mxu0 %v9586_v7  ;;  %975 = vmatprep.subr.bf16.mxu1 %v9613_v16  ;;  %v9631_v29 = vld [vmem:[#allocation11 + $0x64] ss:$24 sps:$4 sm:$0xff]   ;;  %v9636_v33 = vld [vmem:[#allocation11 + $0x60] ss:$24 sps:$4 sm:$0xff]   ;;  %v9637_v34 = vld [vmem:[#allocation11 + $0x34] ss:$24 sps:$4 sm:$0xff]  }
  0xa7   :  { %v9609_v35 = vld [vmem:[#allocation11 + $0x128] ss:$24 sps:$4 sm:$0xff]   ;;  %v9617_v36 = vld [vmem:[#allocation11 + $0xfc] ss:$24 sps:$4 sm:$0xff]   ;;  %v9623_v40 = vld [vmem:[#allocation11 + $0xcc] ss:$24 sps:$4 sm:$0xff]  }
  0xa8   :  { %v9642_v37 = vld [vmem:[#allocation11 + $0x30] ss:$24 sps:$4 sm:$0xff]   ;;  %v9643_v38 = vld [vmem:[#allocation11 + $0x4] ss:$24 sps:$4 sm:$0xff]   ;;  %v9648_v41 = vld [vmem:[#allocation11] ss:$24 sps:$4 sm:$0xff]  }
  0xa9   :  { %325 = vmatpush1.bf16.msra.mxu0 %v9588_v8  ;;  %976 = vmatpush1.bf16.msra.mxu1 %v9618_v19  ;;  %v9649_v42 = vld [vmem:[#allocation11 + $0x2d4] ss:$24 sps:$4 sm:$0xff]   ;;  %v9621_v43 = vld [vmem:[#allocation11 + $0xc8] ss:$24 sps:$4 sm:$0xff]   ;;  %v9655_v46 = vld [vmem:[#allocation11 + $0x2a4] ss:$24 sps:$4 sm:$0xff]  }
  0xaa   :  { %326 = vmatprep.subr.bf16.mxu0 %v9589_v10  ;;  %977 = vmatprep.subr.bf16.mxu1 %v9619_v20  ;;  %v9629_v44 = vld [vmem:[#allocation11 + $0x9c] ss:$24 sps:$4 sm:$0xff]   ;;  %v9654_v45 = vld [vmem:[#allocation11 + $0x2d0] ss:$24 sps:$4 sm:$0xff]   ;;  %v9660_v48 = vld [vmem:[#allocation11 + $0x2a0] ss:$24 sps:$4 sm:$0xff]  }
  0xab   :  { %v9635_v49 = vld [vmem:[#allocation11 + $0x6c] ss:$24 sps:$4 sm:$0xff]   ;;  %v9633_v51 = vld [vmem:[#allocation11 + $0x68] ss:$24 sps:$4 sm:$0xff]   ;;  %v9641_v53 = vld [vmem:[#allocation11 + $0x3c] ss:$24 sps:$4 sm:$0xff]  }
  0xac   :  { %v9661_v50 = vld [vmem:[#allocation11 + $0x274] ss:$24 sps:$4 sm:$0xff]   ;;  %v9666_v52 = vld [vmem:[#allocation11 + $0x270] ss:$24 sps:$4 sm:$0xff]   ;;  %v9667_v54 = vld [vmem:[#allocation11 + $0x244] ss:$24 sps:$4 sm:$0xff]  }
  0xad   :  { %327 = vmatpush1.bf16.msra.mxu0 %v9591_v13  ;;  %978 = vmatpush1.bf16.msra.mxu1 %v9624_v23  ;;  %v9639_v55 = vld [vmem:[#allocation11 + $0x38] ss:$24 sps:$4 sm:$0xff]   ;;  %v9647_v57 = vld [vmem:[#allocation11 + $0xc] ss:$24 sps:$4 sm:$0xff]   ;;  %v9645_v59 = vld [vmem:[#allocation11 + $0x8] ss:$24 sps:$4 sm:$0xff]  }
  0xae   :  { %328 = vmatprep.subr.bf16.mxu0 %v9592_v14  ;;  %979 = vmatprep.subr.bf16.mxu1 %v9625_v24  ;;  %v9672_v56 = vld [vmem:[#allocation11 + $0x240] ss:$24 sps:$4 sm:$0xff]   ;;  %v9673_v58 = vld [vmem:[#allocation11 + $0x214] ss:$24 sps:$4 sm:$0xff]   ;;  %v9678_v60 = vld [vmem:[#allocation11 + $0x210] ss:$24 sps:$4 sm:$0xff]  }
  0xaf   :  { %v9653_v61 = vld [vmem:[#allocation11 + $0x2dc] ss:$24 sps:$4 sm:$0xff]   ;;  %v9651_v63 = vld [vmem:[#allocation11 + $0x2d8] ss:$24 sps:$4 sm:$0xff]   ;;  %v9659_v1 = vld [vmem:[#allocation11 + $0x2ac] ss:$24 sps:$4 sm:$0xff]  }
  0xb0   :  { %v9679_v62 = vld [vmem:[#allocation11 + $0x1e4] ss:$24 sps:$4 sm:$0xff]   ;;  %v9684_v0 = vld [vmem:[#allocation11 + $0x1e0] ss:$24 sps:$4 sm:$0xff]   ;;  %v9685_v11 = vld [vmem:[#allocation11 + $0x1b4] ss:$24 sps:$4 sm:$0xff]  }
  0xb1   :  { %329 = vmatpush1.bf16.msra.mxu0 %v9594_v17  ;;  %980 = vmatpush1.bf16.msra.mxu1 %v9630_v28  ;;  %v9657_v2 = vld [vmem:[#allocation11 + $0x2a8] ss:$24 sps:$4 sm:$0xff]   ;;  %v9665_v3 = vld [vmem:[#allocation11 + $0x27c] ss:$24 sps:$4 sm:$0xff]   ;;  %v9663_v4 = vld [vmem:[#allocation11 + $0x278] ss:$24 sps:$4 sm:$0xff]  }
  0xb2   :  { %330 = vmatprep.subr.bf16.mxu0 %v9595_v18  ;;  %981 = vmatprep.subr.bf16.mxu1 %v9631_v29  ;;  %v9671_v5 = vld [vmem:[#allocation11 + $0x24c] ss:$24 sps:$4 sm:$0xff]   ;;  %v9669_v6 = vld [vmem:[#allocation11 + $0x248] ss:$24 sps:$4 sm:$0xff]   ;;  %v9677_v7 = vld [vmem:[#allocation11 + $0x21c] ss:$24 sps:$4 sm:$0xff]  }
  0xb3   :  { %v9675_v8 = vld [vmem:[#allocation11 + $0x218] ss:$24 sps:$4 sm:$0xff]   ;;  %v9683_v9 = vld [vmem:[#allocation11 + $0x1ec] ss:$24 sps:$4 sm:$0xff]   ;;  %v9681_v10 = vld [vmem:[#allocation11 + $0x1e8] ss:$24 sps:$4 sm:$0xff]  }
  0xb4   :  { %v9689_v12 = vld [vmem:[#allocation11 + $0x1bc] ss:$24 sps:$4 sm:$0xff]   ;;  %v9687_v13 = vld [vmem:[#allocation11 + $0x1b8] ss:$24 sps:$4 sm:$0xff]   ;;  %v9695_v16 = vld [vmem:[#allocation11 + $0x18c] ss:$24 sps:$4 sm:$0xff]  }
  0xb5   :  { %331 = vmatpush1.bf16.msra.mxu0 %v9597_v21  ;;  %982 = vmatpush1.bf16.msra.mxu1 %v9636_v33  ;;  %v9690_v14 = vld [vmem:[#allocation11 + $0x1b0] ss:$24 sps:$4 sm:$0xff]   ;;  %v9691_v15 = vld [vmem:[#allocation11 + $0x184] ss:$24 sps:$4 sm:$0xff]   ;;  %v9696_v18 = vld [vmem:[#allocation11 + $0x180] ss:$24 sps:$4 sm:$0xff]   ;;  %v228_v21 = vlaneseq }
  0xb6   :  { %332 = vmatprep.subr.bf16.mxu0 %v9598_v22  ;;  %983 = vmatprep.subr.bf16.mxu1 %v9637_v34  ;;  %v9693_v17 = vld [vmem:[#allocation11 + $0x188] ss:$24 sps:$4 sm:$0xff]   ;;  %v9699_v19 = vld [vmem:[#allocation11 + $0x164] ss:$24 sps:$4 sm:$0xff]   ;;  %v1095_v29 = vld [vmem:[#allocation2 + $0x8] sm:$0xff]  ;;  %s11359_s10 = smov [#allocation23]  }
  0xb7   :  { %v9702_v20 = vld [vmem:[#allocation14 + $0x154] ss:$24 sps:$4 sm:$0xff]   ;;  %v11478_v22 = vshrl.u32 %v228_v21, 7  ;;  %v226_v23 = vld [vmem:[#allocation10] sm:$0x3]  ;;  %s8318_s12 = sshll.u32 %s11359_s10, 4  ;;  %s8319_s12 = int_to_ptr.vmem [resolvable:$true] %s8318_s12 }
  0xb8   :  { %v9763_v21 = vld [vmem:[#allocation11 + $0x250] ss:$24 sps:$4 sm:$0xff]   ;;  %s11303_s5 = scalar_lea.vmem %s8319_s12, 128  ;;  %p11308_p10 = scmp.lt.s32.totalorder %s8319_s12, %s8319_s12 }
  0xb9   :  { %333 = vmatpush1.bf16.msra.mxu0 %v9600_v25  ;;  %984 = vmatpush1.bf16.msra.mxu1 %v9642_v37  ;;  %v11481_v24 = vsub.s32 0, %v11478_v22  ;;  %v11484_v25 = vsub.s32 1, %v11478_v22  ;;  %v1111_v37 = vmax.f32 %v1095_v29, 0.0  ;;  %v9772_v29 = vld [vmem:[#allocation14 + $0x210] ss:$24 sps:$4 sm:$0xff]   ;;  %p11304_p9 = scmp.ne.s32.totalorder %s8319_s12, %s11303_s5  ;;  %p11309_p11 = scmp.lt.s32.totalorder %s11303_s5, %s11303_s5 }
  0xba   :  { %1012 = vmatprep.subr.bf16.mxu0 %v9605_v27  ;;  %985 = vmatprep.subr.bf16.mxu1 %v9643_v38 }
  0xbb   :  { %v231_v26 = vrot.slane %v226_v23, %v11481_v24  ;;  %v235_v27 = vrot.slane %v226_v23, %v11484_v25  ;;  %v9766_v23 = vld [vmem:[#allocation14 + $0x240] ss:$24 sps:$4 sm:$0xff]   ;;  %p11310_p12 = por %p11309_p11, %p11308_p10 }
  0xbc   :  { %351 = vmatmul.mubr.bf16.vlgmr.msra.gmra.mxu0 %v209_v30 }
  0xbd   :  { %1013 = vmatpush1.bf16.msra.mxu0 %v9603_v31  ;;  %986 = vmatpush1.bf16.msra.mxu1 %v9648_v41  ;;  %p11311_p13 = pnand %p11310_p12, %p11304_p9 }
  0xbe   :  { %1014 = vmatprep.subr.bf16.mxu0 %v9611_v32  ;;  %987 = vmatprep.subr.bf16.mxu1 %v9649_v42  ;;  %v9705_v42 = vld [vmem:[#allocation11 + $0x134] ss:$24 sps:$4 sm:$0xff]  }
  0xc1   :  { %1015 = vmatpush1.bf16.msra.mxu0 %v9609_v35  ;;  %988 = vmatpush2.bf16.msra.mxu1 %v9654_v45  ;;  %v9703_v45 = vld [vmem:[#allocation11 + $0x130] ss:$24 sps:$4 sm:$0xff]  }
  0xc2   :  { %1016 = vmatprep.subr.bf16.mxu0 %v9617_v36  ;;  %989 = vmatprep.subr.bf16.mxu1 %v9655_v46  ;;  %v9697_v36 = vld [vmem:[#allocation11 + $0x160] ss:$24 sps:$4 sm:$0xff]  }
  0xc3   :  { %v9706_v46 = vld [vmem:[#allocation14 + $0x120] ss:$24 sps:$4 sm:$0xff]  }
  0xc5   :  { %1017 = vmatpush1.bf16.msra.mxu0 %v9615_v39  ;;  %990 = vmatpush2.bf16.msra.mxu1 %v9660_v48  ;;  %v9700_v39 = vld [vmem:[#allocation14 + $0x150] ss:$24 sps:$4 sm:$0xff]   ;;  %v9714_v48 = vld [vmem:[#allocation14 + $0xf4] ss:$24 sps:$4 sm:$0xff]  }
  0xc6   :  { %1018 = vmatprep.subr.bf16.mxu0 %v9623_v40  ;;  %991 = vmatprep.subr.bf16.mxu1 %v9661_v50  ;;  %v9712_v50 = vld [vmem:[#allocation14 + $0xf0] ss:$24 sps:$4 sm:$0xff]  }
  0xc9   :  { %1019 = vmatpush1.bf16.msra.mxu0 %v9621_v43  ;;  %992 = vmatpush2.bf16.msra.mxu1 %v9666_v52  ;;  %v9708_v43 = vld [vmem:[#allocation14 + $0x124] ss:$24 sps:$4 sm:$0xff]  }
  0xca   :  { %1020 = vmatprep.subr.bf16.mxu0 %v9629_v44  ;;  %993 = vmatprep.subr.bf16.mxu1 %v9667_v54  ;;  %v11490_v44 = vpack.c.bf16 %v1111_v37, %v1111_v37  ;;  %v9720_v52 = vld [vmem:[#allocation14 + $0xc4] ss:$24 sps:$4 sm:$0xff]   ;;  %v9718_v54 = vld [vmem:[#allocation14 + $0xc0] ss:$24 sps:$4 sm:$0xff]   ;;  %v9784_v37 = vld [vmem:[#allocation14 + $0x1b0] ss:$24 sps:$4 sm:$0xff]  }
  0xcd   :  { %1021 = vmatpush1.bf16.msra.mxu0 %v9627_v47  ;;  %994 = vmatpush2.bf16.msra.mxu1 %v9672_v56  ;;  %v9711_v47 = vld [vmem:[#allocation11 + $0x104] ss:$24 sps:$4 sm:$0xff]  }
  0xce   :  { %1022 = vmatprep.subr.bf16.mxu0 %v9635_v49  ;;  %995 = vmatprep.subr.bf16.mxu1 %v9673_v58  ;;  %v9709_v49 = vld [vmem:[#allocation11 + $0x100] ss:$24 sps:$4 sm:$0xff]  }
  0xcf   :  { %v9726_v56 = vld [vmem:[#allocation14 + $0x94] ss:$24 sps:$4 sm:$0xff]   ;;  %v9724_v58 = vld [vmem:[#allocation14 + $0x90] ss:$24 sps:$4 sm:$0xff]  }
  0xd1   :  { %1023 = vmatpush1.bf16.msra.mxu0 %v9633_v51  ;;  %996 = vmatpush2.bf16.msra.mxu1 %v9678_v60  ;;  %v9717_v51 = vld [vmem:[#allocation11 + $0xd4] ss:$24 sps:$4 sm:$0xff]  }
  0xd2   :  { %1024 = vmatprep.subr.bf16.mxu0 %v9641_v53  ;;  %997 = vmatprep.subr.bf16.mxu1 %v9679_v62  ;;  %v9715_v53 = vld [vmem:[#allocation11 + $0xd0] ss:$24 sps:$4 sm:$0xff]  }
  0xd3   :  { %v9732_v60 = vld [vmem:[#allocation14 + $0x64] ss:$24 sps:$4 sm:$0xff]   ;;  %v9730_v62 = vld [vmem:[#allocation14 + $0x60] ss:$24 sps:$4 sm:$0xff]  }
  0xd5   :  { %1025 = vmatpush1.bf16.msra.mxu0 %v9639_v55  ;;  %998 = vmatpush2.bf16.msra.mxu1 %v9684_v0  ;;  %v9723_v55 = vld [vmem:[#allocation11 + $0xa4] ss:$24 sps:$4 sm:$0xff]  }
  0xd6   :  { %1026 = vmatprep.subr.bf16.mxu0 %v9647_v57  ;;  %999 = vmatprep.subr.bf16.mxu1 %v9685_v11  ;;  %v9721_v57 = vld [vmem:[#allocation11 + $0xa0] ss:$24 sps:$4 sm:$0xff]   ;;  %v9753_v11 = vld [vmem:[#allocation11 + $0x2b4] ss:$24 sps:$4 sm:$0xff]  }
  0xd7   :  { %v9738_v0 = vld [vmem:[#allocation14 + $0x34] ss:$24 sps:$4 sm:$0xff]  }
  0xd9   :  { %1027 = vmatpush1.bf16.msra.mxu0 %v9645_v59  ;;  %1000 = vmatpush2.bf16.msra.mxu1 %v9690_v14  ;;  %v9729_v59 = vld [vmem:[#allocation11 + $0x74] ss:$24 sps:$4 sm:$0xff]   ;;  %v9754_v14 = vld [vmem:[#allocation14 + $0x2a0] ss:$24 sps:$4 sm:$0xff]  }
  0xda   :  { %1028 = vmatprep.subr.bf16.mxu0 %v9653_v61  ;;  %1001 = vmatprep.subr.bf16.mxu1 %v9691_v15  ;;  %v9727_v61 = vld [vmem:[#allocation11 + $0x70] ss:$24 sps:$4 sm:$0xff]   ;;  %v9759_v15 = vld [vmem:[#allocation11 + $0x284] ss:$24 sps:$4 sm:$0xff]  }
  0xdd   :  { %1029 = vmatpush2.bf16.msra.mxu0 %v9651_v63  ;;  %1002 = vmatpush2.bf16.msra.mxu1 %v9696_v18  ;;  %v9735_v63 = vld [vmem:[#allocation11 + $0x44] ss:$24 sps:$4 sm:$0xff]   ;;  %v9760_v18 = vld [vmem:[#allocation14 + $0x270] ss:$24 sps:$4 sm:$0xff]  }
  0xde   :  { %1030 = vmatprep.subr.bf16.mxu0 %v9659_v1  ;;  %1053 = vmatprep.subr.bf16.mxu1 %v9699_v19  ;;  %v9733_v1 = vld [vmem:[#allocation11 + $0x40] ss:$24 sps:$4 sm:$0xff]   ;;  %v9765_v19 = vld [vmem:[#allocation11 + $0x254] ss:$24 sps:$4 sm:$0xff]  }
  0xe1   :  { %1031 = vmatpush2.bf16.msra.mxu0 %v9657_v2  ;;  %v9736_v2 = vld [vmem:[#allocation14 + $0x30] ss:$24 sps:$4 sm:$0xff]  }
  0xe2   :  { %1032 = vmatprep.subr.bf16.mxu0 %v9665_v3  ;;  %v9741_v3 = vld [vmem:[#allocation11 + $0x14] ss:$24 sps:$4 sm:$0xff]  }
  0xe5   :  { %1033 = vmatpush2.bf16.msra.mxu0 %v9663_v4  ;;  %v9744_v4 = vld [vmem:[#allocation14 + $0x4] ss:$24 sps:$4 sm:$0xff]  }
  0xe6   :  { %1034 = vmatprep.subr.bf16.mxu0 %v9671_v5  ;;  %v9739_v5 = vld [vmem:[#allocation11 + $0x10] ss:$24 sps:$4 sm:$0xff]  }
  0xe9   :  { %1035 = vmatpush2.bf16.msra.mxu0 %v9669_v6  ;;  %v9742_v6 = vld [vmem:[#allocation14] ss:$24 sps:$4 sm:$0xff]  }
  0xea   :  { %1036 = vmatprep.subr.bf16.mxu0 %v9677_v7  ;;  %v9747_v7 = vld [vmem:[#allocation11 + $0x2e4] ss:$24 sps:$4 sm:$0xff]  }
  0xed   :  { %1037 = vmatpush2.bf16.msra.mxu0 %v9675_v8  ;;  %v9750_v8 = vld [vmem:[#allocation14 + $0x2d4] ss:$24 sps:$4 sm:$0xff]  }
  0xee   :  { %1038 = vmatprep.subr.bf16.mxu0 %v9683_v9  ;;  %v9745_v9 = vld [vmem:[#allocation11 + $0x2e0] ss:$24 sps:$4 sm:$0xff]  }
  0xf1   :  { %1039 = vmatpush2.bf16.msra.mxu0 %v9681_v10  ;;  %v9748_v10 = vld [vmem:[#allocation14 + $0x2d0] ss:$24 sps:$4 sm:$0xff]  }
  0xf2   :  { %1040 = vmatprep.subr.bf16.mxu0 %v9689_v12  ;;  %v9756_v12 = vld [vmem:[#allocation14 + $0x2a4] ss:$24 sps:$4 sm:$0xff]  }
  0xf5   :  { %1041 = vmatpush2.bf16.msra.mxu0 %v9687_v13  ;;  %v9751_v13 = vld [vmem:[#allocation11 + $0x2b0] ss:$24 sps:$4 sm:$0xff]  }
  0xf6   :  { %1042 = vmatprep.subr.bf16.mxu0 %v9695_v16  ;;  %v9762_v16 = vld [vmem:[#allocation14 + $0x274] ss:$24 sps:$4 sm:$0xff]  }
  0xf9   :  { %1043 = vmatpush2.bf16.msra.mxu0 %v9693_v17  ;;  %v9757_v17 = vld [vmem:[#allocation11 + $0x280] ss:$24 sps:$4 sm:$0xff]  }
  0xfa   :  { %5782 = vmatprep.subr.bf16.mxu0 %v9702_v20  ;;  %v9768_v20 = vld [vmem:[#allocation14 + $0x244] ss:$24 sps:$4 sm:$0xff]  }
 0x17c   :  { %v352_v28 = vpop.f32.mrf.mxu0 }
 0x17d   :  { %v353_v30 = vadd.f32 %v352_v28, %v231_v26  ;;  %v9771_v26 = vld [vmem:[#allocation11 + $0x224] ss:$24 sps:$4 sm:$0xff]   ;;  %v9769_v28 = vld [vmem:[#allocation11 + $0x220] ss:$24 sps:$4 sm:$0xff]  }
 0x17e   :  { %v354_v31 = vpop.f32.mrf.mxu0 }
 0x17f   :  { %v355_v32 = vadd.f32 %v354_v31, %v235_v27  ;;  %v359_v33 = vmax.f32 %v353_v30, 0.0  ;;  %v9774_v27 = vld [vmem:[#allocation14 + $0x214] ss:$24 sps:$4 sm:$0xff]   ;;  %v9780_v31 = vld [vmem:[#allocation14 + $0x1e4] ss:$24 sps:$4 sm:$0xff]  }
 0x180   :  { %v356_v34 = vpop.f32.mrf.mxu0  ;;  %v9777_v30 = vld [vmem:[#allocation11 + $0x1f4] ss:$24 sps:$4 sm:$0xff]  }
 0x181   :  { %v360_v35 = vmax.f32 %v355_v32, 0.0  ;;  %v11488_v41 = vpack.c.bf16 %v359_v33, %v359_v33  ;;  %v9775_v32 = vld [vmem:[#allocation11 + $0x1f0] ss:$24 sps:$4 sm:$0xff]   ;;  %v9783_v34 = vld [vmem:[#allocation11 + $0x1c4] ss:$24 sps:$4 sm:$0xff]  }
 0x182   :  { %v357_v38 = vpop.f32.mrf.mxu0  ;;  %v9778_v33 = vld [vmem:[#allocation14 + $0x1e0] ss:$24 sps:$4 sm:$0xff]  }
 0x183   :  { %v362_v40 = vpack.c.bf16 %v360_v35, %v360_v35  ;;  %v9786_v35 = vld [vmem:[#allocation14 + $0x1b4] ss:$24 sps:$4 sm:$0xff]  }
 0x184   :  { %v9789_v38 = vld [vmem:[#allocation11 + $0x194] ss:$24 sps:$4 sm:$0xff]  }
 0x185   :  { %1003 = vmatprep.mubr.bf16.mxu1 %v362_v40  ;;  %1044 = vmatprep.mubr.bf16.mxu0 %v362_v40 }
 0x186   :  { %1004 = vmatmul.mubr.bf16.vlgmr.msra.gmra.mxu1 %v11488_v41  ;;  %1045 = vmatmul.mubr.bf16.vlgmr.msra.gmra.mxu0 %v11488_v41 }
 0x187   :  { %1054 = vmatpush1.bf16.msra.mxu1 %v9697_v36  ;;  %5783 = vmatpush1.bf16.msra.mxu0 %v9700_v39  ;;  %v9781_v36 = vld [vmem:[#allocation11 + $0x1c0] ss:$24 sps:$4 sm:$0xff]  }
 0x188   :  { %1085 = vmatprep.mubr.bf16.mxu1 %v362_v40  ;;  %1055 = vmatprep.subr.bf16.mxu1 %v9705_v42  ;;  %v9792_v39 = vld [vmem:[#allocation14 + $0x184] ss:$24 sps:$4 sm:$0xff]  }
 0x189   :  { %5784 = vmatprep.subr.bf16.mxu0 %v9708_v43  ;;  %5814 = vmatprep.mubr.bf16.mxu0 %v11490_v44  ;;  %v1094_v40 = vld [vmem:[#allocation2] sm:$0xff]  ;;  %v1097_v42 = vld [vmem:[#allocation2 + $0x18] sm:$0xff]  ;;  %v1099_v43 = vld [vmem:[#allocation2 + $0x28] sm:$0xff] }
 0x18b   :  { %1056 = vmatpush1.bf16.msra.mxu1 %v9703_v45  ;;  %5785 = vmatpush1.bf16.msra.mxu0 %v9706_v46  ;;  %v1110_v45 = vmax.f32 %v1094_v40, 0.0  ;;  %v9787_v46 = vld [vmem:[#allocation11 + $0x190] ss:$24 sps:$4 sm:$0xff]  }
 0x18c   :  { %1057 = vmatprep.subr.bf16.mxu1 %v9711_v47  ;;  %5786 = vmatprep.subr.bf16.mxu0 %v9714_v48  ;;  %v9790_v47 = vld [vmem:[#allocation14 + $0x180] ss:$24 sps:$4 sm:$0xff]   ;;  %v9795_v48 = vld [vmem:[#allocation14 + $0x454] ss:$24 sps:$4 sm:$0xff]  }
 0x18d   :  { %v9870_v40 = vld [vmem:[#allocation14 + $0x814] ss:$24 sps:$4 sm:$0xff]  }
 0x18f   :  { %1058 = vmatpush1.bf16.msra.mxu1 %v9709_v49  ;;  %5787 = vmatpush1.bf16.msra.mxu0 %v9712_v50  ;;  %v9798_v49 = vld [vmem:[#allocation14 + $0x754] ss:$24 sps:$4 sm:$0xff]   ;;  %v9793_v50 = vld [vmem:[#allocation14 + $0x450] ss:$24 sps:$4 sm:$0xff]  }
 0x190   :  { %1059 = vmatprep.subr.bf16.mxu1 %v9717_v51  ;;  %5788 = vmatprep.subr.bf16.mxu0 %v9720_v52  ;;  %v1113_v51 = vmax.f32 %v1097_v42, 0.0  ;;  %v1115_v52 = vmax.f32 %v1099_v43, 0.0  ;;  %v9865_v42 = vld [vmem:[#allocation14 + $0x510] ss:$24 sps:$4 sm:$0xff]  }
 0x191   :  { %v9868_v43 = vld [vmem:[#allocation14 + $0x810] ss:$24 sps:$4 sm:$0xff]  }
 0x193   :  { %1060 = vmatpush1.bf16.msra.mxu1 %v9715_v53  ;;  %5789 = vmatpush1.bf16.msra.mxu0 %v9718_v54  ;;  %v9796_v53 = vld [vmem:[#allocation14 + $0x750] ss:$24 sps:$4 sm:$0xff]   ;;  %v11495_v54 = vpack.c.bf16 %v1110_v45, %v1110_v45  ;;  %v9873_v45 = vld [vmem:[#allocation14 + $0x4e4] ss:$24 sps:$4 sm:$0xff]  }
 0x194   :  { %1061 = vmatprep.subr.bf16.mxu1 %v9723_v55  ;;  %5790 = vmatprep.subr.bf16.mxu0 %v9726_v56  ;;  %v9801_v55 = vld [vmem:[#allocation14 + $0x424] ss:$24 sps:$4 sm:$0xff]  }
 0x195   :  { %v9804_v56 = vld [vmem:[#allocation14 + $0x724] ss:$24 sps:$4 sm:$0xff]  }
 0x197   :  { %1062 = vmatpush1.bf16.msra.mxu1 %v9721_v57  ;;  %5791 = vmatpush1.bf16.msra.mxu0 %v9724_v58  ;;  %v9799_v57 = vld [vmem:[#allocation14 + $0x420] ss:$24 sps:$4 sm:$0xff]  }
 0x198   :  { %1063 = vmatprep.subr.bf16.mxu1 %v9729_v59  ;;  %5792 = vmatprep.subr.bf16.mxu0 %v9732_v60  ;;  %v9802_v58 = vld [vmem:[#allocation14 + $0x720] ss:$24 sps:$4 sm:$0xff]   ;;  %v11497_v59 = vpack.c.bf16 %v1113_v51, %v1113_v51  ;;  %v11499_v60 = vpack.c.bf16 %v1115_v52, %v1115_v52  ;;  %v9877_v51 = vld [vmem:[#allocation14 + $0x4b0] ss:$24 sps:$4 sm:$0xff]  }
 0x199   :  { %v9880_v52 = vld [vmem:[#allocation14 + $0x7b0] ss:$24 sps:$4 sm:$0xff]  }
 0x19b   :  { %1064 = vmatpush1.bf16.msra.mxu1 %v9727_v61  ;;  %5793 = vmatpush1.bf16.msra.mxu0 %v9730_v62  ;;  %v9807_v61 = vld [vmem:[#allocation14 + $0x3f4] ss:$24 sps:$4 sm:$0xff]  }
 0x19c   :  { %1065 = vmatprep.subr.bf16.mxu1 %v9735_v63  ;;  %5794 = vmatprep.subr.bf16.mxu0 %v9738_v0  ;;  %v9810_v62 = vld [vmem:[#allocation14 + $0x6f4] ss:$24 sps:$4 sm:$0xff]   ;;  %v9805_v63 = vld [vmem:[#allocation14 + $0x3f0] ss:$24 sps:$4 sm:$0xff]  }
 0x19d   :  { %v9808_v0 = vld [vmem:[#allocation14 + $0x6f0] ss:$24 sps:$4 sm:$0xff]  }
 0x19f   :  { %1066 = vmatpush1.bf16.msra.mxu1 %v9733_v1  ;;  %5795 = vmatpush1.bf16.msra.mxu0 %v9736_v2  ;;  %v9813_v1 = vld [vmem:[#allocation14 + $0x3c4] ss:$24 sps:$4 sm:$0xff]   ;;  %v9811_v2 = vld [vmem:[#allocation14 + $0x3c0] ss:$24 sps:$4 sm:$0xff]  }
 0x1a0   :  { %1067 = vmatprep.subr.bf16.mxu1 %v9741_v3  ;;  %5796 = vmatprep.subr.bf16.mxu0 %v9744_v4  ;;  %v9814_v3 = vld [vmem:[#allocation14 + $0x6c0] ss:$24 sps:$4 sm:$0xff]   ;;  %v9819_v4 = vld [vmem:[#allocation14 + $0x394] ss:$24 sps:$4 sm:$0xff]  }
 0x1a3   :  { %1068 = vmatpush1.bf16.msra.mxu1 %v9739_v5  ;;  %5797 = vmatpush1.bf16.msra.mxu0 %v9742_v6  ;;  %v9822_v5 = vld [vmem:[#allocation14 + $0x694] ss:$24 sps:$4 sm:$0xff]   ;;  %v9817_v6 = vld [vmem:[#allocation14 + $0x390] ss:$24 sps:$4 sm:$0xff]  }
 0x1a4   :  { %1069 = vmatprep.subr.bf16.mxu1 %v9747_v7  ;;  %5798 = vmatprep.subr.bf16.mxu0 %v9750_v8  ;;  %v9820_v7 = vld [vmem:[#allocation14 + $0x690] ss:$24 sps:$4 sm:$0xff]   ;;  %v9825_v8 = vld [vmem:[#allocation14 + $0x364] ss:$24 sps:$4 sm:$0xff]  }
 0x1a7   :  { %1070 = vmatpush2.bf16.msra.mxu1 %v9745_v9  ;;  %5799 = vmatpush2.bf16.msra.mxu0 %v9748_v10  ;;  %v9828_v9 = vld [vmem:[#allocation14 + $0x664] ss:$24 sps:$4 sm:$0xff]   ;;  %v9823_v10 = vld [vmem:[#allocation14 + $0x360] ss:$24 sps:$4 sm:$0xff]  }
 0x1a8   :  { %1071 = vmatprep.subr.bf16.mxu1 %v9753_v11  ;;  %5800 = vmatprep.subr.bf16.mxu0 %v9756_v12  ;;  %v9826_v11 = vld [vmem:[#allocation14 + $0x660] ss:$24 sps:$4 sm:$0xff]   ;;  %v9831_v12 = vld [vmem:[#allocation14 + $0x334] ss:$24 sps:$4 sm:$0xff]  }
 0x1ab   :  { %1072 = vmatpush2.bf16.msra.mxu1 %v9751_v13  ;;  %5801 = vmatpush2.bf16.msra.mxu0 %v9754_v14  ;;  %v9834_v13 = vld [vmem:[#allocation14 + $0x634] ss:$24 sps:$4 sm:$0xff]   ;;  %v9829_v14 = vld [vmem:[#allocation14 + $0x330] ss:$24 sps:$4 sm:$0xff]  }
 0x1ac   :  { %1073 = vmatprep.subr.bf16.mxu1 %v9759_v15  ;;  %5802 = vmatprep.subr.bf16.mxu0 %v9762_v16  ;;  %v9832_v15 = vld [vmem:[#allocation14 + $0x630] ss:$24 sps:$4 sm:$0xff]   ;;  %v9837_v16 = vld [vmem:[#allocation14 + $0x304] ss:$24 sps:$4 sm:$0xff]  }
 0x1af   :  { %1074 = vmatpush2.bf16.msra.mxu1 %v9757_v17  ;;  %5803 = vmatpush2.bf16.msra.mxu0 %v9760_v18  ;;  %v9840_v17 = vld [vmem:[#allocation14 + $0x604] ss:$24 sps:$4 sm:$0xff]   ;;  %v9835_v18 = vld [vmem:[#allocation14 + $0x300] ss:$24 sps:$4 sm:$0xff]  }
 0x1b0   :  { %1075 = vmatprep.subr.bf16.mxu1 %v9765_v19  ;;  %5804 = vmatprep.subr.bf16.mxu0 %v9768_v20  ;;  %v9838_v19 = vld [vmem:[#allocation14 + $0x600] ss:$24 sps:$4 sm:$0xff]   ;;  %v9843_v20 = vld [vmem:[#allocation14 + $0x5d4] ss:$24 sps:$4 sm:$0xff]  }
 0x1b3   :  { %1076 = vmatpush2.bf16.msra.mxu1 %v9763_v21  ;;  %5805 = vmatpush2.bf16.msra.mxu0 %v9766_v23  ;;  %v9846_v21 = vld [vmem:[#allocation14 + $0x8d4] ss:$24 sps:$4 sm:$0xff]   ;;  %v9841_v23 = vld [vmem:[#allocation14 + $0x5d0] ss:$24 sps:$4 sm:$0xff]  }
 0x1b4   :  { %1077 = vmatprep.subr.bf16.mxu1 %v9771_v26  ;;  %5806 = vmatprep.subr.bf16.mxu0 %v9774_v27  ;;  %v9844_v26 = vld [vmem:[#allocation14 + $0x8d0] ss:$24 sps:$4 sm:$0xff]   ;;  %v9849_v27 = vld [vmem:[#allocation14 + $0x5a4] ss:$24 sps:$4 sm:$0xff]  }
 0x1b7   :  { %1078 = vmatpush2.bf16.msra.mxu1 %v9769_v28  ;;  %5807 = vmatpush2.bf16.msra.mxu0 %v9772_v29  ;;  %v9852_v28 = vld [vmem:[#allocation14 + $0x8a4] ss:$24 sps:$4 sm:$0xff]   ;;  %v9847_v29 = vld [vmem:[#allocation14 + $0x5a0] ss:$24 sps:$4 sm:$0xff]  }
 0x1b8   :  { %1079 = vmatprep.subr.bf16.mxu1 %v9777_v30  ;;  %5808 = vmatprep.subr.bf16.mxu0 %v9780_v31  ;;  %v9850_v30 = vld [vmem:[#allocation14 + $0x8a0] ss:$24 sps:$4 sm:$0xff]   ;;  %v9855_v31 = vld [vmem:[#allocation14 + $0x574] ss:$24 sps:$4 sm:$0xff]  }
 0x1bb   :  { %1080 = vmatpush2.bf16.msra.mxu1 %v9775_v32  ;;  %5809 = vmatpush2.bf16.msra.mxu0 %v9778_v33  ;;  %v9858_v32 = vld [vmem:[#allocation14 + $0x874] ss:$24 sps:$4 sm:$0xff]   ;;  %v9853_v33 = vld [vmem:[#allocation14 + $0x570] ss:$24 sps:$4 sm:$0xff]  }
 0x1bc   :  { %1081 = vmatprep.subr.bf16.mxu1 %v9783_v34  ;;  %5810 = vmatprep.subr.bf16.mxu0 %v9786_v35  ;;  %v9856_v34 = vld [vmem:[#allocation14 + $0x870] ss:$24 sps:$4 sm:$0xff]   ;;  %v9861_v35 = vld [vmem:[#allocation14 + $0x544] ss:$24 sps:$4 sm:$0xff]  }
 0x1bf   :  { %1082 = vmatpush2.bf16.msra.mxu1 %v9781_v36  ;;  %5811 = vmatpush2.bf16.msra.mxu0 %v9784_v37  ;;  %v9864_v36 = vld [vmem:[#allocation14 + $0x844] ss:$24 sps:$4 sm:$0xff]   ;;  %v9859_v37 = vld [vmem:[#allocation14 + $0x540] ss:$24 sps:$4 sm:$0xff]  }
 0x1c0   :  { %1083 = vmatprep.subr.bf16.mxu1 %v9789_v38  ;;  %5812 = vmatprep.subr.bf16.mxu0 %v9792_v39  ;;  %v9862_v38 = vld [vmem:[#allocation14 + $0x840] ss:$24 sps:$4 sm:$0xff]   ;;  %v9867_v39 = vld [vmem:[#allocation14 + $0x514] ss:$24 sps:$4 sm:$0xff]  }
 0x1c3   :  { %1084 = vmatpush2.bf16.msra.mxu1 %v9787_v46  ;;  %5813 = vmatpush2.bf16.msra.mxu0 %v9790_v47  ;;  %v9876_v46 = vld [vmem:[#allocation14 + $0x7e4] ss:$24 sps:$4 sm:$0xff]   ;;  %v9871_v47 = vld [vmem:[#allocation14 + $0x4e0] ss:$24 sps:$4 sm:$0xff]  }
 0x1c4   :  { %5823 = vmatprep.subr.bf16.mxu1 %v9795_v48  ;;  %5864 = vmatprep.subr.bf16.mxu0 %v9798_v49  ;;  %v9874_v48 = vld [vmem:[#allocation14 + $0x7e0] ss:$24 sps:$4 sm:$0xff]   ;;  %v9879_v49 = vld [vmem:[#allocation14 + $0x4b4] ss:$24 sps:$4 sm:$0xff]  }
 0x1c6   :  { %1086 = vmatmul.mubr.bf16.vlgmr.msra.gmra.mxu1 %v11488_v41  ;;  %5815 = vmatmul.mubr.bf16.vlgmr.msra.gmra.mxu0 %v11495_v54  ;;  %v9816_v41 = vld [vmem:[#allocation14 + $0x6c4] ss:$24 sps:$4 sm:$0xff]  }
 0x1c7   :  { %5824 = vmatpush1.bf16.msra.mxu1 %v9793_v50  ;;  %5865 = vmatpush1.bf16.msra.mxu0 %v9796_v53  ;;  %v9882_v50 = vld [vmem:[#allocation14 + $0x7b4] ss:$24 sps:$4 sm:$0xff]   ;;  %v9885_v53 = vld [vmem:[#allocation14 + $0x484] ss:$24 sps:$4 sm:$0xff]  }
 0x1c8   :  { %5825 = vmatprep.subr.bf16.mxu1 %v9801_v55  ;;  %5866 = vmatprep.subr.bf16.mxu0 %v9804_v56  ;;  %v9888_v55 = vld [vmem:[#allocation14 + $0x784] ss:$24 sps:$4 sm:$0xff]   ;;  %v1096_v56 = vld [vmem:[#allocation2 + $0x10] sm:$0xff] }
 0x1c9   :  { %5855 = vmatprep.mubr.bf16.mxu1 %v11497_v59  ;;  %5896 = vmatprep.mubr.bf16.mxu0 %v11499_v60 }
 0x1cb   :  { %5826 = vmatpush1.bf16.msra.mxu1 %v9799_v57  ;;  %5867 = vmatpush1.bf16.msra.mxu0 %v9802_v58  ;;  %v1098_v57 = vld [vmem:[#allocation2 + $0x20] sm:$0xff]  ;;  %v1101_v58 = vld [vmem:[#allocation2 + $0x38] sm:$0xff] }
 0x1cc   :  { %5827 = vmatprep.subr.bf16.mxu1 %v9807_v61  ;;  %5868 = vmatprep.subr.bf16.mxu0 %v9810_v62  ;;  %v1103_v61 = vld [vmem:[#allocation2 + $0x48] sm:$0xff]  ;;  %v1112_v62 = vmax.f32 %v1096_v56, 0.0 }
 0x1cd   :  { %v9952_v56 = vld [vmem:[#allocation14 + $0xe70] ss:$24 sps:$4 sm:$0xff]  }
 0x1cf   :  { %5828 = vmatpush1.bf16.msra.mxu1 %v9805_v63  ;;  %5869 = vmatpush1.bf16.msra.mxu0 %v9808_v0  ;;  %v1114_v63 = vmax.f32 %v1098_v57, 0.0  ;;  %v9883_v0 = vld [vmem:[#allocation14 + $0x480] ss:$24 sps:$4 sm:$0xff]   ;;  %v9957_v57 = vld [vmem:[#allocation14 + $0xb44] ss:$24 sps:$4 sm:$0xff]  }
 0x1d0   :  { %5829 = vmatprep.subr.bf16.mxu1 %v9813_v1  ;;  %5870 = vmatprep.subr.bf16.mxu0 %v9816_v41  ;;  %v9886_v1 = vld [vmem:[#allocation14 + $0x780] ss:$24 sps:$4 sm:$0xff]   ;;  %v9891_v41 = vld [vmem:[#allocation14 + $0xa54] ss:$24 sps:$4 sm:$0xff]  }
 0x1d3   :  { %5830 = vmatpush1.bf16.msra.mxu1 %v9811_v2  ;;  %5871 = vmatpush1.bf16.msra.mxu0 %v9814_v3  ;;  %v9894_v2 = vld [vmem:[#allocation14 + $0xd54] ss:$24 sps:$4 sm:$0xff]   ;;  %v9889_v3 = vld [vmem:[#allocation14 + $0xa50] ss:$24 sps:$4 sm:$0xff]  }
 0x1d4   :  { %5831 = vmatprep.subr.bf16.mxu1 %v9819_v4  ;;  %5872 = vmatprep.subr.bf16.mxu0 %v9822_v5  ;;  %v1117_v4 = vmax.f32 %v1101_v58, 0.0  ;;  %v1119_v5 = vmax.f32 %v1103_v61, 0.0  ;;  %v9960_v58 = vld [vmem:[#allocation14 + $0xe44] ss:$24 sps:$4 sm:$0xff]   ;;  %v9955_v61 = vld [vmem:[#allocation14 + $0xb40] ss:$24 sps:$4 sm:$0xff]  }
 0x1d7   :  { %5832 = vmatpush1.bf16.msra.mxu1 %v9817_v6  ;;  %5873 = vmatpush1.bf16.msra.mxu0 %v9820_v7  ;;  %v11505_v6 = vpack.c.bf16 %v1112_v62, %v1112_v62  ;;  %v9892_v7 = vld [vmem:[#allocation14 + $0xd50] ss:$24 sps:$4 sm:$0xff]   ;;  %v9958_v62 = vld [vmem:[#allocation14 + $0xe40] ss:$24 sps:$4 sm:$0xff]  }
 0x1d8   :  { %5833 = vmatprep.subr.bf16.mxu1 %v9825_v8  ;;  %5874 = vmatprep.subr.bf16.mxu0 %v9828_v9  ;;  %v11507_v8 = vpack.c.bf16 %v1114_v63, %v1114_v63  ;;  %v9897_v9 = vld [vmem:[#allocation14 + $0xa24] ss:$24 sps:$4 sm:$0xff]   ;;  %v9963_v63 = vld [vmem:[#allocation14 + $0xb14] ss:$24 sps:$4 sm:$0xff]  }
 0x1db   :  { %5834 = vmatpush1.bf16.msra.mxu1 %v9823_v10  ;;  %5875 = vmatpush1.bf16.msra.mxu0 %v9826_v11  ;;  %v9900_v10 = vld [vmem:[#allocation14 + $0xd24] ss:$24 sps:$4 sm:$0xff]   ;;  %v9895_v11 = vld [vmem:[#allocation14 + $0xa20] ss:$24 sps:$4 sm:$0xff]  }
 0x1dc   :  { %5835 = vmatprep.subr.bf16.mxu1 %v9831_v12  ;;  %5876 = vmatprep.subr.bf16.mxu0 %v9834_v13  ;;  %v9898_v12 = vld [vmem:[#allocation14 + $0xd20] ss:$24 sps:$4 sm:$0xff]   ;;  %v11509_v13 = vpack.c.bf16 %v1117_v4, %v1117_v4 }
 0x1dd   :  { %v9967_v4 = vld [vmem:[#allocation14 + $0xae0] ss:$24 sps:$4 sm:$0xff]  }
 0x1df   :  { %5836 = vmatpush1.bf16.msra.mxu1 %v9829_v14  ;;  %5877 = vmatpush1.bf16.msra.mxu0 %v9832_v15  ;;  %v11511_v14 = vpack.c.bf16 %v1119_v5, %v1119_v5  ;;  %v9903_v15 = vld [vmem:[#allocation14 + $0x9f4] ss:$24 sps:$4 sm:$0xff]   ;;  %v9970_v5 = vld [vmem:[#allocation14 + $0xde0] ss:$24 sps:$4 sm:$0xff]  }
 0x1e0   :  { %5837 = vmatprep.subr.bf16.mxu1 %v9837_v16  ;;  %5878 = vmatprep.subr.bf16.mxu0 %v9840_v17  ;;  %v9906_v16 = vld [vmem:[#allocation14 + $0xcf4] ss:$24 sps:$4 sm:$0xff]   ;;  %v9901_v17 = vld [vmem:[#allocation14 + $0x9f0] ss:$24 sps:$4 sm:$0xff]  }
 0x1e3   :  { %5838 = vmatpush1.bf16.msra.mxu1 %v9835_v18  ;;  %5879 = vmatpush1.bf16.msra.mxu0 %v9838_v19  ;;  %v9904_v18 = vld [vmem:[#allocation14 + $0xcf0] ss:$24 sps:$4 sm:$0xff]   ;;  %v9909_v19 = vld [vmem:[#allocation14 + $0x9c4] ss:$24 sps:$4 sm:$0xff]  }
 0x1e4   :  { %5839 = vmatprep.subr.bf16.mxu1 %v9843_v20  ;;  %5880 = vmatprep.subr.bf16.mxu0 %v9846_v21  ;;  %v9912_v20 = vld [vmem:[#allocation14 + $0xcc4] ss:$24 sps:$4 sm:$0xff]   ;;  %v9907_v21 = vld [vmem:[#allocation14 + $0x9c0] ss:$24 sps:$4 sm:$0xff]  }
 0x1e7   :  { %5840 = vmatpush2.bf16.msra.mxu1 %v9841_v23  ;;  %5881 = vmatpush2.bf16.msra.mxu0 %v9844_v26  ;;  %v9910_v23 = vld [vmem:[#allocation14 + $0xcc0] ss:$24 sps:$4 sm:$0xff]   ;;  %v9915_v26 = vld [vmem:[#allocation14 + $0x994] ss:$24 sps:$4 sm:$0xff]  }
 0x1e8   :  { %5841 = vmatprep.subr.bf16.mxu1 %v9849_v27  ;;  %5882 = vmatprep.subr.bf16.mxu0 %v9852_v28  ;;  %v9918_v27 = vld [vmem:[#allocation14 + $0xc94] ss:$24 sps:$4 sm:$0xff]   ;;  %v9913_v28 = vld [vmem:[#allocation14 + $0x990] ss:$24 sps:$4 sm:$0xff]  }
 0x1eb   :  { %5842 = vmatpush2.bf16.msra.mxu1 %v9847_v29  ;;  %5883 = vmatpush2.bf16.msra.mxu0 %v9850_v30  ;;  %v9916_v29 = vld [vmem:[#allocation14 + $0xc90] ss:$24 sps:$4 sm:$0xff]   ;;  %v9921_v30 = vld [vmem:[#allocation14 + $0x964] ss:$24 sps:$4 sm:$0xff]  }
 0x1ec   :  { %5843 = vmatprep.subr.bf16.mxu1 %v9855_v31  ;;  %5884 = vmatprep.subr.bf16.mxu0 %v9858_v32  ;;  %v9924_v31 = vld [vmem:[#allocation14 + $0xc64] ss:$24 sps:$4 sm:$0xff]   ;;  %v9919_v32 = vld [vmem:[#allocation14 + $0x960] ss:$24 sps:$4 sm:$0xff]  }
 0x1ef   :  { %5844 = vmatpush2.bf16.msra.mxu1 %v9853_v33  ;;  %5885 = vmatpush2.bf16.msra.mxu0 %v9856_v34  ;;  %v9922_v33 = vld [vmem:[#allocation14 + $0xc60] ss:$24 sps:$4 sm:$0xff]   ;;  %v9927_v34 = vld [vmem:[#allocation14 + $0x934] ss:$24 sps:$4 sm:$0xff]  }
 0x1f0   :  { %5845 = vmatprep.subr.bf16.mxu1 %v9861_v35  ;;  %5886 = vmatprep.subr.bf16.mxu0 %v9864_v36  ;;  %v9930_v35 = vld [vmem:[#allocation14 + $0xc34] ss:$24 sps:$4 sm:$0xff]   ;;  %v9925_v36 = vld [vmem:[#allocation14 + $0x930] ss:$24 sps:$4 sm:$0xff]  }
 0x1f3   :  { %5846 = vmatpush2.bf16.msra.mxu1 %v9859_v37  ;;  %5887 = vmatpush2.bf16.msra.mxu0 %v9862_v38  ;;  %v9928_v37 = vld [vmem:[#allocation14 + $0xc30] ss:$24 sps:$4 sm:$0xff]   ;;  %v9933_v38 = vld [vmem:[#allocation14 + $0x904] ss:$24 sps:$4 sm:$0xff]  }
 0x1f4   :  { %5847 = vmatprep.subr.bf16.mxu1 %v9867_v39  ;;  %5888 = vmatprep.subr.bf16.mxu0 %v9870_v40  ;;  %v9936_v39 = vld [vmem:[#allocation14 + $0xc04] ss:$24 sps:$4 sm:$0xff]   ;;  %v9931_v40 = vld [vmem:[#allocation14 + $0x900] ss:$24 sps:$4 sm:$0xff]  }
 0x1f7   :  { %5848 = vmatpush2.bf16.msra.mxu1 %v9865_v42  ;;  %5889 = vmatpush2.bf16.msra.mxu0 %v9868_v43  ;;  %v9934_v42 = vld [vmem:[#allocation14 + $0xc00] ss:$24 sps:$4 sm:$0xff]   ;;  %v9939_v43 = vld [vmem:[#allocation14 + $0xbd4] ss:$24 sps:$4 sm:$0xff]  }
 0x1f8   :  { %5849 = vmatprep.subr.bf16.mxu1 %v9873_v45  ;;  %5890 = vmatprep.subr.bf16.mxu0 %v9876_v46  ;;  %v9942_v45 = vld [vmem:[#allocation14 + $0xed4] ss:$24 sps:$4 sm:$0xff]   ;;  %v9937_v46 = vld [vmem:[#allocation14 + $0xbd0] ss:$24 sps:$4 sm:$0xff]  }
 0x1fb   :  { %5850 = vmatpush2.bf16.msra.mxu1 %v9871_v47  ;;  %5891 = vmatpush2.bf16.msra.mxu0 %v9874_v48  ;;  %v9940_v47 = vld [vmem:[#allocation14 + $0xed0] ss:$24 sps:$4 sm:$0xff]   ;;  %v9945_v48 = vld [vmem:[#allocation14 + $0xba4] ss:$24 sps:$4 sm:$0xff]  }
 0x1fc   :  { %5851 = vmatprep.subr.bf16.mxu1 %v9879_v49  ;;  %5892 = vmatprep.subr.bf16.mxu0 %v9882_v50  ;;  %v9948_v49 = vld [vmem:[#allocation14 + $0xea4] ss:$24 sps:$4 sm:$0xff]   ;;  %v9943_v50 = vld [vmem:[#allocation14 + $0xba0] ss:$24 sps:$4 sm:$0xff]  }
 0x1ff   :  { %5852 = vmatpush2.bf16.msra.mxu1 %v9877_v51  ;;  %5893 = vmatpush2.bf16.msra.mxu0 %v9880_v52  ;;  %v9946_v51 = vld [vmem:[#allocation14 + $0xea0] ss:$24 sps:$4 sm:$0xff]   ;;  %v9951_v52 = vld [vmem:[#allocation14 + $0xb74] ss:$24 sps:$4 sm:$0xff]  }
 0x200   :  { %5853 = vmatprep.subr.bf16.mxu1 %v9885_v53  ;;  %5894 = vmatprep.subr.bf16.mxu0 %v9888_v55  ;;  %v9954_v53 = vld [vmem:[#allocation14 + $0xe74] ss:$24 sps:$4 sm:$0xff]   ;;  %v9949_v55 = vld [vmem:[#allocation14 + $0xb70] ss:$24 sps:$4 sm:$0xff]  }
 0x203   :  { %5854 = vmatpush2.bf16.msra.mxu1 %v9883_v0  ;;  %5895 = vmatpush2.bf16.msra.mxu0 %v9886_v1  ;;  %v9966_v0 = vld [vmem:[#allocation14 + $0xe14] ss:$24 sps:$4 sm:$0xff]   ;;  %v9961_v1 = vld [vmem:[#allocation14 + $0xb10] ss:$24 sps:$4 sm:$0xff]  }
 0x204   :  { %5905 = vmatprep.subr.bf16.mxu1 %v9891_v41  ;;  %5946 = vmatprep.subr.bf16.mxu0 %v9894_v2  ;;  %v9964_v41 = vld [vmem:[#allocation14 + $0xe10] ss:$24 sps:$4 sm:$0xff]   ;;  %v9969_v2 = vld [vmem:[#allocation14 + $0xae4] ss:$24 sps:$4 sm:$0xff]  }
 0x206   :  { %5856 = vmatmul.mubr.bf16.vlgmr.msra.gmra.mxu1 %v11505_v6  ;;  %5897 = vmatmul.mubr.bf16.vlgmr.msra.gmra.mxu0 %v11507_v8 }
 0x207   :  { %5906 = vmatpush1.bf16.msra.mxu1 %v9889_v3  ;;  %5947 = vmatpush1.bf16.msra.mxu0 %v9892_v7  ;;  %v9972_v3 = vld [vmem:[#allocation14 + $0xde4] ss:$24 sps:$4 sm:$0xff]   ;;  %v9975_v7 = vld [vmem:[#allocation14 + $0xab4] ss:$24 sps:$4 sm:$0xff]  }
 0x208   :  { %5907 = vmatprep.subr.bf16.mxu1 %v9897_v9  ;;  %5948 = vmatprep.subr.bf16.mxu0 %v9900_v10  ;;  %v9978_v9 = vld [vmem:[#allocation14 + $0xdb4] ss:$24 sps:$4 sm:$0xff]   ;;  %v9973_v10 = vld [vmem:[#allocation14 + $0xab0] ss:$24 sps:$4 sm:$0xff]  }
 0x209   :  { %5937 = vmatprep.mubr.bf16.mxu1 %v11509_v13  ;;  %5978 = vmatprep.mubr.bf16.mxu0 %v11511_v14 }
 0x20b   :  { %5908 = vmatpush1.bf16.msra.mxu1 %v9895_v11  ;;  %5949 = vmatpush1.bf16.msra.mxu0 %v9898_v12  ;;  %v9976_v11 = vld [vmem:[#allocation14 + $0xdb0] ss:$24 sps:$4 sm:$0xff]  }
 0x20c   :  { %5909 = vmatprep.subr.bf16.mxu1 %v9903_v15  ;;  %5950 = vmatprep.subr.bf16.mxu0 %v9906_v16  ;;  %v1100_v12 = vld [vmem:[#allocation2 + $0x30] sm:$0xff]  ;;  %v1102_v15 = vld [vmem:[#allocation2 + $0x40] sm:$0xff] }
 0x20d   :  { %v9981_v16 = vld [vmem:[#allocation14 + $0xa84] ss:$24 sps:$4 sm:$0xff]  }
 0x20f   :  { %5910 = vmatpush1.bf16.msra.mxu1 %v9901_v17  ;;  %5951 = vmatpush1.bf16.msra.mxu0 %v9904_v18  ;;  %v9984_v17 = vld [vmem:[#allocation14 + $0xd84] ss:$24 sps:$4 sm:$0xff]  }
 0x210   :  { %5911 = vmatprep.subr.bf16.mxu1 %v9909_v19  ;;  %5952 = vmatprep.subr.bf16.mxu0 %v9912_v20  ;;  %v1105_v18 = vld [vmem:[#allocation2 + $0x58] sm:$0xff]  ;;  %v1116_v20 = vmax.f32 %v1100_v12, 0.0 }
 0x211   :  { %v9979_v19 = vld [vmem:[#allocation14 + $0xa80] ss:$24 sps:$4 sm:$0xff]   ;;  %v10032_v12 = vld [vmem:[#allocation14 + $0x1204] ss:$24 sps:$4 sm:$0xff]  }
 0x213   :  { %5912 = vmatpush1.bf16.msra.mxu1 %v9907_v21  ;;  %5953 = vmatpush1.bf16.msra.mxu0 %v9910_v23  ;;  %v1118_v21 = vmax.f32 %v1102_v15, 0.0  ;;  %v9982_v23 = vld [vmem:[#allocation14 + $0xd80] ss:$24 sps:$4 sm:$0xff]  }
 0x214   :  { %5913 = vmatprep.subr.bf16.mxu1 %v9915_v26  ;;  %5954 = vmatprep.subr.bf16.mxu0 %v9918_v27  ;;  %v1107_v26 = vld [vmem:[#allocation2 + $0x68] sm:$0xff]  ;;  %v10027_v15 = vld [vmem:[#allocation14 + $0xf00] ss:$24 sps:$4 sm:$0xff]  }
 0x215   :  { %v9987_v27 = vld [vmem:[#allocation14 + $0x1054] ss:$24 sps:$4 sm:$0xff]  }
 0x217   :  { %5914 = vmatpush1.bf16.msra.mxu1 %v9913_v28  ;;  %5955 = vmatpush1.bf16.msra.mxu0 %v9916_v29  ;;  %v9990_v28 = vld [vmem:[#allocation14 + $0x1354] ss:$24 sps:$4 sm:$0xff]   ;;  %v9985_v29 = vld [vmem:[#allocation14 + $0x1050] ss:$24 sps:$4 sm:$0xff]  }
 0x218   :  { %5915 = vmatprep.subr.bf16.mxu1 %v9921_v30  ;;  %5956 = vmatprep.subr.bf16.mxu0 %v9924_v31  ;;  %v9988_v30 = vld [vmem:[#allocation14 + $0x1350] ss:$24 sps:$4 sm:$0xff]   ;;  %v1121_v31 = vmax.f32 %v1105_v18, 0.0  ;;  %v10038_v18 = vld [vmem:[#allocation14 + $0x14d4] ss:$24 sps:$4 sm:$0xff]  }
 0x21b   :  { %5916 = vmatpush1.bf16.msra.mxu1 %v9919_v32  ;;  %5957 = vmatpush1.bf16.msra.mxu0 %v9922_v33  ;;  %v11517_v32 = vpack.c.bf16 %v1116_v20, %v1116_v20  ;;  %v11519_v33 = vpack.c.bf16 %v1118_v21, %v1118_v21  ;;  %v10036_v20 = vld [vmem:[#allocation14 + $0x14d0] ss:$24 sps:$4 sm:$0xff]   ;;  %v10041_v21 = vld [vmem:[#allocation14 + $0x11a4] ss:$24 sps:$4 sm:$0xff]  }
 0x21c   :  { %5917 = vmatprep.subr.bf16.mxu1 %v9927_v34  ;;  %5958 = vmatprep.subr.bf16.mxu0 %v9930_v35  ;;  %v1123_v34 = vmax.f32 %v1107_v26, 0.0  ;;  %v9993_v35 = vld [vmem:[#allocation14 + $0x1024] ss:$24 sps:$4 sm:$0xff]   ;;  %v10039_v26 = vld [vmem:[#allocation14 + $0x11a0] ss:$24 sps:$4 sm:$0xff]  }
 0x21f   :  { %5918 = vmatpush1.bf16.msra.mxu1 %v9925_v36  ;;  %5959 = vmatpush1.bf16.msra.mxu0 %v9928_v37  ;;  %v9996_v36 = vld [vmem:[#allocation14 + $0x1324] ss:$24 sps:$4 sm:$0xff]   ;;  %v9991_v37 = vld [vmem:[#allocation14 + $0x1020] ss:$24 sps:$4 sm:$0xff]  }
 0x220   :  { %5919 = vmatprep.subr.bf16.mxu1 %v9933_v38  ;;  %5960 = vmatprep.subr.bf16.mxu0 %v9936_v39  ;;  %v9994_v38 = vld [vmem:[#allocation14 + $0x1320] ss:$24 sps:$4 sm:$0xff]   ;;  %v11521_v39 = vpack.c.bf16 %v1121_v31, %v1121_v31  ;;  %v10048_v31 = vld [vmem:[#allocation14 + $0x1470] ss:$24 sps:$4 sm:$0xff]  }
 0x223   :  { %5920 = vmatpush1.bf16.msra.mxu1 %v9931_v40  ;;  %5961 = vmatpush1.bf16.msra.mxu0 %v9934_v42 }
 0x224   :  { %5921 = vmatprep.subr.bf16.mxu1 %v9939_v43  ;;  %5962 = vmatprep.subr.bf16.mxu0 %v9942_v45  ;;  %v11529_v43 = vpack.c.bf16 %v1123_v34, %v1123_v34  ;;  %v10053_v34 = vld [vmem:[#allocation14 + $0x1144] ss:$24 sps:$4 sm:$0xff]  }
 0x227   :  { %5922 = vmatpush2.bf16.msra.mxu1 %v9937_v46  ;;  %5963 = vmatpush2.bf16.msra.mxu0 %v9940_v47  ;;  %v9999_v47 = vld [vmem:[#allocation14 + $0xff4] ss:$24 sps:$4 sm:$0xff]  }
 0x228   :  { %5923 = vmatprep.subr.bf16.mxu1 %v9945_v48  ;;  %5964 = vmatprep.subr.bf16.mxu0 %v9948_v49  ;;  %v10002_v48 = vld [vmem:[#allocation14 + $0x12f4] ss:$24 sps:$4 sm:$0xff]   ;;  %v9997_v49 = vld [vmem:[#allocation14 + $0xff0] ss:$24 sps:$4 sm:$0xff]  }
 0x22b   :  { %5924 = vmatpush2.bf16.msra.mxu1 %v9943_v50  ;;  %5965 = vmatpush2.bf16.msra.mxu0 %v9946_v51  ;;  %v10000_v50 = vld [vmem:[#allocation14 + $0x12f0] ss:$24 sps:$4 sm:$0xff]  }
 0x22c   :  { %5925 = vmatprep.subr.bf16.mxu1 %v9951_v52  ;;  %5966 = vmatprep.subr.bf16.mxu0 %v9954_v53 }
 0x22f   :  { %5926 = vmatpush2.bf16.msra.mxu1 %v9949_v55  ;;  %5967 = vmatpush2.bf16.msra.mxu0 %v9952_v56  ;;  %v10005_v56 = vld [vmem:[#allocation14 + $0xfc4] ss:$24 sps:$4 sm:$0xff]  }
 0x230   :  { %5927 = vmatprep.subr.bf16.mxu1 %v9957_v57  ;;  %5968 = vmatprep.subr.bf16.mxu0 %v9960_v58  ;;  %v10008_v57 = vld [vmem:[#allocation14 + $0x12c4] ss:$24 sps:$4 sm:$0xff]   ;;  %v10003_v58 = vld [vmem:[#allocation14 + $0xfc0] ss:$24 sps:$4 sm:$0xff]  }
 0x233   :  { %5928 = vmatpush2.bf16.msra.mxu1 %v9955_v61  ;;  %5969 = vmatpush2.bf16.msra.mxu0 %v9958_v62  ;;  %v10006_v61 = vld [vmem:[#allocation14 + $0x12c0] ss:$24 sps:$4 sm:$0xff]   ;;  %v10011_v62 = vld [vmem:[#allocation14 + $0xf94] ss:$24 sps:$4 sm:$0xff]  }
 0x234   :  { %5929 = vmatprep.subr.bf16.mxu1 %v9963_v63  ;;  %5970 = vmatprep.subr.bf16.mxu0 %v9966_v0  ;;  %v10014_v63 = vld [vmem:[#allocation14 + $0x1294] ss:$24 sps:$4 sm:$0xff]   ;;  %v10009_v0 = vld [vmem:[#allocation14 + $0xf90] ss:$24 sps:$4 sm:$0xff]  }
 0x237   :  { %5930 = vmatpush2.bf16.msra.mxu1 %v9961_v1  ;;  %5971 = vmatpush2.bf16.msra.mxu0 %v9964_v41  ;;  %v10012_v1 = vld [vmem:[#allocation14 + $0x1290] ss:$24 sps:$4 sm:$0xff]   ;;  %v10017_v41 = vld [vmem:[#allocation14 + $0xf64] ss:$24 sps:$4 sm:$0xff]  }
 0x238   :  { %5931 = vmatprep.subr.bf16.mxu1 %v9969_v2  ;;  %5972 = vmatprep.subr.bf16.mxu0 %v9972_v3  ;;  %v10020_v2 = vld [vmem:[#allocation14 + $0x1264] ss:$24 sps:$4 sm:$0xff]   ;;  %v10015_v3 = vld [vmem:[#allocation14 + $0xf60] ss:$24 sps:$4 sm:$0xff]  }
 0x23b   :  { %5932 = vmatpush2.bf16.msra.mxu1 %v9967_v4  ;;  %5973 = vmatpush2.bf16.msra.mxu0 %v9970_v5  ;;  %v10018_v4 = vld [vmem:[#allocation14 + $0x1260] ss:$24 sps:$4 sm:$0xff]   ;;  %v10023_v5 = vld [vmem:[#allocation14 + $0xf34] ss:$24 sps:$4 sm:$0xff]  }
 0x23c   :  { %5933 = vmatprep.subr.bf16.mxu1 %v9975_v7  ;;  %5974 = vmatprep.subr.bf16.mxu0 %v9978_v9  ;;  %v10026_v7 = vld [vmem:[#allocation14 + $0x1234] ss:$24 sps:$4 sm:$0xff]   ;;  %v10021_v9 = vld [vmem:[#allocation14 + $0xf30] ss:$24 sps:$4 sm:$0xff]  }
 0x23f   :  { %5934 = vmatpush2.bf16.msra.mxu1 %v9973_v10  ;;  %5975 = vmatpush2.bf16.msra.mxu0 %v9976_v11  ;;  %v10024_v10 = vld [vmem:[#allocation14 + $0x1230] ss:$24 sps:$4 sm:$0xff]   ;;  %v10029_v11 = vld [vmem:[#allocation14 + $0xf04] ss:$24 sps:$4 sm:$0xff]  }
 0x240   :  { %5935 = vmatprep.subr.bf16.mxu1 %v9981_v16  ;;  %5976 = vmatprep.subr.bf16.mxu0 %v9984_v17  ;;  %v10030_v16 = vld [vmem:[#allocation14 + $0x1200] ss:$24 sps:$4 sm:$0xff]   ;;  %v10035_v17 = vld [vmem:[#allocation14 + $0x11d4] ss:$24 sps:$4 sm:$0xff]  }
 0x243   :  { %5936 = vmatpush2.bf16.msra.mxu1 %v9979_v19  ;;  %5977 = vmatpush2.bf16.msra.mxu0 %v9982_v23  ;;  %v10033_v19 = vld [vmem:[#allocation14 + $0x11d0] ss:$24 sps:$4 sm:$0xff]   ;;  %v10044_v23 = vld [vmem:[#allocation14 + $0x14a4] ss:$24 sps:$4 sm:$0xff]  }
 0x244   :  { %5987 = vmatprep.subr.bf16.mxu1 %v9987_v27  ;;  %6028 = vmatprep.subr.bf16.mxu0 %v9990_v28  ;;  %v10042_v27 = vld [vmem:[#allocation14 + $0x14a0] ss:$24 sps:$4 sm:$0xff]   ;;  %v10047_v28 = vld [vmem:[#allocation14 + $0x1174] ss:$24 sps:$4 sm:$0xff]  }
 0x246   :  { %5938 = vmatmul.mubr.bf16.vlgmr.msra.gmra.mxu1 %v11517_v32  ;;  %v11524_v40 = vpop.f32.mrf.mxu1  ;;  %v11526_v42 = vpop.f32.mrf.mxu0  ;;  %5979 = vmatmul.mubr.bf16.vlgmr.msra.gmra.mxu0 %v11519_v33 }
 0x247   :  { %5988 = vmatpush1.bf16.msra.mxu1 %v9985_v29  ;;  %6029 = vmatpush1.bf16.msra.mxu0 %v9988_v30  ;;  %v10050_v29 = vld [vmem:[#allocation14 + $0x1474] ss:$24 sps:$4 sm:$0xff]   ;;  %v10045_v30 = vld [vmem:[#allocation14 + $0x1170] ss:$24 sps:$4 sm:$0xff]  }
 0x248   :  { %v11531_v45 = vpop.f32.mrf.mxu1  ;;  %v11533_v46 = vpop.f32.mrf.mxu0  ;;  %5989 = vmatprep.subr.bf16.mxu1 %v9993_v35  ;;  %6030 = vmatprep.subr.bf16.mxu0 %v9996_v36  ;;  %v10056_v35 = vld [vmem:[#allocation14 + $0x1444] ss:$24 sps:$4 sm:$0xff]   ;;  %v10051_v36 = vld [vmem:[#allocation14 + $0x1140] ss:$24 sps:$4 sm:$0xff]  }
 0x249   :  { %6019 = vmatprep.mubr.bf16.mxu1 %v11521_v39  ;;  %6060 = vmatprep.mubr.bf16.mxu0 %v11529_v43 }
 0x24a   :  { %v1009_v51 = vpop.f32.mrf.mxu1  ;;  %v1050_v52 = vpop.f32.mrf.mxu0 }
 0x24b   :  { %5990 = vmatpush1.bf16.msra.mxu1 %v9991_v37  ;;  %6031 = vmatpush1.bf16.msra.mxu0 %v9994_v38  ;;  %v10054_v37 = vld [vmem:[#allocation14 + $0x1440] ss:$24 sps:$4 sm:$0xff]   ;;  %v10059_v38 = vld [vmem:[#allocation14 + $0x1114] ss:$24 sps:$4 sm:$0xff]   ;;  %v10068_v51 = vld [vmem:[#allocation14 + $0x13e4] ss:$24 sps:$4 sm:$0xff]  }
 0x24c   :  { %v1010_v53 = vpop.f32.mrf.mxu1  ;;  %v1051_v55 = vpop.f32.mrf.mxu0  ;;  %5991 = vmatprep.subr.bf16.mxu1 %v9999_v47  ;;  %6032 = vmatprep.subr.bf16.mxu0 %v10002_v48  ;;  %v10062_v47 = vld [vmem:[#allocation14 + $0x1414] ss:$24 sps:$4 sm:$0xff]   ;;  %v10057_v48 = vld [vmem:[#allocation14 + $0x1110] ss:$24 sps:$4 sm:$0xff]   ;;  %v10063_v52 = vld [vmem:[#allocation14 + $0x10e0] ss:$24 sps:$4 sm:$0xff]  }
 0x24d   :  { %v10066_v53 = vld [vmem:[#allocation14 + $0x13e0] ss:$24 sps:$4 sm:$0xff]   ;;  %v10071_v55 = vld [vmem:[#allocation14 + $0x10b4] ss:$24 sps:$4 sm:$0xff]  }
 0x24f   :  { %5992 = vmatpush1.bf16.msra.mxu1 %v9997_v49  ;;  %6033 = vmatpush1.bf16.msra.mxu0 %v10000_v50  ;;  %v10060_v49 = vld [vmem:[#allocation14 + $0x1410] ss:$24 sps:$4 sm:$0xff]   ;;  %v10065_v50 = vld [vmem:[#allocation14 + $0x10e4] ss:$24 sps:$4 sm:$0xff]  }
 0x250   :  { %5993 = vmatprep.subr.bf16.mxu1 %v10005_v56  ;;  %6034 = vmatprep.subr.bf16.mxu0 %v10008_v57  ;;  %v10074_v56 = vld [vmem:[#allocation14 + $0x13b4] ss:$24 sps:$4 sm:$0xff]  }
 0x251   :  { %v1104_v57 = vld [vmem:[#allocation2 + $0x50] sm:$0xff] }
 0x253   :  { %5994 = vmatpush1.bf16.msra.mxu1 %v10003_v58  ;;  %6035 = vmatpush1.bf16.msra.mxu0 %v10006_v61  ;;  %v1106_v58 = vld [vmem:[#allocation2 + $0x60] sm:$0xff]  ;;  %v10069_v61 = vld [vmem:[#allocation14 + $0x10b0] ss:$24 sps:$4 sm:$0xff]  }
 0x254   :  { %5995 = vmatprep.subr.bf16.mxu1 %v10011_v62  ;;  %6036 = vmatprep.subr.bf16.mxu0 %v10014_v63  ;;  %v10072_v62 = vld [vmem:[#allocation14 + $0x13b0] ss:$24 sps:$4 sm:$0xff]   ;;  %v10077_v63 = vld [vmem:[#allocation14 + $0x1084] ss:$24 sps:$4 sm:$0xff]  }
 0x257   :  { %5996 = vmatpush1.bf16.msra.mxu1 %v10009_v0  ;;  %6037 = vmatpush1.bf16.msra.mxu0 %v10012_v1  ;;  %v10080_v0 = vld [vmem:[#allocation14 + $0x1384] ss:$24 sps:$4 sm:$0xff]   ;;  %v1120_v1 = vmax.f32 %v1104_v57, 0.0  ;;  %v10111_v57 = vld [vmem:[#allocation14 + $0x1560] ss:$24 sps:$4 sm:$0xff]  }
 0x258   :  { %5997 = vmatprep.subr.bf16.mxu1 %v10017_v41  ;;  %6038 = vmatprep.subr.bf16.mxu0 %v10020_v2  ;;  %v1122_v41 = vmax.f32 %v1106_v58, 0.0  ;;  %v1109_v2 = vld [vmem:[#allocation2 + $0x78] sm:$0xff]  ;;  %v10114_v58 = vld [vmem:[#allocation14 + $0x68] ss:$24 sps:$4 sm:$0xff]  }
 0x25b   :  { %5998 = vmatpush1.bf16.msra.mxu1 %v10015_v3  ;;  %6039 = vmatpush1.bf16.msra.mxu0 %v10018_v4  ;;  %v10075_v3 = vld [vmem:[#allocation14 + $0x1080] ss:$24 sps:$4 sm:$0xff]  }
 0x25c   :  { %5999 = vmatprep.subr.bf16.mxu1 %v10023_v5  ;;  %6040 = vmatprep.subr.bf16.mxu0 %v10026_v7  ;;  %v10078_v4 = vld [vmem:[#allocation14 + $0x1380] ss:$24 sps:$4 sm:$0xff]   ;;  %v10083_v5 = vld [vmem:[#allocation14 + $0x1654] ss:$24 sps:$4 sm:$0xff]  }
 0x25d   :  { %v10086_v7 = vld [vmem:[#allocation14 + $0x15c] ss:$24 sps:$4 sm:$0xff]  }
 0x25f   :  { %6000 = vmatpush1.bf16.msra.mxu1 %v10021_v9  ;;  %6041 = vmatpush1.bf16.msra.mxu0 %v10024_v10  ;;  %v1125_v9 = vmax.f32 %v1109_v2, 0.0  ;;  %v10081_v10 = vld [vmem:[#allocation14 + $0x1650] ss:$24 sps:$4 sm:$0xff]   ;;  %v10123_v2 = vld [vmem:[#allocation14 + $0x1500] ss:$24 sps:$4 sm:$0xff]  }
 0x260   :  { %6001 = vmatprep.subr.bf16.mxu1 %v10029_v11  ;;  %6042 = vmatprep.subr.bf16.mxu0 %v10032_v12  ;;  %v10084_v11 = vld [vmem:[#allocation14 + $0x158] ss:$24 sps:$4 sm:$0xff]   ;;  %v11537_v12 = vpack.c.bf16 %v1120_v1, %v1120_v1  ;;  %v10125_v1 = vld [vmem:[#allocation14 + $0x1504] ss:$24 sps:$4 sm:$0xff]  }
 0x263   :  { %6002 = vmatpush1.bf16.msra.mxu1 %v10027_v15  ;;  %6043 = vmatpush1.bf16.msra.mxu0 %v10030_v16  ;;  %v11539_v15 = vpack.c.bf16 %v1122_v41, %v1122_v41  ;;  %v10089_v16 = vld [vmem:[#allocation14 + $0x1624] ss:$24 sps:$4 sm:$0xff]  }
 0x264   :  { %6003 = vmatprep.subr.bf16.mxu1 %v10035_v17  ;;  %6044 = vmatprep.subr.bf16.mxu0 %v10038_v18  ;;  %v10092_v17 = vld [vmem:[#allocation14 + $0x12c] ss:$24 sps:$4 sm:$0xff]   ;;  %v10087_v18 = vld [vmem:[#allocation14 + $0x1620] ss:$24 sps:$4 sm:$0xff]  }
 0x265   :  { %v10128_v41 = vld [vmem:[#allocation14 + $0xc] ss:$24 sps:$4 sm:$0xff]  }
 0x267   :  { %6004 = vmatpush2.bf16.msra.mxu1 %v10033_v19  ;;  %6045 = vmatpush2.bf16.msra.mxu0 %v10036_v20  ;;  %v10090_v19 = vld [vmem:[#allocation14 + $0x128] ss:$24 sps:$4 sm:$0xff]   ;;  %v11541_v20 = vpack.c.bf16 %v1125_v9, %v1125_v9  ;;  %v10132_v9 = vld [vmem:[#allocation14 + $0x2d8] ss:$24 sps:$4 sm:$0xff]  }
 0x268   :  { %6005 = vmatprep.subr.bf16.mxu1 %v10041_v21  ;;  %6046 = vmatprep.subr.bf16.mxu0 %v10044_v23 }
 0x26b   :  { %6006 = vmatpush2.bf16.msra.mxu1 %v10039_v26  ;;  %6047 = vmatpush2.bf16.msra.mxu0 %v10042_v27  ;;  %v10095_v27 = vld [vmem:[#allocation14 + $0x15f4] ss:$24 sps:$4 sm:$0xff]  }
 0x26c   :  { %6007 = vmatprep.subr.bf16.mxu1 %v10047_v28  ;;  %6048 = vmatprep.subr.bf16.mxu0 %v10050_v29  ;;  %v10098_v28 = vld [vmem:[#allocation14 + $0xfc] ss:$24 sps:$4 sm:$0xff]  }
 0x26f   :  { %6008 = vmatpush2.bf16.msra.mxu1 %v10045_v30  ;;  %6049 = vmatpush2.bf16.msra.mxu0 %v10048_v31  ;;  %v10093_v30 = vld [vmem:[#allocation14 + $0x15f0] ss:$24 sps:$4 sm:$0xff]  }
 0x270   :  { %6009 = vmatprep.subr.bf16.mxu1 %v10053_v34  ;;  %6050 = vmatprep.subr.bf16.mxu0 %v10056_v35  ;;  %v10096_v31 = vld [vmem:[#allocation14 + $0xf8] ss:$24 sps:$4 sm:$0xff]  }
 0x273   :  { %6010 = vmatpush2.bf16.msra.mxu1 %v10051_v36  ;;  %6051 = vmatpush2.bf16.msra.mxu0 %v10054_v37  ;;  %v10101_v37 = vld [vmem:[#allocation14 + $0x15c4] ss:$24 sps:$4 sm:$0xff]  }
 0x274   :  { %6011 = vmatprep.subr.bf16.mxu1 %v10059_v38  ;;  %6052 = vmatprep.subr.bf16.mxu0 %v10062_v47  ;;  %v10104_v38 = vld [vmem:[#allocation14 + $0xcc] ss:$24 sps:$4 sm:$0xff]  }
 0x277   :  { %6012 = vmatpush2.bf16.msra.mxu1 %v10057_v48  ;;  %6053 = vmatpush2.bf16.msra.mxu0 %v10060_v49  ;;  %v10099_v48 = vld [vmem:[#allocation14 + $0x15c0] ss:$24 sps:$4 sm:$0xff]  }
 0x278   :  { %6013 = vmatprep.subr.bf16.mxu1 %v10065_v50  ;;  %6054 = vmatprep.subr.bf16.mxu0 %v10068_v51  ;;  %v10102_v49 = vld [vmem:[#allocation14 + $0xc8] ss:$24 sps:$4 sm:$0xff]   ;;  %v10107_v50 = vld [vmem:[#allocation14 + $0x1594] ss:$24 sps:$4 sm:$0xff]  }
 0x279   :  { %v10110_v51 = vld [vmem:[#allocation14 + $0x9c] ss:$24 sps:$4 sm:$0xff]  }
 0x27b   :  { %6014 = vmatpush2.bf16.msra.mxu1 %v10063_v52  ;;  %6055 = vmatpush2.bf16.msra.mxu0 %v10066_v53  ;;  %v10105_v52 = vld [vmem:[#allocation14 + $0x1590] ss:$24 sps:$4 sm:$0xff]  }
 0x27c   :  { %6015 = vmatprep.subr.bf16.mxu1 %v10071_v55  ;;  %6056 = vmatprep.subr.bf16.mxu0 %v10074_v56  ;;  %v10108_v53 = vld [vmem:[#allocation14 + $0x98] ss:$24 sps:$4 sm:$0xff]   ;;  %v10113_v55 = vld [vmem:[#allocation14 + $0x1564] ss:$24 sps:$4 sm:$0xff]  }
 0x27d   :  { %v10116_v56 = vld [vmem:[#allocation14 + $0x6c] ss:$24 sps:$4 sm:$0xff]  }
 0x27f   :  { %6016 = vmatpush2.bf16.msra.mxu1 %v10069_v61  ;;  %6057 = vmatpush2.bf16.msra.mxu0 %v10072_v62  ;;  %v10119_v61 = vld [vmem:[#allocation14 + $0x1534] ss:$24 sps:$4 sm:$0xff]  }
 0x280   :  { %6017 = vmatprep.subr.bf16.mxu1 %v10077_v63  ;;  %6058 = vmatprep.subr.bf16.mxu0 %v10080_v0  ;;  %v10122_v62 = vld [vmem:[#allocation14 + $0x3c] ss:$24 sps:$4 sm:$0xff]   ;;  %v10117_v63 = vld [vmem:[#allocation14 + $0x1530] ss:$24 sps:$4 sm:$0xff]  }
 0x281   :  { %v10120_v0 = vld [vmem:[#allocation14 + $0x38] ss:$24 sps:$4 sm:$0xff]  }
 0x283   :  { %6018 = vmatpush2.bf16.msra.mxu1 %v10075_v3  ;;  %6059 = vmatpush2.bf16.msra.mxu0 %v10078_v4  ;;  %v10126_v3 = vld [vmem:[#allocation14 + $0x8] ss:$24 sps:$4 sm:$0xff]   ;;  %v10131_v4 = vld [vmem:[#allocation14 + $0x17d4] ss:$24 sps:$4 sm:$0xff]  }
 0x284   :  { %6069 = vmatprep.subr.bf16.mxu1 %v10083_v5  ;;  %6110 = vmatprep.subr.bf16.mxu0 %v10086_v7  ;;  %v10134_v5 = vld [vmem:[#allocation14 + $0x2dc] ss:$24 sps:$4 sm:$0xff]   ;;  %v10129_v7 = vld [vmem:[#allocation14 + $0x17d0] ss:$24 sps:$4 sm:$0xff]  }
 0x286   :  { %v11543_v21 = vpop.f32.mrf.mxu1  ;;  %6020 = vmatmul.mubr.bf16.vlgmr.msra.gmra.mxu1 %v11537_v12  ;;  %6061 = vmatmul.mubr.bf16.vlgmr.msra.gmra.mxu0 %v11539_v15  ;;  %v11547_v23 = vpop.f32.mrf.mxu0 }
 0x287   :  { %6070 = vmatpush1.bf16.msra.mxu1 %v10081_v10  ;;  %6111 = vmatpush1.bf16.msra.mxu0 %v10084_v11  ;;  %v10137_v10 = vld [vmem:[#allocation14 + $0x17a4] ss:$24 sps:$4 sm:$0xff]  }
 0x288   :  { %v11549_v26 = vpop.f32.mrf.mxu1  ;;  %6071 = vmatprep.subr.bf16.mxu1 %v10089_v16  ;;  %6112 = vmatprep.subr.bf16.mxu0 %v10092_v17  ;;  %v11551_v29 = vpop.f32.mrf.mxu0  ;;  %v10140_v11 = vld [vmem:[#allocation14 + $0x2ac] ss:$24 sps:$4 sm:$0xff]   ;;  %v10135_v16 = vld [vmem:[#allocation14 + $0x17a0] ss:$24 sps:$4 sm:$0xff]  }
 0x289   :  { %6101 = vmatprep.mubr.bf16.mxu1 %v11541_v20  ;;  %6142 = vmatprep.mubr.bf16.mxu0 %v11490_v44  ;;  %v10138_v17 = vld [vmem:[#allocation14 + $0x2a8] ss:$24 sps:$4 sm:$0xff]  }
 0x28a   :  { %v1091_v34 = vpop.f32.mrf.mxu1  ;;  %v5820_v35 = vpop.f32.mrf.mxu0 }
 0x28b   :  { %6072 = vmatpush1.bf16.msra.mxu1 %v10087_v18  ;;  %6113 = vmatpush1.bf16.msra.mxu0 %v10090_v19  ;;  %v10143_v18 = vld [vmem:[#allocation14 + $0x1774] ss:$24 sps:$4 sm:$0xff]   ;;  %v10147_v34 = vld [vmem:[#allocation14 + $0x1740] ss:$24 sps:$4 sm:$0xff]  }
 0x28c   :  { %v1092_v36 = vpop.f32.mrf.mxu1  ;;  %6073 = vmatprep.subr.bf16.mxu1 %v10095_v27  ;;  %6114 = vmatprep.subr.bf16.mxu0 %v10098_v28  ;;  %v5821_v47 = vpop.f32.mrf.mxu0  ;;  %v10146_v19 = vld [vmem:[#allocation14 + $0x27c] ss:$24 sps:$4 sm:$0xff]   ;;  %v10141_v27 = vld [vmem:[#allocation14 + $0x1770] ss:$24 sps:$4 sm:$0xff]  }
 0x28d   :  { %v10144_v28 = vld [vmem:[#allocation14 + $0x278] ss:$24 sps:$4 sm:$0xff]   ;;  %v10150_v35 = vld [vmem:[#allocation14 + $0x248] ss:$24 sps:$4 sm:$0xff]   ;;  %v10155_v36 = vld [vmem:[#allocation14 + $0x1714] ss:$24 sps:$4 sm:$0xff]  }
 0x28e   :  { %v10156_v47 = vld [vmem:[#allocation14 + $0x218] ss:$24 sps:$4 sm:$0xff]  }
 0x28f   :  { %6074 = vmatpush1.bf16.msra.mxu1 %v10093_v30  ;;  %6115 = vmatpush1.bf16.msra.mxu0 %v10096_v31  ;;  %v10149_v30 = vld [vmem:[#allocation14 + $0x1744] ss:$24 sps:$4 sm:$0xff]  }
 0x290   :  { %6075 = vmatprep.subr.bf16.mxu1 %v10101_v37  ;;  %6116 = vmatprep.subr.bf16.mxu0 %v10104_v38  ;;  %v10152_v31 = vld [vmem:[#allocation14 + $0x24c] ss:$24 sps:$4 sm:$0xff]   ;;  %v10158_v37 = vld [vmem:[#allocation14 + $0x21c] ss:$24 sps:$4 sm:$0xff]   ;;  %v10153_v38 = vld [vmem:[#allocation14 + $0x1710] ss:$24 sps:$4 sm:$0xff]  }
 0x293   :  { %6076 = vmatpush1.bf16.msra.mxu1 %v10099_v48  ;;  %6117 = vmatpush1.bf16.msra.mxu0 %v10102_v49  ;;  %v10161_v48 = vld [vmem:[#allocation14 + $0x16e4] ss:$24 sps:$4 sm:$0xff]  }
 0x294   :  { %6077 = vmatprep.subr.bf16.mxu1 %v10107_v50  ;;  %6118 = vmatprep.subr.bf16.mxu0 %v10110_v51  ;;  %v10164_v49 = vld [vmem:[#allocation14 + $0x1ec] ss:$24 sps:$4 sm:$0xff]   ;;  %v10159_v50 = vld [vmem:[#allocation14 + $0x16e0] ss:$24 sps:$4 sm:$0xff]  }
 0x295   :  { %v10162_v51 = vld [vmem:[#allocation14 + $0x1e8] ss:$24 sps:$4 sm:$0xff]  }
 0x297   :  { %6078 = vmatpush1.bf16.msra.mxu1 %v10105_v52  ;;  %6119 = vmatpush1.bf16.msra.mxu0 %v10108_v53  ;;  %v10167_v52 = vld [vmem:[#allocation14 + $0x16b4] ss:$24 sps:$4 sm:$0xff]  }
 0x298   :  { %6079 = vmatprep.subr.bf16.mxu1 %v10113_v55  ;;  %6120 = vmatprep.subr.bf16.mxu0 %v10116_v56  ;;  %v10170_v53 = vld [vmem:[#allocation14 + $0x1bc] ss:$24 sps:$4 sm:$0xff]   ;;  %v10165_v56 = vld [vmem:[#allocation14 + $0x16b0] ss:$24 sps:$4 sm:$0xff]  }
 0x299   :  { %v1108_v55 = vld [vmem:[#allocation2 + $0x70] sm:$0xff] }
 0x29b   :  { %6080 = vmatpush1.bf16.msra.mxu1 %v10111_v57  ;;  %6121 = vmatpush1.bf16.msra.mxu0 %v10114_v58  ;;  %v10168_v57 = vld [vmem:[#allocation14 + $0x1b8] ss:$24 sps:$4 sm:$0xff]   ;;  %v1910_v58 = vld [vmem:[#allocation16] sm:$0x3f] }
 0x29c   :  { %6081 = vmatprep.subr.bf16.mxu1 %v10119_v61  ;;  %6122 = vmatprep.subr.bf16.mxu0 %v10122_v62  ;;  %v10173_v61 = vld [vmem:[#allocation14 + $0x1684] ss:$24 sps:$4 sm:$0xff]  }
 0x29d   :  { %v10176_v62 = vld [vmem:[#allocation14 + $0x18c] ss:$24 sps:$4 sm:$0xff]  }
 0x29f   :  { %6082 = vmatpush1.bf16.msra.mxu1 %v10117_v63  ;;  %6123 = vmatpush1.bf16.msra.mxu0 %v10120_v0  ;;  %v1124_v63 = vmax.f32 %v1108_v55, 0.0  ;;  %v1915_v0 = vrot.slane %v1910_v58, %v11481_v24  ;;  %v10195_v55 = vld [vmem:[#allocation14 + $0x3c8] ss:$24 sps:$4 sm:$0xff]  }
 0x2a0   :  { %6083 = vmatprep.subr.bf16.mxu1 %v10125_v1  ;;  %6124 = vmatprep.subr.bf16.mxu0 %v10128_v41  ;;  %v10171_v1 = vld [vmem:[#allocation14 + $0x1680] ss:$24 sps:$4 sm:$0xff]  }
 0x2a1   :  { %v10174_v41 = vld [vmem:[#allocation14 + $0x188] ss:$24 sps:$4 sm:$0xff]  }
 0x2a3   :  { %6084 = vmatpush1.bf16.msra.mxu1 %v10123_v2  ;;  %6125 = vmatpush1.bf16.msra.mxu0 %v10126_v3  ;;  %v10179_v2 = vld [vmem:[#allocation14 + $0x45c] ss:$24 sps:$4 sm:$0xff]  }
 0x2a4   :  { %6085 = vmatprep.subr.bf16.mxu1 %v10131_v4  ;;  %6126 = vmatprep.subr.bf16.mxu0 %v10134_v5  ;;  %v10182_v3 = vld [vmem:[#allocation14 + $0x75c] ss:$24 sps:$4 sm:$0xff]   ;;  %v1919_v4 = vrot.slane %v1910_v58, %v11484_v25  ;;  %v10177_v5 = vld [vmem:[#allocation14 + $0x458] ss:$24 sps:$4 sm:$0xff]  }
 0x2a5   :  { %v10206_v58 = vld [vmem:[#allocation14 + $0x69c] ss:$24 sps:$4 sm:$0xff]  }
 0x2a7   :  { %6086 = vmatpush2.bf16.msra.mxu1 %v10129_v7  ;;  %6127 = vmatpush2.bf16.msra.mxu0 %v10132_v9  ;;  %v10180_v7 = vld [vmem:[#allocation14 + $0x758] ss:$24 sps:$4 sm:$0xff]   ;;  %v11557_v9 = vpack.c.bf16 %v1124_v63, %v1124_v63  ;;  %v10209_v63 = vld [vmem:[#allocation14 + $0x36c] ss:$24 sps:$4 sm:$0xff]  }
 0x2a8   :  { %6087 = vmatprep.subr.bf16.mxu1 %v10137_v10  ;;  %6128 = vmatprep.subr.bf16.mxu0 %v10140_v11  ;;  %v5817_v10 = vadd.f32 %v11547_v23, %v1915_v0  ;;  %v10185_v11 = vld [vmem:[#allocation14 + $0x42c] ss:$24 sps:$4 sm:$0xff]  }
 0x2a9   :  { %v10212_v0 = vld [vmem:[#allocation14 + $0x66c] ss:$24 sps:$4 sm:$0xff]  }
 0x2ab   :  { %6088 = vmatpush2.bf16.msra.mxu1 %v10135_v16  ;;  %6129 = vmatpush2.bf16.msra.mxu0 %v10138_v17  ;;  %v10188_v16 = vld [vmem:[#allocation14 + $0x72c] ss:$24 sps:$4 sm:$0xff]   ;;  %v5819_v17 = vadd.f32 %v11551_v29, %v1919_v4  ;;  %v10189_v29 = vld [vmem:[#allocation14 + $0x3f8] ss:$24 sps:$4 sm:$0xff]  }
 0x2ac   :  { %6089 = vmatprep.subr.bf16.mxu1 %v10143_v18  ;;  %6130 = vmatprep.subr.bf16.mxu0 %v10146_v19  ;;  %v10183_v18 = vld [vmem:[#allocation14 + $0x428] ss:$24 sps:$4 sm:$0xff]   ;;  %v10213_v4 = vld [vmem:[#allocation14 + $0x338] ss:$24 sps:$4 sm:$0xff]  }
 0x2ad   :  { %v10186_v19 = vld [vmem:[#allocation14 + $0x728] ss:$24 sps:$4 sm:$0xff]  }
 0x2af   :  { %6090 = vmatpush2.bf16.msra.mxu1 %v10141_v27  ;;  %6131 = vmatpush2.bf16.msra.mxu0 %v10144_v28 }
 0x2b0   :  { %6091 = vmatprep.subr.bf16.mxu1 %v10149_v30  ;;  %6132 = vmatprep.subr.bf16.mxu0 %v10152_v31 }
 0x2b3   :  { %6092 = vmatpush2.bf16.msra.mxu1 %v10147_v34  ;;  %6133 = vmatpush2.bf16.msra.mxu0 %v10150_v35  ;;  %v10191_v34 = vld [vmem:[#allocation14 + $0x3fc] ss:$24 sps:$4 sm:$0xff]  }
 0x2b4   :  { %6093 = vmatprep.subr.bf16.mxu1 %v10155_v36  ;;  %6134 = vmatprep.subr.bf16.mxu0 %v10158_v37  ;;  %v10194_v35 = vld [vmem:[#allocation14 + $0x6fc] ss:$24 sps:$4 sm:$0xff]  }
 0x2b7   :  { %6094 = vmatpush2.bf16.msra.mxu1 %v10153_v38  ;;  %6135 = vmatpush2.bf16.msra.mxu0 %v10156_v47  ;;  %v10192_v38 = vld [vmem:[#allocation14 + $0x6f8] ss:$24 sps:$4 sm:$0xff]  }
 0x2b8   :  { %6095 = vmatprep.subr.bf16.mxu1 %v10161_v48  ;;  %6136 = vmatprep.subr.bf16.mxu0 %v10164_v49 }
 0x2bb   :  { %6096 = vmatpush2.bf16.msra.mxu1 %v10159_v50  ;;  %6137 = vmatpush2.bf16.msra.mxu0 %v10162_v51  ;;  %v10197_v51 = vld [vmem:[#allocation14 + $0x3cc] ss:$24 sps:$4 sm:$0xff]  }
 0x2bc   :  { %6097 = vmatprep.subr.bf16.mxu1 %v10167_v52  ;;  %6138 = vmatprep.subr.bf16.mxu0 %v10170_v53  ;;  %v10200_v52 = vld [vmem:[#allocation14 + $0x6cc] ss:$24 sps:$4 sm:$0xff]  }
 0x2bf   :  { %6098 = vmatpush2.bf16.msra.mxu1 %v10165_v56  ;;  %6139 = vmatpush2.bf16.msra.mxu0 %v10168_v57  ;;  %v10198_v56 = vld [vmem:[#allocation14 + $0x6c8] ss:$24 sps:$4 sm:$0xff]   ;;  %v10203_v57 = vld [vmem:[#allocation14 + $0x39c] ss:$24 sps:$4 sm:$0xff]  }
 0x2c0   :  { %6099 = vmatprep.subr.bf16.mxu1 %v10173_v61  ;;  %6140 = vmatprep.subr.bf16.mxu0 %v10176_v62  ;;  %v10201_v61 = vld [vmem:[#allocation14 + $0x398] ss:$24 sps:$4 sm:$0xff]  }
 0x2c1   :  { %v10204_v62 = vld [vmem:[#allocation14 + $0x698] ss:$24 sps:$4 sm:$0xff]  }
 0x2c3   :  { %6100 = vmatpush2.bf16.msra.mxu1 %v10171_v1  ;;  %6141 = vmatpush2.bf16.msra.mxu0 %v10174_v41  ;;  %v10207_v1 = vld [vmem:[#allocation14 + $0x368] ss:$24 sps:$4 sm:$0xff]  }
 0x2c4   :  { %6151 = vmatprep.subr.bf16.mxu1 %v10179_v2  ;;  %6192 = vmatprep.subr.bf16.mxu0 %v10182_v3  ;;  %v10210_v41 = vld [vmem:[#allocation14 + $0x668] ss:$24 sps:$4 sm:$0xff]   ;;  %v10215_v2 = vld [vmem:[#allocation14 + $0x33c] ss:$24 sps:$4 sm:$0xff]  }
 0x2c5   :  { %v10218_v3 = vld [vmem:[#allocation14 + $0x63c] ss:$24 sps:$4 sm:$0xff]  }
 0x2c6   :  { %v5857_v27 = vpop.f32.mrf.mxu1  ;;  %6102 = vmatmul.mubr.bf16.vlgmr.msra.gmra.mxu1 %v11557_v9  ;;  %6143 = vmatmul.mubr.bf16.vlgmr.msra.gmra.mxu0 %v11495_v54  ;;  %v5898_v28 = vpop.f32.mrf.mxu0 }
 0x2c7   :  { %v5858_v30 = vadd.f32 %v5857_v27, %v5817_v10  ;;  %6152 = vmatpush1.bf16.msra.mxu1 %v10177_v5  ;;  %6193 = vmatpush1.bf16.msra.mxu0 %v10180_v7  ;;  %v10216_v5 = vld [vmem:[#allocation14 + $0x638] ss:$24 sps:$4 sm:$0xff]   ;;  %v10221_v7 = vld [vmem:[#allocation14 + $0x30c] ss:$24 sps:$4 sm:$0xff]  }
 0x2c8   :  { %v5859_v23 = vpop.f32.mrf.mxu1  ;;  %v5900_v31 = vpop.f32.mrf.mxu0  ;;  %6153 = vmatprep.subr.bf16.mxu1 %v10185_v11  ;;  %6194 = vmatprep.subr.bf16.mxu0 %v10188_v16  ;;  %v10224_v10 = vld [vmem:[#allocation14 + $0x60c] ss:$24 sps:$4 sm:$0xff]   ;;  %v10219_v11 = vld [vmem:[#allocation14 + $0x308] ss:$24 sps:$4 sm:$0xff]   ;;  %v10228_v27 = vld [vmem:[#allocation14 + $0x8d8] ss:$24 sps:$4 sm:$0xff]  }
 0x2c9   :  { %v5860_v36 = vadd.f32 %v5859_v23, %v5819_v17  ;;  %v11563_v37 = vadd.f32 %v5898_v28, %v5858_v30  ;;  %6183 = vmatprep.mubr.bf16.mxu1 %v11497_v59  ;;  %6224 = vmatprep.mubr.bf16.mxu0 %v11499_v60  ;;  %v10222_v16 = vld [vmem:[#allocation14 + $0x608] ss:$24 sps:$4 sm:$0xff]   ;;  %v10227_v17 = vld [vmem:[#allocation14 + $0x5dc] ss:$24 sps:$4 sm:$0xff]   ;;  %v10233_v28 = vld [vmem:[#allocation14 + $0x5ac] ss:$24 sps:$4 sm:$0xff]  }
 0x2ca   :  { %v5861_v47 = vpop.f32.mrf.mxu1  ;;  %v5902_v48 = vpop.f32.mrf.mxu0  ;;  %v10236_v30 = vld [vmem:[#allocation14 + $0x8ac] ss:$24 sps:$4 sm:$0xff]   ;;  %v10231_v23 = vld [vmem:[#allocation14 + $0x5a8] ss:$24 sps:$4 sm:$0xff]  }
 0x2cb   :  { %v11567_v49 = vadd.f32 %v5900_v31, %v5860_v36  ;;  %6154 = vmatpush1.bf16.msra.mxu1 %v10183_v18  ;;  %6195 = vmatpush1.bf16.msra.mxu0 %v10186_v19  ;;  %v10230_v18 = vld [vmem:[#allocation14 + $0x8dc] ss:$24 sps:$4 sm:$0xff]   ;;  %v10225_v19 = vld [vmem:[#allocation14 + $0x5d8] ss:$24 sps:$4 sm:$0xff]   ;;  %v10234_v31 = vld [vmem:[#allocation14 + $0x8a8] ss:$24 sps:$4 sm:$0xff]  }
 0x2cc   :  { %v5862_v50 = vpop.f32.mrf.mxu1  ;;  %6155 = vmatprep.subr.bf16.mxu1 %v10191_v34  ;;  %6196 = vmatprep.subr.bf16.mxu0 %v10194_v35  ;;  %v5903_v53 = vpop.f32.mrf.mxu0  ;;  %v10239_v34 = vld [vmem:[#allocation14 + $0x57c] ss:$24 sps:$4 sm:$0xff]   ;;  %v10237_v36 = vld [vmem:[#allocation14 + $0x578] ss:$24 sps:$4 sm:$0xff]   ;;  %v10248_v47 = vld [vmem:[#allocation14 + $0x84c] ss:$24 sps:$4 sm:$0xff]  }
 0x2cd   :  { %v10242_v35 = vld [vmem:[#allocation14 + $0x87c] ss:$24 sps:$4 sm:$0xff]   ;;  %v10243_v48 = vld [vmem:[#allocation14 + $0x548] ss:$24 sps:$4 sm:$0xff]   ;;  %v10249_v53 = vld [vmem:[#allocation14 + $0x518] ss:$24 sps:$4 sm:$0xff]  }
 0x2ce   :  { %v10246_v50 = vld [vmem:[#allocation14 + $0x848] ss:$24 sps:$4 sm:$0xff]  }
 0x2cf   :  { %6156 = vmatpush1.bf16.msra.mxu1 %v10189_v29  ;;  %6197 = vmatpush1.bf16.msra.mxu0 %v10192_v38  ;;  %v10240_v29 = vld [vmem:[#allocation14 + $0x878] ss:$24 sps:$4 sm:$0xff]   ;;  %v10245_v38 = vld [vmem:[#allocation14 + $0x54c] ss:$24 sps:$4 sm:$0xff]  }
 0x2d0   :  { %6157 = vmatprep.subr.bf16.mxu1 %v10197_v51  ;;  %6198 = vmatprep.subr.bf16.mxu0 %v10200_v52  ;;  %v10251_v51 = vld [vmem:[#allocation14 + $0x51c] ss:$24 sps:$4 sm:$0xff]  }
 0x2d1   :  { %v10254_v52 = vld [vmem:[#allocation14 + $0x81c] ss:$24 sps:$4 sm:$0xff]  }
 0x2d3   :  { %6158 = vmatpush1.bf16.msra.mxu1 %v10195_v55  ;;  %6199 = vmatpush1.bf16.msra.mxu0 %v10198_v56  ;;  %v10252_v55 = vld [vmem:[#allocation14 + $0x818] ss:$24 sps:$4 sm:$0xff]   ;;  %v10257_v56 = vld [vmem:[#allocation14 + $0x4ec] ss:$24 sps:$4 sm:$0xff]  }
 0x2d4   :  { %6159 = vmatprep.subr.bf16.mxu1 %v10203_v57  ;;  %6200 = vmatprep.subr.bf16.mxu0 %v10206_v58  ;;  %v10260_v57 = vld [vmem:[#allocation14 + $0x7ec] ss:$24 sps:$4 sm:$0xff]   ;;  %v10255_v58 = vld [vmem:[#allocation14 + $0x4e8] ss:$24 sps:$4 sm:$0xff]  }
 0x2d7   :  { %6160 = vmatpush1.bf16.msra.mxu1 %v10201_v61  ;;  %6201 = vmatpush1.bf16.msra.mxu0 %v10204_v62  ;;  %v10258_v61 = vld [vmem:[#allocation14 + $0x7e8] ss:$24 sps:$4 sm:$0xff]   ;;  %v10263_v62 = vld [vmem:[#allocation14 + $0x4bc] ss:$24 sps:$4 sm:$0xff]  }
 0x2d8   :  { %6161 = vmatprep.subr.bf16.mxu1 %v10209_v63  ;;  %6202 = vmatprep.subr.bf16.mxu0 %v10212_v0  ;;  %v10266_v63 = vld [vmem:[#allocation14 + $0x7bc] ss:$24 sps:$4 sm:$0xff]   ;;  %v10261_v0 = vld [vmem:[#allocation14 + $0x4b8] ss:$24 sps:$4 sm:$0xff]  }
 0x2db   :  { %6162 = vmatpush1.bf16.msra.mxu1 %v10207_v1  ;;  %6203 = vmatpush1.bf16.msra.mxu0 %v10210_v41  ;;  %v10264_v1 = vld [vmem:[#allocation14 + $0x7b8] ss:$24 sps:$4 sm:$0xff]   ;;  %v10269_v41 = vld [vmem:[#allocation14 + $0x48c] ss:$24 sps:$4 sm:$0xff]  }
 0x2dc   :  { %6163 = vmatprep.subr.bf16.mxu1 %v10215_v2  ;;  %6204 = vmatprep.subr.bf16.mxu0 %v10218_v3  ;;  %v10272_v2 = vld [vmem:[#allocation14 + $0x78c] ss:$24 sps:$4 sm:$0xff]   ;;  %v10267_v3 = vld [vmem:[#allocation14 + $0x488] ss:$24 sps:$4 sm:$0xff]  }
 0x2df   :  { %6164 = vmatpush1.bf16.msra.mxu1 %v10213_v4  ;;  %6205 = vmatpush1.bf16.msra.mxu0 %v10216_v5  ;;  %v10270_v4 = vld [vmem:[#allocation14 + $0x788] ss:$24 sps:$4 sm:$0xff]   ;;  %v10275_v5 = vld [vmem:[#allocation14 + $0xa5c] ss:$24 sps:$4 sm:$0xff]  }
 0x2e0   :  { %6165 = vmatprep.subr.bf16.mxu1 %v10221_v7  ;;  %6206 = vmatprep.subr.bf16.mxu0 %v10224_v10  ;;  %v10278_v7 = vld [vmem:[#allocation14 + $0xd5c] ss:$24 sps:$4 sm:$0xff]   ;;  %v10273_v10 = vld [vmem:[#allocation14 + $0xa58] ss:$24 sps:$4 sm:$0xff]  }
 0x2e3   :  { %6166 = vmatpush1.bf16.msra.mxu1 %v10219_v11  ;;  %6207 = vmatpush1.bf16.msra.mxu0 %v10222_v16  ;;  %v10276_v11 = vld [vmem:[#allocation14 + $0xd58] ss:$24 sps:$4 sm:$0xff]   ;;  %v10281_v16 = vld [vmem:[#allocation14 + $0xa2c] ss:$24 sps:$4 sm:$0xff]  }
 0x2e4   :  { %6167 = vmatprep.subr.bf16.mxu1 %v10227_v17  ;;  %6208 = vmatprep.subr.bf16.mxu0 %v10230_v18  ;;  %v10284_v17 = vld [vmem:[#allocation14 + $0xd2c] ss:$24 sps:$4 sm:$0xff]  }
 0x2e7   :  { %6168 = vmatpush2.bf16.msra.mxu1 %v10225_v19  ;;  %6209 = vmatpush2.bf16.msra.mxu0 %v10228_v27 }
 0x2e8   :  { %6169 = vmatprep.subr.bf16.mxu1 %v10233_v28  ;;  %6210 = vmatprep.subr.bf16.mxu0 %v10236_v30  ;;  %v10279_v28 = vld [vmem:[#allocation14 + $0xa28] ss:$24 sps:$4 sm:$0xff]  }
 0x2e9   :  { %v10282_v30 = vld [vmem:[#allocation14 + $0xd28] ss:$24 sps:$4 sm:$0xff]  }
 0x2eb   :  { %6170 = vmatpush2.bf16.msra.mxu1 %v10231_v23  ;;  %6211 = vmatpush2.bf16.msra.mxu0 %v10234_v31 }
 0x2ec   :  { %6171 = vmatprep.subr.bf16.mxu1 %v10239_v34  ;;  %6212 = vmatprep.subr.bf16.mxu0 %v10242_v35  ;;  %v10287_v34 = vld [vmem:[#allocation14 + $0x9fc] ss:$24 sps:$4 sm:$0xff]  }
 0x2ed   :  { %v10290_v35 = vld [vmem:[#allocation14 + $0xcfc] ss:$24 sps:$4 sm:$0xff]  }
 0x2ef   :  { %6172 = vmatpush2.bf16.msra.mxu1 %v10237_v36  ;;  %6213 = vmatpush2.bf16.msra.mxu0 %v10240_v29 }
 0x2f0   :  { %6173 = vmatprep.subr.bf16.mxu1 %v10245_v38  ;;  %6214 = vmatprep.subr.bf16.mxu0 %v10248_v47 }
 0x2f3   :  { %6174 = vmatpush2.bf16.msra.mxu1 %v10243_v48  ;;  %6215 = vmatpush2.bf16.msra.mxu0 %v10246_v50  ;;  %v10285_v48 = vld [vmem:[#allocation14 + $0x9f8] ss:$24 sps:$4 sm:$0xff]  }
 0x2f4   :  { %6175 = vmatprep.subr.bf16.mxu1 %v10251_v51  ;;  %6216 = vmatprep.subr.bf16.mxu0 %v10254_v52  ;;  %v10288_v50 = vld [vmem:[#allocation14 + $0xcf8] ss:$24 sps:$4 sm:$0xff]   ;;  %v10293_v52 = vld [vmem:[#allocation14 + $0x9cc] ss:$24 sps:$4 sm:$0xff]  }
 0x2f7   :  { %6176 = vmatpush2.bf16.msra.mxu1 %v10249_v53  ;;  %6217 = vmatpush2.bf16.msra.mxu0 %v10252_v55  ;;  %v10296_v53 = vld [vmem:[#allocation14 + $0xccc] ss:$24 sps:$4 sm:$0xff]   ;;  %v10291_v55 = vld [vmem:[#allocation14 + $0x9c8] ss:$24 sps:$4 sm:$0xff]  }
 0x2f8   :  { %6177 = vmatprep.subr.bf16.mxu1 %v10257_v56  ;;  %6218 = vmatprep.subr.bf16.mxu0 %v10260_v57  ;;  %v10294_v56 = vld [vmem:[#allocation14 + $0xcc8] ss:$24 sps:$4 sm:$0xff]   ;;  %v10299_v57 = vld [vmem:[#allocation14 + $0x99c] ss:$24 sps:$4 sm:$0xff]  }
 0x2fb   :  { %6178 = vmatpush2.bf16.msra.mxu1 %v10255_v58  ;;  %6219 = vmatpush2.bf16.msra.mxu0 %v10258_v61  ;;  %v10302_v58 = vld [vmem:[#allocation14 + $0xc9c] ss:$24 sps:$4 sm:$0xff]   ;;  %v10297_v61 = vld [vmem:[#allocation14 + $0x998] ss:$24 sps:$4 sm:$0xff]  }
 0x2fc   :  { %6179 = vmatprep.subr.bf16.mxu1 %v10263_v62  ;;  %6220 = vmatprep.subr.bf16.mxu0 %v10266_v63  ;;  %v10300_v62 = vld [vmem:[#allocation14 + $0xc98] ss:$24 sps:$4 sm:$0xff]   ;;  %v10305_v63 = vld [vmem:[#allocation14 + $0x96c] ss:$24 sps:$4 sm:$0xff]  }
 0x2ff   :  { %6180 = vmatpush2.bf16.msra.mxu1 %v10261_v0  ;;  %6221 = vmatpush2.bf16.msra.mxu0 %v10264_v1  ;;  %v10308_v0 = vld [vmem:[#allocation14 + $0xc6c] ss:$24 sps:$4 sm:$0xff]   ;;  %v10303_v1 = vld [vmem:[#allocation14 + $0x968] ss:$24 sps:$4 sm:$0xff]  }
 0x300   :  { %6181 = vmatprep.subr.bf16.mxu1 %v10269_v41  ;;  %6222 = vmatprep.subr.bf16.mxu0 %v10272_v2  ;;  %v10306_v41 = vld [vmem:[#allocation14 + $0xc68] ss:$24 sps:$4 sm:$0xff]   ;;  %v10311_v2 = vld [vmem:[#allocation14 + $0x93c] ss:$24 sps:$4 sm:$0xff]  }
 0x303   :  { %6182 = vmatpush2.bf16.msra.mxu1 %v10267_v3  ;;  %6223 = vmatpush2.bf16.msra.mxu0 %v10270_v4  ;;  %v10314_v3 = vld [vmem:[#allocation14 + $0xc3c] ss:$24 sps:$4 sm:$0xff]   ;;  %v10309_v4 = vld [vmem:[#allocation14 + $0x938] ss:$24 sps:$4 sm:$0xff]  }
 0x304   :  { %6233 = vmatprep.subr.bf16.mxu1 %v10275_v5  ;;  %6274 = vmatprep.subr.bf16.mxu0 %v10278_v7  ;;  %v10312_v5 = vld [vmem:[#allocation14 + $0xc38] ss:$24 sps:$4 sm:$0xff]   ;;  %v10317_v7 = vld [vmem:[#allocation14 + $0x90c] ss:$24 sps:$4 sm:$0xff]  }
 0x306   :  { %v5939_v18 = vpop.f32.mrf.mxu1  ;;  %6184 = vmatmul.mubr.bf16.vlgmr.msra.gmra.mxu1 %v11505_v6  ;;  %6225 = vmatmul.mubr.bf16.vlgmr.msra.gmra.mxu0 %v11507_v8  ;;  %v5980_v19 = vpop.f32.mrf.mxu0 }
 0x307   :  { %v5940_v27 = vadd.f32 %v5939_v18, %v11563_v37  ;;  %6234 = vmatpush1.bf16.msra.mxu1 %v10273_v10  ;;  %6275 = vmatpush1.bf16.msra.mxu0 %v10276_v11  ;;  %v10320_v10 = vld [vmem:[#allocation14 + $0xc0c] ss:$24 sps:$4 sm:$0xff]   ;;  %v10315_v11 = vld [vmem:[#allocation14 + $0x908] ss:$24 sps:$4 sm:$0xff]   ;;  %v10326_v18 = vld [vmem:[#allocation14 + $0xedc] ss:$24 sps:$4 sm:$0xff]  }
 0x308   :  { %v5941_v23 = vpop.f32.mrf.mxu1  ;;  %v5982_v31 = vpop.f32.mrf.mxu0  ;;  %6235 = vmatprep.subr.bf16.mxu1 %v10281_v16  ;;  %6276 = vmatprep.subr.bf16.mxu0 %v10284_v17  ;;  %v10318_v16 = vld [vmem:[#allocation14 + $0xc08] ss:$24 sps:$4 sm:$0xff]   ;;  %v10323_v17 = vld [vmem:[#allocation14 + $0xbdc] ss:$24 sps:$4 sm:$0xff]  }
 0x309   :  { %v5942_v36 = vadd.f32 %v5941_v23, %v11567_v49  ;;  %v11573_v29 = vadd.f32 %v5980_v19, %v5940_v27  ;;  %6265 = vmatprep.mubr.bf16.mxu1 %v11509_v13  ;;  %6306 = vmatprep.mubr.bf16.mxu0 %v11511_v14  ;;  %v10321_v19 = vld [vmem:[#allocation14 + $0xbd8] ss:$24 sps:$4 sm:$0xff]   ;;  %v10327_v23 = vld [vmem:[#allocation14 + $0xba8] ss:$24 sps:$4 sm:$0xff]  }
 0x30a   :  { %v5943_v38 = vpop.f32.mrf.mxu1  ;;  %v5984_v37 = vpop.f32.mrf.mxu0  ;;  %v10324_v27 = vld [vmem:[#allocation14 + $0xed8] ss:$24 sps:$4 sm:$0xff]  }
 0x30b   :  { %v11577_v47 = vadd.f32 %v5982_v31, %v5942_v36  ;;  %6236 = vmatpush1.bf16.msra.mxu1 %v10279_v28  ;;  %6277 = vmatpush1.bf16.msra.mxu0 %v10282_v30  ;;  %v10329_v28 = vld [vmem:[#allocation14 + $0xbac] ss:$24 sps:$4 sm:$0xff]   ;;  %v10330_v31 = vld [vmem:[#allocation14 + $0xea8] ss:$24 sps:$4 sm:$0xff]   ;;  %v10333_v36 = vld [vmem:[#allocation14 + $0xb78] ss:$24 sps:$4 sm:$0xff]  }
 0x30c   :  { %v5944_v51 = vpop.f32.mrf.mxu1  ;;  %6237 = vmatprep.subr.bf16.mxu1 %v10287_v34  ;;  %6278 = vmatprep.subr.bf16.mxu0 %v10290_v35  ;;  %v5985_v49 = vpop.f32.mrf.mxu0  ;;  %v10332_v30 = vld [vmem:[#allocation14 + $0xeac] ss:$24 sps:$4 sm:$0xff]   ;;  %v10335_v34 = vld [vmem:[#allocation14 + $0xb7c] ss:$24 sps:$4 sm:$0xff]   ;;  %v10336_v38 = vld [vmem:[#allocation14 + $0xe78] ss:$24 sps:$4 sm:$0xff]  }
 0x30d   :  { %v10338_v35 = vld [vmem:[#allocation14 + $0xe7c] ss:$24 sps:$4 sm:$0xff]   ;;  %v10341_v37 = vld [vmem:[#allocation14 + $0xb4c] ss:$24 sps:$4 sm:$0xff]   ;;  %v10342_v51 = vld [vmem:[#allocation14 + $0xe48] ss:$24 sps:$4 sm:$0xff]  }
 0x30e   :  { %v10345_v49 = vld [vmem:[#allocation14 + $0xb18] ss:$24 sps:$4 sm:$0xff]  }
 0x30f   :  { %6238 = vmatpush1.bf16.msra.mxu1 %v10285_v48  ;;  %6279 = vmatpush1.bf16.msra.mxu0 %v10288_v50  ;;  %v10344_v48 = vld [vmem:[#allocation14 + $0xe4c] ss:$24 sps:$4 sm:$0xff]   ;;  %v10339_v50 = vld [vmem:[#allocation14 + $0xb48] ss:$24 sps:$4 sm:$0xff]  }
 0x310   :  { %6239 = vmatprep.subr.bf16.mxu1 %v10293_v52  ;;  %6280 = vmatprep.subr.bf16.mxu0 %v10296_v53  ;;  %v10347_v52 = vld [vmem:[#allocation14 + $0xb1c] ss:$24 sps:$4 sm:$0xff]  }
 0x311   :  { %v10350_v53 = vld [vmem:[#allocation14 + $0xe1c] ss:$24 sps:$4 sm:$0xff]  }
 0x313   :  { %6240 = vmatpush1.bf16.msra.mxu1 %v10291_v55  ;;  %6281 = vmatpush1.bf16.msra.mxu0 %v10294_v56  ;;  %v10348_v55 = vld [vmem:[#allocation14 + $0xe18] ss:$24 sps:$4 sm:$0xff]   ;;  %v10353_v56 = vld [vmem:[#allocation14 + $0xaec] ss:$24 sps:$4 sm:$0xff]  }
 0x314   :  { %6241 = vmatprep.subr.bf16.mxu1 %v10299_v57  ;;  %6282 = vmatprep.subr.bf16.mxu0 %v10302_v58  ;;  %v10356_v57 = vld [vmem:[#allocation14 + $0xdec] ss:$24 sps:$4 sm:$0xff]   ;;  %v10351_v58 = vld [vmem:[#allocation14 + $0xae8] ss:$24 sps:$4 sm:$0xff]  }
 0x317   :  { %6242 = vmatpush1.bf16.msra.mxu1 %v10297_v61  ;;  %6283 = vmatpush1.bf16.msra.mxu0 %v10300_v62  ;;  %v10354_v61 = vld [vmem:[#allocation14 + $0xde8] ss:$24 sps:$4 sm:$0xff]   ;;  %v10359_v62 = vld [vmem:[#allocation14 + $0xabc] ss:$24 sps:$4 sm:$0xff]  }
 0x318   :  { %6243 = vmatprep.subr.bf16.mxu1 %v10305_v63  ;;  %6284 = vmatprep.subr.bf16.mxu0 %v10308_v0  ;;  %v10362_v63 = vld [vmem:[#allocation14 + $0xdbc] ss:$24 sps:$4 sm:$0xff]   ;;  %v10357_v0 = vld [vmem:[#allocation14 + $0xab8] ss:$24 sps:$4 sm:$0xff]  }
 0x31b   :  { %6244 = vmatpush1.bf16.msra.mxu1 %v10303_v1  ;;  %6285 = vmatpush1.bf16.msra.mxu0 %v10306_v41  ;;  %v10360_v1 = vld [vmem:[#allocation14 + $0xdb8] ss:$24 sps:$4 sm:$0xff]   ;;  %v10365_v41 = vld [vmem:[#allocation14 + $0xa8c] ss:$24 sps:$4 sm:$0xff]  }
 0x31c   :  { %6245 = vmatprep.subr.bf16.mxu1 %v10311_v2  ;;  %6286 = vmatprep.subr.bf16.mxu0 %v10314_v3  ;;  %v10368_v2 = vld [vmem:[#allocation14 + $0xd8c] ss:$24 sps:$4 sm:$0xff]   ;;  %v10363_v3 = vld [vmem:[#allocation14 + $0xa88] ss:$24 sps:$4 sm:$0xff]  }
 0x31f   :  { %6246 = vmatpush1.bf16.msra.mxu1 %v10309_v4  ;;  %6287 = vmatpush1.bf16.msra.mxu0 %v10312_v5  ;;  %v10366_v4 = vld [vmem:[#allocation14 + $0xd88] ss:$24 sps:$4 sm:$0xff]   ;;  %v10371_v5 = vld [vmem:[#allocation14 + $0x105c] ss:$24 sps:$4 sm:$0xff]  }
 0x320   :  { %6247 = vmatprep.subr.bf16.mxu1 %v10317_v7  ;;  %6288 = vmatprep.subr.bf16.mxu0 %v10320_v10  ;;  %v10374_v7 = vld [vmem:[#allocation14 + $0x135c] ss:$24 sps:$4 sm:$0xff]   ;;  %v10369_v10 = vld [vmem:[#allocation14 + $0x1058] ss:$24 sps:$4 sm:$0xff]  }
 0x323   :  { %6248 = vmatpush1.bf16.msra.mxu1 %v10315_v11  ;;  %6289 = vmatpush1.bf16.msra.mxu0 %v10318_v16  ;;  %v10372_v11 = vld [vmem:[#allocation14 + $0x1358] ss:$24 sps:$4 sm:$0xff]   ;;  %v10377_v16 = vld [vmem:[#allocation14 + $0x102c] ss:$24 sps:$4 sm:$0xff]  }
 0x324   :  { %6249 = vmatprep.subr.bf16.mxu1 %v10323_v17  ;;  %6290 = vmatprep.subr.bf16.mxu0 %v10326_v18  ;;  %v10380_v17 = vld [vmem:[#allocation14 + $0x132c] ss:$24 sps:$4 sm:$0xff]  }
 0x327   :  { %6250 = vmatpush2.bf16.msra.mxu1 %v10321_v19  ;;  %6291 = vmatpush2.bf16.msra.mxu0 %v10324_v27 }
 0x328   :  { %6251 = vmatprep.subr.bf16.mxu1 %v10329_v28  ;;  %6292 = vmatprep.subr.bf16.mxu0 %v10332_v30  ;;  %v10375_v28 = vld [vmem:[#allocation14 + $0x1028] ss:$24 sps:$4 sm:$0xff]  }
 0x329   :  { %v10378_v30 = vld [vmem:[#allocation14 + $0x1328] ss:$24 sps:$4 sm:$0xff]  }
 0x32b   :  { %6252 = vmatpush2.bf16.msra.mxu1 %v10327_v23  ;;  %6293 = vmatpush2.bf16.msra.mxu0 %v10330_v31 }
 0x32c   :  { %6253 = vmatprep.subr.bf16.mxu1 %v10335_v34  ;;  %6294 = vmatprep.subr.bf16.mxu0 %v10338_v35  ;;  %v10383_v34 = vld [vmem:[#allocation14 + $0xffc] ss:$24 sps:$4 sm:$0xff]  }
 0x32d   :  { %v10386_v35 = vld [vmem:[#allocation14 + $0x12fc] ss:$24 sps:$4 sm:$0xff]  }
 0x32f   :  { %6254 = vmatpush2.bf16.msra.mxu1 %v10333_v36  ;;  %6295 = vmatpush2.bf16.msra.mxu0 %v10336_v38 }
 0x330   :  { %6255 = vmatprep.subr.bf16.mxu1 %v10341_v37  ;;  %6296 = vmatprep.subr.bf16.mxu0 %v10344_v48 }
 0x333   :  { %6256 = vmatpush2.bf16.msra.mxu1 %v10339_v50  ;;  %6297 = vmatpush2.bf16.msra.mxu0 %v10342_v51  ;;  %v10381_v50 = vld [vmem:[#allocation14 + $0xff8] ss:$24 sps:$4 sm:$0xff]  }
 0x334   :  { %6257 = vmatprep.subr.bf16.mxu1 %v10347_v52  ;;  %6298 = vmatprep.subr.bf16.mxu0 %v10350_v53  ;;  %v10384_v51 = vld [vmem:[#allocation14 + $0x12f8] ss:$24 sps:$4 sm:$0xff]   ;;  %v10389_v53 = vld [vmem:[#allocation14 + $0xfcc] ss:$24 sps:$4 sm:$0xff]  }
 0x337   :  { %6258 = vmatpush2.bf16.msra.mxu1 %v10345_v49  ;;  %6299 = vmatpush2.bf16.msra.mxu0 %v10348_v55  ;;  %v10392_v49 = vld [vmem:[#allocation14 + $0x12cc] ss:$24 sps:$4 sm:$0xff]   ;;  %v10387_v55 = vld [vmem:[#allocation14 + $0xfc8] ss:$24 sps:$4 sm:$0xff]  }
 0x338   :  { %6259 = vmatprep.subr.bf16.mxu1 %v10353_v56  ;;  %6300 = vmatprep.subr.bf16.mxu0 %v10356_v57  ;;  %v10390_v56 = vld [vmem:[#allocation14 + $0x12c8] ss:$24 sps:$4 sm:$0xff]   ;;  %v10395_v57 = vld [vmem:[#allocation14 + $0xf9c] ss:$24 sps:$4 sm:$0xff]  }
 0x33b   :  { %6260 = vmatpush2.bf16.msra.mxu1 %v10351_v58  ;;  %6301 = vmatpush2.bf16.msra.mxu0 %v10354_v61  ;;  %v10398_v58 = vld [vmem:[#allocation14 + $0x129c] ss:$24 sps:$4 sm:$0xff]   ;;  %v10393_v61 = vld [vmem:[#allocation14 + $0xf98] ss:$24 sps:$4 sm:$0xff]  }
 0x33c   :  { %6261 = vmatprep.subr.bf16.mxu1 %v10359_v62  ;;  %6302 = vmatprep.subr.bf16.mxu0 %v10362_v63  ;;  %v10396_v62 = vld [vmem:[#allocation14 + $0x1298] ss:$24 sps:$4 sm:$0xff]   ;;  %v10401_v63 = vld [vmem:[#allocation14 + $0xf6c] ss:$24 sps:$4 sm:$0xff]  }
 0x33f   :  { %6262 = vmatpush2.bf16.msra.mxu1 %v10357_v0  ;;  %6303 = vmatpush2.bf16.msra.mxu0 %v10360_v1  ;;  %v10404_v0 = vld [vmem:[#allocation14 + $0x126c] ss:$24 sps:$4 sm:$0xff]   ;;  %v10399_v1 = vld [vmem:[#allocation14 + $0xf68] ss:$24 sps:$4 sm:$0xff]  }
 0x340   :  { %6263 = vmatprep.subr.bf16.mxu1 %v10365_v41  ;;  %6304 = vmatprep.subr.bf16.mxu0 %v10368_v2  ;;  %v10402_v41 = vld [vmem:[#allocation14 + $0x1268] ss:$24 sps:$4 sm:$0xff]   ;;  %v10407_v2 = vld [vmem:[#allocation14 + $0xf3c] ss:$24 sps:$4 sm:$0xff]  }
 0x343   :  { %6264 = vmatpush2.bf16.msra.mxu1 %v10363_v3  ;;  %6305 = vmatpush2.bf16.msra.mxu0 %v10366_v4  ;;  %v10410_v3 = vld [vmem:[#allocation14 + $0x123c] ss:$24 sps:$4 sm:$0xff]   ;;  %v10405_v4 = vld [vmem:[#allocation14 + $0xf38] ss:$24 sps:$4 sm:$0xff]  }
 0x344   :  { %6315 = vmatprep.subr.bf16.mxu1 %v10371_v5  ;;  %6356 = vmatprep.subr.bf16.mxu0 %v10374_v7  ;;  %v10408_v5 = vld [vmem:[#allocation14 + $0x1238] ss:$24 sps:$4 sm:$0xff]   ;;  %v10413_v7 = vld [vmem:[#allocation14 + $0xf0c] ss:$24 sps:$4 sm:$0xff]  }
 0x346   :  { %v6021_v18 = vpop.f32.mrf.mxu1  ;;  %6266 = vmatmul.mubr.bf16.vlgmr.msra.gmra.mxu1 %v11517_v32  ;;  %6307 = vmatmul.mubr.bf16.vlgmr.msra.gmra.mxu0 %v11519_v33  ;;  %v6062_v19 = vpop.f32.mrf.mxu0 }
 0x347   :  { %v6022_v27 = vadd.f32 %v6021_v18, %v11573_v29  ;;  %6316 = vmatpush1.bf16.msra.mxu1 %v10369_v10  ;;  %6357 = vmatpush1.bf16.msra.mxu0 %v10372_v11  ;;  %v10416_v10 = vld [vmem:[#allocation14 + $0x120c] ss:$24 sps:$4 sm:$0xff]   ;;  %v10411_v11 = vld [vmem:[#allocation14 + $0xf08] ss:$24 sps:$4 sm:$0xff]   ;;  %v10422_v18 = vld [vmem:[#allocation14 + $0x14dc] ss:$24 sps:$4 sm:$0xff]  }
 0x348   :  { %v6023_v23 = vpop.f32.mrf.mxu1  ;;  %v6064_v31 = vpop.f32.mrf.mxu0  ;;  %6317 = vmatprep.subr.bf16.mxu1 %v10377_v16  ;;  %6358 = vmatprep.subr.bf16.mxu0 %v10380_v17  ;;  %v10414_v16 = vld [vmem:[#allocation14 + $0x1208] ss:$24 sps:$4 sm:$0xff]   ;;  %v10419_v17 = vld [vmem:[#allocation14 + $0x11dc] ss:$24 sps:$4 sm:$0xff]  }
 0x349   :  { %v6024_v36 = vadd.f32 %v6023_v23, %v11577_v47  ;;  %v11583_v38 = vadd.f32 %v6062_v19, %v6022_v27  ;;  %6347 = vmatprep.mubr.bf16.mxu1 %v11521_v39  ;;  %6388 = vmatprep.mubr.bf16.mxu0 %v11529_v43  ;;  %v10417_v19 = vld [vmem:[#allocation14 + $0x11d8] ss:$24 sps:$4 sm:$0xff]   ;;  %v10423_v23 = vld [vmem:[#allocation14 + $0x11a8] ss:$24 sps:$4 sm:$0xff]  }
 0x34a   :  { %v6025_v37 = vpop.f32.mrf.mxu1  ;;  %v6066_v29 = vpop.f32.mrf.mxu0  ;;  %v10420_v27 = vld [vmem:[#allocation14 + $0x14d8] ss:$24 sps:$4 sm:$0xff]  }
 0x34b   :  { %v11587_v48 = vadd.f32 %v6064_v31, %v6024_v36  ;;  %6318 = vmatpush1.bf16.msra.mxu1 %v10375_v28  ;;  %6359 = vmatpush1.bf16.msra.mxu0 %v10378_v30  ;;  %v10425_v28 = vld [vmem:[#allocation14 + $0x11ac] ss:$24 sps:$4 sm:$0xff]   ;;  %v10426_v31 = vld [vmem:[#allocation14 + $0x14a8] ss:$24 sps:$4 sm:$0xff]   ;;  %v10429_v36 = vld [vmem:[#allocation14 + $0x1178] ss:$24 sps:$4 sm:$0xff]  }
 0x34c   :  { %v6026_v52 = vpop.f32.mrf.mxu1  ;;  %6319 = vmatprep.subr.bf16.mxu1 %v10383_v34  ;;  %6360 = vmatprep.subr.bf16.mxu0 %v10386_v35  ;;  %v6067_v47 = vpop.f32.mrf.mxu0  ;;  %v10428_v30 = vld [vmem:[#allocation14 + $0x14ac] ss:$24 sps:$4 sm:$0xff]   ;;  %v10431_v34 = vld [vmem:[#allocation14 + $0x117c] ss:$24 sps:$4 sm:$0xff]   ;;  %v10432_v37 = vld [vmem:[#allocation14 + $0x1478] ss:$24 sps:$4 sm:$0xff]  }
 0x34d   :  { %v10434_v35 = vld [vmem:[#allocation14 + $0x147c] ss:$24 sps:$4 sm:$0xff]   ;;  %v10437_v29 = vld [vmem:[#allocation14 + $0x114c] ss:$24 sps:$4 sm:$0xff]   ;;  %v10438_v52 = vld [vmem:[#allocation14 + $0x1448] ss:$24 sps:$4 sm:$0xff]  }
 0x34e   :  { %v10441_v47 = vld [vmem:[#allocation14 + $0x1118] ss:$24 sps:$4 sm:$0xff]  }
 0x34f   :  { %6320 = vmatpush1.bf16.msra.mxu1 %v10381_v50  ;;  %6361 = vmatpush1.bf16.msra.mxu0 %v10384_v51  ;;  %v10440_v50 = vld [vmem:[#allocation14 + $0x144c] ss:$24 sps:$4 sm:$0xff]   ;;  %v10435_v51 = vld [vmem:[#allocation14 + $0x1148] ss:$24 sps:$4 sm:$0xff]  }
 0x350   :  { %6321 = vmatprep.subr.bf16.mxu1 %v10389_v53  ;;  %6362 = vmatprep.subr.bf16.mxu0 %v10392_v49  ;;  %v10443_v53 = vld [vmem:[#allocation14 + $0x111c] ss:$24 sps:$4 sm:$0xff]  }
 0x351   :  { %v10446_v49 = vld [vmem:[#allocation14 + $0x141c] ss:$24 sps:$4 sm:$0xff]  }
 0x353   :  { %6322 = vmatpush1.bf16.msra.mxu1 %v10387_v55  ;;  %6363 = vmatpush1.bf16.msra.mxu0 %v10390_v56  ;;  %v10444_v55 = vld [vmem:[#allocation14 + $0x1418] ss:$24 sps:$4 sm:$0xff]   ;;  %v10449_v56 = vld [vmem:[#allocation14 + $0x10ec] ss:$24 sps:$4 sm:$0xff]  }
 0x354   :  { %6323 = vmatprep.subr.bf16.mxu1 %v10395_v57  ;;  %6364 = vmatprep.subr.bf16.mxu0 %v10398_v58  ;;  %v10452_v57 = vld [vmem:[#allocation14 + $0x13ec] ss:$24 sps:$4 sm:$0xff]   ;;  %v10447_v58 = vld [vmem:[#allocation14 + $0x10e8] ss:$24 sps:$4 sm:$0xff]  }
 0x357   :  { %6324 = vmatpush1.bf16.msra.mxu1 %v10393_v61  ;;  %6365 = vmatpush1.bf16.msra.mxu0 %v10396_v62  ;;  %v10450_v61 = vld [vmem:[#allocation14 + $0x13e8] ss:$24 sps:$4 sm:$0xff]   ;;  %v10455_v62 = vld [vmem:[#allocation14 + $0x10bc] ss:$24 sps:$4 sm:$0xff]  }
 0x358   :  { %6325 = vmatprep.subr.bf16.mxu1 %v10401_v63  ;;  %6366 = vmatprep.subr.bf16.mxu0 %v10404_v0  ;;  %v10458_v63 = vld [vmem:[#allocation14 + $0x13bc] ss:$24 sps:$4 sm:$0xff]   ;;  %v10453_v0 = vld [vmem:[#allocation14 + $0x10b8] ss:$24 sps:$4 sm:$0xff]  }
 0x35b   :  { %6326 = vmatpush1.bf16.msra.mxu1 %v10399_v1  ;;  %6367 = vmatpush1.bf16.msra.mxu0 %v10402_v41  ;;  %v10456_v1 = vld [vmem:[#allocation14 + $0x13b8] ss:$24 sps:$4 sm:$0xff]   ;;  %v10461_v41 = vld [vmem:[#allocation14 + $0x108c] ss:$24 sps:$4 sm:$0xff]  }
 0x35c   :  { %6327 = vmatprep.subr.bf16.mxu1 %v10407_v2  ;;  %6368 = vmatprep.subr.bf16.mxu0 %v10410_v3  ;;  %v10464_v2 = vld [vmem:[#allocation14 + $0x138c] ss:$24 sps:$4 sm:$0xff]   ;;  %v10459_v3 = vld [vmem:[#allocation14 + $0x1088] ss:$24 sps:$4 sm:$0xff]  }
 0x35f   :  { %6328 = vmatpush1.bf16.msra.mxu1 %v10405_v4  ;;  %6369 = vmatpush1.bf16.msra.mxu0 %v10408_v5  ;;  %v10462_v4 = vld [vmem:[#allocation14 + $0x1388] ss:$24 sps:$4 sm:$0xff]   ;;  %v10467_v5 = vld [vmem:[#allocation14 + $0x165c] ss:$24 sps:$4 sm:$0xff]  }
 0x360   :  { %6329 = vmatprep.subr.bf16.mxu1 %v10413_v7  ;;  %6370 = vmatprep.subr.bf16.mxu0 %v10416_v10  ;;  %v10470_v7 = vld [vmem:[#allocation14 + $0x164] ss:$24 sps:$4 sm:$0xff]   ;;  %v10465_v10 = vld [vmem:[#allocation14 + $0x1658] ss:$24 sps:$4 sm:$0xff]  }
 0x363   :  { %6330 = vmatpush1.bf16.msra.mxu1 %v10411_v11  ;;  %6371 = vmatpush1.bf16.msra.mxu0 %v10414_v16  ;;  %v10468_v11 = vld [vmem:[#allocation14 + $0x160] ss:$24 sps:$4 sm:$0xff]   ;;  %v10473_v16 = vld [vmem:[#allocation14 + $0x162c] ss:$24 sps:$4 sm:$0xff]  }
 0x364   :  { %6331 = vmatprep.subr.bf16.mxu1 %v10419_v17  ;;  %6372 = vmatprep.subr.bf16.mxu0 %v10422_v18  ;;  %v10476_v17 = vld [vmem:[#allocation14 + $0x134] ss:$24 sps:$4 sm:$0xff]  }
 0x367   :  { %6332 = vmatpush2.bf16.msra.mxu1 %v10417_v19  ;;  %6373 = vmatpush2.bf16.msra.mxu0 %v10420_v27 }
 0x368   :  { %6333 = vmatprep.subr.bf16.mxu1 %v10425_v28  ;;  %6374 = vmatprep.subr.bf16.mxu0 %v10428_v30  ;;  %v10471_v28 = vld [vmem:[#allocation14 + $0x1628] ss:$24 sps:$4 sm:$0xff]  }
 0x369   :  { %v10474_v30 = vld [vmem:[#allocation14 + $0x130] ss:$24 sps:$4 sm:$0xff]  }
 0x36b   :  { %6334 = vmatpush2.bf16.msra.mxu1 %v10423_v23  ;;  %6375 = vmatpush2.bf16.msra.mxu0 %v10426_v31  ;;  %v10479_v31 = vld [vmem:[#allocation14 + $0x15fc] ss:$24 sps:$4 sm:$0xff]  }
 0x36c   :  { %6335 = vmatprep.subr.bf16.mxu1 %v10431_v34  ;;  %6376 = vmatprep.subr.bf16.mxu0 %v10434_v35  ;;  %v10482_v34 = vld [vmem:[#allocation14 + $0x104] ss:$24 sps:$4 sm:$0xff]  }
 0x36f   :  { %6336 = vmatpush2.bf16.msra.mxu1 %v10429_v36  ;;  %6377 = vmatpush2.bf16.msra.mxu0 %v10432_v37 }
 0x370   :  { %6337 = vmatprep.subr.bf16.mxu1 %v10437_v29  ;;  %6378 = vmatprep.subr.bf16.mxu0 %v10440_v50  ;;  %v10477_v29 = vld [vmem:[#allocation14 + $0x15f8] ss:$24 sps:$4 sm:$0xff]  }
 0x371   :  { %v10480_v50 = vld [vmem:[#allocation14 + $0x100] ss:$24 sps:$4 sm:$0xff]  }
 0x373   :  { %6338 = vmatpush2.bf16.msra.mxu1 %v10435_v51  ;;  %6379 = vmatpush2.bf16.msra.mxu0 %v10438_v52  ;;  %v10485_v52 = vld [vmem:[#allocation14 + $0x15cc] ss:$24 sps:$4 sm:$0xff]  }
 0x374   :  { %6339 = vmatprep.subr.bf16.mxu1 %v10443_v53  ;;  %6380 = vmatprep.subr.bf16.mxu0 %v10446_v49  ;;  %v10488_v53 = vld [vmem:[#allocation14 + $0xd4] ss:$24 sps:$4 sm:$0xff]  }
 0x377   :  { %6340 = vmatpush2.bf16.msra.mxu1 %v10441_v47  ;;  %6381 = vmatpush2.bf16.msra.mxu0 %v10444_v55  ;;  %v10486_v47 = vld [vmem:[#allocation14 + $0xd0] ss:$24 sps:$4 sm:$0xff]   ;;  %v10491_v55 = vld [vmem:[#allocation14 + $0x159c] ss:$24 sps:$4 sm:$0xff]  }
 0x378   :  { %6341 = vmatprep.subr.bf16.mxu1 %v10449_v56  ;;  %6382 = vmatprep.subr.bf16.mxu0 %v10452_v57  ;;  %v10489_v56 = vld [vmem:[#allocation14 + $0x1598] ss:$24 sps:$4 sm:$0xff]  }
 0x379   :  { %v10492_v57 = vld [vmem:[#allocation14 + $0xa0] ss:$24 sps:$4 sm:$0xff]  }
 0x37b   :  { %6342 = vmatpush2.bf16.msra.mxu1 %v10447_v58  ;;  %6383 = vmatpush2.bf16.msra.mxu0 %v10450_v61  ;;  %v10497_v58 = vld [vmem:[#allocation14 + $0x156c] ss:$24 sps:$4 sm:$0xff]  }
 0x37c   :  { %6343 = vmatprep.subr.bf16.mxu1 %v10455_v62  ;;  %6384 = vmatprep.subr.bf16.mxu0 %v10458_v63  ;;  %v10500_v61 = vld [vmem:[#allocation14 + $0x74] ss:$24 sps:$4 sm:$0xff]   ;;  %v10495_v62 = vld [vmem:[#allocation14 + $0x1568] ss:$24 sps:$4 sm:$0xff]  }
 0x37d   :  { %v10498_v63 = vld [vmem:[#allocation14 + $0x70] ss:$24 sps:$4 sm:$0xff]  }
 0x37f   :  { %6344 = vmatpush2.bf16.msra.mxu1 %v10453_v0  ;;  %6385 = vmatpush2.bf16.msra.mxu0 %v10456_v1  ;;  %v10503_v0 = vld [vmem:[#allocation14 + $0x153c] ss:$24 sps:$4 sm:$0xff]  }
 0x380   :  { %6345 = vmatprep.subr.bf16.mxu1 %v10461_v41  ;;  %6386 = vmatprep.subr.bf16.mxu0 %v10464_v2  ;;  %v10506_v1 = vld [vmem:[#allocation14 + $0x44] ss:$24 sps:$4 sm:$0xff]   ;;  %v10501_v41 = vld [vmem:[#allocation14 + $0x1538] ss:$24 sps:$4 sm:$0xff]  }
 0x381   :  { %v10504_v2 = vld [vmem:[#allocation14 + $0x40] ss:$24 sps:$4 sm:$0xff]  }
 0x383   :  { %6346 = vmatpush2.bf16.msra.mxu1 %v10459_v3  ;;  %6387 = vmatpush2.bf16.msra.mxu0 %v10462_v4  ;;  %v10509_v3 = vld [vmem:[#allocation14 + $0x150c] ss:$24 sps:$4 sm:$0xff]  }
 0x384   :  { %6397 = vmatprep.subr.bf16.mxu1 %v10467_v5  ;;  %6438 = vmatprep.subr.bf16.mxu0 %v10470_v7  ;;  %v10512_v4 = vld [vmem:[#allocation14 + $0x14] ss:$24 sps:$4 sm:$0xff]   ;;  %v10507_v5 = vld [vmem:[#allocation14 + $0x1508] ss:$24 sps:$4 sm:$0xff]  }
 0x385   :  { %v10510_v7 = vld [vmem:[#allocation14 + $0x10] ss:$24 sps:$4 sm:$0xff]  }
 0x386   :  { %v6103_v18 = vpop.f32.mrf.mxu1  ;;  %6348 = vmatmul.mubr.bf16.vlgmr.msra.gmra.mxu1 %v11537_v12  ;;  %6389 = vmatmul.mubr.bf16.vlgmr.msra.gmra.mxu0 %v11539_v15  ;;  %v11591_v19 = vpop.f32.mrf.mxu0 }
 0x387   :  { %v11594_v27 = vadd.f32 %v6103_v18, %v11583_v38  ;;  %6398 = vmatpush1.bf16.msra.mxu1 %v10465_v10  ;;  %6439 = vmatpush1.bf16.msra.mxu0 %v10468_v11  ;;  %v10515_v10 = vld [vmem:[#allocation14 + $0x17dc] ss:$24 sps:$4 sm:$0xff]   ;;  %v10521_v18 = vld [vmem:[#allocation14 + $0x17ac] ss:$24 sps:$4 sm:$0xff]  }
 0x388   :  { %v6105_v23 = vpop.f32.mrf.mxu1  ;;  %6399 = vmatprep.subr.bf16.mxu1 %v10473_v16  ;;  %6440 = vmatprep.subr.bf16.mxu0 %v10476_v17  ;;  %v11596_v35 = vpop.f32.mrf.mxu0  ;;  %v10518_v11 = vld [vmem:[#allocation14 + $0x2e4] ss:$24 sps:$4 sm:$0xff]   ;;  %v10513_v16 = vld [vmem:[#allocation14 + $0x17d8] ss:$24 sps:$4 sm:$0xff]  }
 0x389   :  { %v11599_v36 = vadd.f32 %v6105_v23, %v11587_v48  ;;  %6429 = vmatprep.mubr.bf16.mxu1 %v11541_v20  ;;  %6470 = vmatprep.mubr.bf16.mxu0 %v11490_v44  ;;  %v10483_v48 = vld [vmem:[#allocation14 + $0x15c8] ss:$24 sps:$4 sm:$0xff]   ;;  %v10494_v44 = vld [vmem:[#allocation14 + $0xa4] ss:$24 sps:$4 sm:$0xff]  }
 0x38a   :  { %v6107_v38 = vpop.f32.mrf.mxu1  ;;  %v6148_v37 = vpop.f32.mrf.mxu0  ;;  %v10516_v17 = vld [vmem:[#allocation14 + $0x2e0] ss:$24 sps:$4 sm:$0xff]   ;;  %v10522_v23 = vld [vmem:[#allocation14 + $0x2b0] ss:$24 sps:$4 sm:$0xff]  }
 0x38b   :  { %6400 = vmatpush1.bf16.msra.mxu1 %v10471_v28  ;;  %6441 = vmatpush1.bf16.msra.mxu0 %v10474_v30  ;;  %v10524_v28 = vld [vmem:[#allocation14 + $0x2b4] ss:$24 sps:$4 sm:$0xff]   ;;  %v10519_v30 = vld [vmem:[#allocation14 + $0x17a8] ss:$24 sps:$4 sm:$0xff]   ;;  %v10525_v38 = vld [vmem:[#allocation14 + $0x1778] ss:$24 sps:$4 sm:$0xff]  }
 0x38c   :  { %v6108_v51 = vpop.f32.mrf.mxu1  ;;  %6401 = vmatprep.subr.bf16.mxu1 %v10479_v31  ;;  %6442 = vmatprep.subr.bf16.mxu0 %v10482_v34  ;;  %v6149_v49 = vpop.f32.mrf.mxu0  ;;  %v10527_v31 = vld [vmem:[#allocation14 + $0x177c] ss:$24 sps:$4 sm:$0xff]   ;;  %v10528_v37 = vld [vmem:[#allocation14 + $0x280] ss:$24 sps:$4 sm:$0xff]  }
 0x38d   :  { %v10530_v34 = vld [vmem:[#allocation14 + $0x284] ss:$24 sps:$4 sm:$0xff]   ;;  %v10531_v51 = vld [vmem:[#allocation14 + $0x1748] ss:$24 sps:$4 sm:$0xff]  }
 0x38e   :  { %v10542_v49 = vld [vmem:[#allocation14 + $0x224] ss:$24 sps:$4 sm:$0xff]  }
 0x38f   :  { %6402 = vmatpush1.bf16.msra.mxu1 %v10477_v29  ;;  %6443 = vmatpush1.bf16.msra.mxu0 %v10480_v50  ;;  %v10533_v29 = vld [vmem:[#allocation14 + $0x174c] ss:$24 sps:$4 sm:$0xff]  }
 0x390   :  { %6403 = vmatprep.subr.bf16.mxu1 %v10485_v52  ;;  %6444 = vmatprep.subr.bf16.mxu0 %v10488_v53  ;;  %v10536_v50 = vld [vmem:[#allocation14 + $0x254] ss:$24 sps:$4 sm:$0xff]   ;;  %v10534_v52 = vld [vmem:[#allocation14 + $0x250] ss:$24 sps:$4 sm:$0xff]  }
 0x391   :  { %v10539_v53 = vld [vmem:[#allocation14 + $0x171c] ss:$24 sps:$4 sm:$0xff]  }
 0x393   :  { %6404 = vmatpush1.bf16.msra.mxu1 %v10483_v48  ;;  %6445 = vmatpush1.bf16.msra.mxu0 %v10486_v47  ;;  %v10537_v48 = vld [vmem:[#allocation14 + $0x1718] ss:$24 sps:$4 sm:$0xff]  }
 0x394   :  { %6405 = vmatprep.subr.bf16.mxu1 %v10491_v55  ;;  %6446 = vmatprep.subr.bf16.mxu0 %v10494_v44  ;;  %v10540_v47 = vld [vmem:[#allocation14 + $0x220] ss:$24 sps:$4 sm:$0xff]   ;;  %v10545_v55 = vld [vmem:[#allocation14 + $0x16ec] ss:$24 sps:$4 sm:$0xff]  }
 0x395   :  { %v10548_v44 = vld [vmem:[#allocation14 + $0x1f4] ss:$24 sps:$4 sm:$0xff]  }
 0x397   :  { %6406 = vmatpush1.bf16.msra.mxu1 %v10489_v56  ;;  %6447 = vmatpush1.bf16.msra.mxu0 %v10492_v57  ;;  %v10543_v56 = vld [vmem:[#allocation14 + $0x16e8] ss:$24 sps:$4 sm:$0xff]  }
 0x398   :  { %6407 = vmatprep.subr.bf16.mxu1 %v10497_v58  ;;  %6448 = vmatprep.subr.bf16.mxu0 %v10500_v61  ;;  %v10546_v57 = vld [vmem:[#allocation14 + $0x1f0] ss:$24 sps:$4 sm:$0xff]   ;;  %v10551_v58 = vld [vmem:[#allocation14 + $0x16bc] ss:$24 sps:$4 sm:$0xff]  }
 0x399   :  { %v10554_v61 = vld [vmem:[#allocation14 + $0x1c4] ss:$24 sps:$4 sm:$0xff]  }
 0x39b   :  { %6408 = vmatpush1.bf16.msra.mxu1 %v10495_v62  ;;  %6449 = vmatpush1.bf16.msra.mxu0 %v10498_v63  ;;  %v10549_v62 = vld [vmem:[#allocation14 + $0x16b8] ss:$24 sps:$4 sm:$0xff]  }
 0x39c   :  { %6409 = vmatprep.subr.bf16.mxu1 %v10503_v0  ;;  %6450 = vmatprep.subr.bf16.mxu0 %v10506_v1  ;;  %v10552_v63 = vld [vmem:[#allocation14 + $0x1c0] ss:$24 sps:$4 sm:$0xff]   ;;  %v10557_v0 = vld [vmem:[#allocation14 + $0x168c] ss:$24 sps:$4 sm:$0xff]  }
 0x39d   :  { %v10560_v1 = vld [vmem:[#allocation14 + $0x194] ss:$24 sps:$4 sm:$0xff]  }
 0x39f   :  { %6410 = vmatpush1.bf16.msra.mxu1 %v10501_v41  ;;  %6451 = vmatpush1.bf16.msra.mxu0 %v10504_v2  ;;  %v471_v41 = vsub.s32 2, %v11478_v22  ;;  %v475_v2 = vsub.s32 3, %v11478_v22 }
 0x3a0   :  { %6411 = vmatprep.subr.bf16.mxu1 %v10509_v3  ;;  %6452 = vmatprep.subr.bf16.mxu0 %v10512_v4  ;;  %v11041_v3 = vld [vmem:[#allocation16] sm:$0x3f] }
 0x3a1   :  { %v1923_v4 = vrot.slane %v11041_v3, %v471_v41 }
 0x3a3   :  { %6412 = vmatpush1.bf16.msra.mxu1 %v10507_v5  ;;  %6453 = vmatpush1.bf16.msra.mxu0 %v10510_v7  ;;  %v10555_v5 = vld [vmem:[#allocation14 + $0x1688] ss:$24 sps:$4 sm:$0xff]  }
 0x3a4   :  { %6413 = vmatprep.subr.bf16.mxu1 %v10515_v10  ;;  %6454 = vmatprep.subr.bf16.mxu0 %v10518_v11  ;;  %v10558_v7 = vld [vmem:[#allocation14 + $0x190] ss:$24 sps:$4 sm:$0xff]   ;;  %v10563_v10 = vld [vmem:[#allocation14 + $0x464] ss:$24 sps:$4 sm:$0xff]  }
 0x3a5   :  { %v10566_v11 = vld [vmem:[#allocation14 + $0x764] ss:$24 sps:$4 sm:$0xff]  }
 0x3a7   :  { %6414 = vmatpush2.bf16.msra.mxu1 %v10513_v16  ;;  %6455 = vmatpush2.bf16.msra.mxu0 %v10516_v17  ;;  %v1927_v16 = vrot.slane %v11041_v3, %v475_v2  ;;  %v6145_v17 = vadd.f32 %v11591_v19, %v1923_v4  ;;  %v10567_v19 = vld [vmem:[#allocation14 + $0x430] ss:$24 sps:$4 sm:$0xff]   ;;  %v10593_v3 = vld [vmem:[#allocation14 + $0x374] ss:$24 sps:$4 sm:$0xff]  }
 0x3a8   :  { %6415 = vmatprep.subr.bf16.mxu1 %v10521_v18  ;;  %6456 = vmatprep.subr.bf16.mxu0 %v10524_v28  ;;  %v10561_v18 = vld [vmem:[#allocation14 + $0x460] ss:$24 sps:$4 sm:$0xff]   ;;  %v10596_v4 = vld [vmem:[#allocation14 + $0x674] ss:$24 sps:$4 sm:$0xff]  }
 0x3a9   :  { %v10564_v28 = vld [vmem:[#allocation14 + $0x760] ss:$24 sps:$4 sm:$0xff]  }
 0x3ab   :  { %6416 = vmatpush2.bf16.msra.mxu1 %v10519_v30  ;;  %6457 = vmatpush2.bf16.msra.mxu0 %v10522_v23  ;;  %v10569_v30 = vld [vmem:[#allocation14 + $0x434] ss:$24 sps:$4 sm:$0xff]  }
 0x3ac   :  { %6417 = vmatprep.subr.bf16.mxu1 %v10527_v31  ;;  %6458 = vmatprep.subr.bf16.mxu0 %v10530_v34  ;;  %v10572_v23 = vld [vmem:[#allocation14 + $0x734] ss:$24 sps:$4 sm:$0xff]   ;;  %v6147_v31 = vadd.f32 %v11596_v35, %v1927_v16  ;;  %v10597_v16 = vld [vmem:[#allocation14 + $0x340] ss:$24 sps:$4 sm:$0xff]  }
 0x3af   :  { %6418 = vmatpush2.bf16.msra.mxu1 %v10525_v38  ;;  %6459 = vmatpush2.bf16.msra.mxu0 %v10528_v37 }
 0x3b0   :  { %6419 = vmatprep.subr.bf16.mxu1 %v10533_v29  ;;  %6460 = vmatprep.subr.bf16.mxu0 %v10536_v50  ;;  %v10570_v29 = vld [vmem:[#allocation14 + $0x730] ss:$24 sps:$4 sm:$0xff]  }
 0x3b3   :  { %6420 = vmatpush2.bf16.msra.mxu1 %v10531_v51  ;;  %6461 = vmatpush2.bf16.msra.mxu0 %v10534_v52  ;;  %v10575_v52 = vld [vmem:[#allocation14 + $0x404] ss:$24 sps:$4 sm:$0xff]  }
 0x3b4   :  { %6421 = vmatprep.subr.bf16.mxu1 %v10539_v53  ;;  %6462 = vmatprep.subr.bf16.mxu0 %v10542_v49  ;;  %v10578_v53 = vld [vmem:[#allocation14 + $0x704] ss:$24 sps:$4 sm:$0xff]  }
 0x3b7   :  { %6422 = vmatpush2.bf16.msra.mxu1 %v10537_v48  ;;  %6463 = vmatpush2.bf16.msra.mxu0 %v10540_v47 }
 0x3b8   :  { %6423 = vmatprep.subr.bf16.mxu1 %v10545_v55  ;;  %6464 = vmatprep.subr.bf16.mxu0 %v10548_v44  ;;  %v10573_v55 = vld [vmem:[#allocation14 + $0x400] ss:$24 sps:$4 sm:$0xff]  }
 0x3b9   :  { %v10576_v44 = vld [vmem:[#allocation14 + $0x700] ss:$24 sps:$4 sm:$0xff]  }
 0x3bb   :  { %6424 = vmatpush2.bf16.msra.mxu1 %v10543_v56  ;;  %6465 = vmatpush2.bf16.msra.mxu0 %v10546_v57  ;;  %v10581_v57 = vld [vmem:[#allocation14 + $0x3d4] ss:$24 sps:$4 sm:$0xff]  }
 0x3bc   :  { %6425 = vmatprep.subr.bf16.mxu1 %v10551_v58  ;;  %6466 = vmatprep.subr.bf16.mxu0 %v10554_v61  ;;  %v10584_v58 = vld [vmem:[#allocation14 + $0x6d4] ss:$24 sps:$4 sm:$0xff]  }
 0x3bf   :  { %6426 = vmatpush2.bf16.msra.mxu1 %v10549_v62  ;;  %6467 = vmatpush2.bf16.msra.mxu0 %v10552_v63  ;;  %v10579_v62 = vld [vmem:[#allocation14 + $0x3d0] ss:$24 sps:$4 sm:$0xff]   ;;  %v10590_v63 = vld [vmem:[#allocation14 + $0x6a4] ss:$24 sps:$4 sm:$0xff]  }
 0x3c0   :  { %6427 = vmatprep.subr.bf16.mxu1 %v10557_v0  ;;  %6468 = vmatprep.subr.bf16.mxu0 %v10560_v1  ;;  %v10585_v0 = vld [vmem:[#allocation14 + $0x3a0] ss:$24 sps:$4 sm:$0xff]  }
 0x3c1   :  { %v10588_v1 = vld [vmem:[#allocation14 + $0x6a0] ss:$24 sps:$4 sm:$0xff]  }
 0x3c3   :  { %6428 = vmatpush2.bf16.msra.mxu1 %v10555_v5  ;;  %6469 = vmatpush2.bf16.msra.mxu0 %v10558_v7  ;;  %v10591_v5 = vld [vmem:[#allocation14 + $0x370] ss:$24 sps:$4 sm:$0xff]  }
 0x3c4   :  { %6479 = vmatprep.subr.bf16.mxu1 %v10563_v10  ;;  %6520 = vmatprep.subr.bf16.mxu0 %v10566_v11  ;;  %v10594_v7 = vld [vmem:[#allocation14 + $0x670] ss:$24 sps:$4 sm:$0xff]   ;;  %v10599_v10 = vld [vmem:[#allocation14 + $0x344] ss:$24 sps:$4 sm:$0xff]  }
 0x3c5   :  { %v10602_v11 = vld [vmem:[#allocation14 + $0x644] ss:$24 sps:$4 sm:$0xff]  }
 0x3c6   :  { %v6185_v34 = vpop.f32.mrf.mxu1  ;;  %6430 = vmatmul.mubr.bf16.vlgmr.msra.gmra.mxu1 %v11557_v9  ;;  %6471 = vmatmul.mubr.bf16.vlgmr.msra.gmra.mxu0 %v11495_v54  ;;  %v6226_v38 = vpop.f32.mrf.mxu0 }
 0x3c7   :  { %v6186_v37 = vadd.f32 %v6185_v34, %v6145_v17  ;;  %6480 = vmatpush1.bf16.msra.mxu1 %v10561_v18  ;;  %6521 = vmatpush1.bf16.msra.mxu0 %v10564_v28  ;;  %v10600_v17 = vld [vmem:[#allocation14 + $0x640] ss:$24 sps:$4 sm:$0xff]   ;;  %v10605_v18 = vld [vmem:[#allocation14 + $0x314] ss:$24 sps:$4 sm:$0xff]   ;;  %v10614_v34 = vld [vmem:[#allocation14 + $0x8e4] ss:$24 sps:$4 sm:$0xff]  }
 0x3c8   :  { %v6187_v50 = vpop.f32.mrf.mxu1  ;;  %v6228_v51 = vpop.f32.mrf.mxu0  ;;  %6481 = vmatprep.subr.bf16.mxu1 %v10569_v30  ;;  %6522 = vmatprep.subr.bf16.mxu0 %v10572_v23  ;;  %v10608_v28 = vld [vmem:[#allocation14 + $0x614] ss:$24 sps:$4 sm:$0xff]   ;;  %v10603_v30 = vld [vmem:[#allocation14 + $0x310] ss:$24 sps:$4 sm:$0xff]  }
 0x3c9   :  { %v6188_v49 = vadd.f32 %v6187_v50, %v6147_v31  ;;  %v11613_v48 = vadd.f32 %v6226_v38, %v6186_v37  ;;  %6511 = vmatprep.mubr.bf16.mxu1 %v11497_v59  ;;  %6552 = vmatprep.mubr.bf16.mxu0 %v11499_v60  ;;  %v10582_v59 = vld [vmem:[#allocation14 + $0x6d0] ss:$24 sps:$4 sm:$0xff]   ;;  %v10587_v60 = vld [vmem:[#allocation14 + $0x3a4] ss:$24 sps:$4 sm:$0xff]   ;;  %v10609_v38 = vld [vmem:[#allocation14 + $0x5e0] ss:$24 sps:$4 sm:$0xff]  }
 0x3ca   :  { %v6189_v54 = vpop.f32.mrf.mxu1  ;;  %v6230_v35 = vpop.f32.mrf.mxu0  ;;  %v10606_v23 = vld [vmem:[#allocation14 + $0x610] ss:$24 sps:$4 sm:$0xff]   ;;  %v10611_v31 = vld [vmem:[#allocation14 + $0x5e4] ss:$24 sps:$4 sm:$0xff]   ;;  %v10612_v37 = vld [vmem:[#allocation14 + $0x8e0] ss:$24 sps:$4 sm:$0xff]  }
 0x3cb   :  { %v11617_v47 = vadd.f32 %v6228_v51, %v6188_v49  ;;  %6482 = vmatpush1.bf16.msra.mxu1 %v10567_v19  ;;  %6523 = vmatpush1.bf16.msra.mxu0 %v10570_v29  ;;  %v10617_v19 = vld [vmem:[#allocation14 + $0x5b4] ss:$24 sps:$4 sm:$0xff]   ;;  %v10615_v50 = vld [vmem:[#allocation14 + $0x5b0] ss:$24 sps:$4 sm:$0xff]   ;;  %v10621_v49 = vld [vmem:[#allocation14 + $0x580] ss:$24 sps:$4 sm:$0xff]  }
 0x3cc   :  { %v6190_v56 = vpop.f32.mrf.mxu1  ;;  %6483 = vmatprep.subr.bf16.mxu1 %v10575_v52  ;;  %6524 = vmatprep.subr.bf16.mxu0 %v10578_v53  ;;  %v6231_v61 = vpop.f32.mrf.mxu0  ;;  %v10620_v29 = vld [vmem:[#allocation14 + $0x8b4] ss:$24 sps:$4 sm:$0xff]   ;;  %v10618_v51 = vld [vmem:[#allocation14 + $0x8b0] ss:$24 sps:$4 sm:$0xff]   ;;  %v10623_v52 = vld [vmem:[#allocation14 + $0x584] ss:$24 sps:$4 sm:$0xff]  }
 0x3cd   :  { %v10626_v53 = vld [vmem:[#allocation14 + $0x884] ss:$24 sps:$4 sm:$0xff]   ;;  %v10624_v54 = vld [vmem:[#allocation14 + $0x880] ss:$24 sps:$4 sm:$0xff]   ;;  %v10629_v35 = vld [vmem:[#allocation14 + $0x554] ss:$24 sps:$4 sm:$0xff]  }
 0x3ce   :  { %v10630_v56 = vld [vmem:[#allocation14 + $0x850] ss:$24 sps:$4 sm:$0xff]   ;;  %v10633_v61 = vld [vmem:[#allocation14 + $0x520] ss:$24 sps:$4 sm:$0xff]  }
 0x3cf   :  { %6484 = vmatpush1.bf16.msra.mxu1 %v10573_v55  ;;  %6525 = vmatpush1.bf16.msra.mxu0 %v10576_v44  ;;  %v10632_v55 = vld [vmem:[#allocation14 + $0x854] ss:$24 sps:$4 sm:$0xff]   ;;  %v10627_v44 = vld [vmem:[#allocation14 + $0x550] ss:$24 sps:$4 sm:$0xff]  }
 0x3d0   :  { %6485 = vmatprep.subr.bf16.mxu1 %v10581_v57  ;;  %6526 = vmatprep.subr.bf16.mxu0 %v10584_v58  ;;  %v10635_v57 = vld [vmem:[#allocation14 + $0x524] ss:$24 sps:$4 sm:$0xff]  }
 0x3d1   :  { %v10638_v58 = vld [vmem:[#allocation14 + $0x824] ss:$24 sps:$4 sm:$0xff]  }
 0x3d3   :  { %6486 = vmatpush1.bf16.msra.mxu1 %v10579_v62  ;;  %6527 = vmatpush1.bf16.msra.mxu0 %v10582_v59  ;;  %v10636_v62 = vld [vmem:[#allocation14 + $0x820] ss:$24 sps:$4 sm:$0xff]   ;;  %v10641_v59 = vld [vmem:[#allocation14 + $0x4f4] ss:$24 sps:$4 sm:$0xff]  }
 0x3d4   :  { %6487 = vmatprep.subr.bf16.mxu1 %v10587_v60  ;;  %6528 = vmatprep.subr.bf16.mxu0 %v10590_v63  ;;  %v10644_v60 = vld [vmem:[#allocation14 + $0x7f4] ss:$24 sps:$4 sm:$0xff]   ;;  %v10639_v63 = vld [vmem:[#allocation14 + $0x4f0] ss:$24 sps:$4 sm:$0xff]  }
 0x3d7   :  { %6488 = vmatpush1.bf16.msra.mxu1 %v10585_v0  ;;  %6529 = vmatpush1.bf16.msra.mxu0 %v10588_v1  ;;  %v10642_v0 = vld [vmem:[#allocation14 + $0x7f0] ss:$24 sps:$4 sm:$0xff]   ;;  %v10647_v1 = vld [vmem:[#allocation14 + $0x4c4] ss:$24 sps:$4 sm:$0xff]  }
 0x3d8   :  { %6489 = vmatprep.subr.bf16.mxu1 %v10593_v3  ;;  %6530 = vmatprep.subr.bf16.mxu0 %v10596_v4  ;;  %v10650_v3 = vld [vmem:[#allocation14 + $0x7c4] ss:$24 sps:$4 sm:$0xff]   ;;  %v10645_v4 = vld [vmem:[#allocation14 + $0x4c0] ss:$24 sps:$4 sm:$0xff]  }
 0x3db   :  { %6490 = vmatpush1.bf16.msra.mxu1 %v10591_v5  ;;  %6531 = vmatpush1.bf16.msra.mxu0 %v10594_v7  ;;  %v10648_v5 = vld [vmem:[#allocation14 + $0x7c0] ss:$24 sps:$4 sm:$0xff]   ;;  %v10653_v7 = vld [vmem:[#allocation14 + $0x494] ss:$24 sps:$4 sm:$0xff]  }
 0x3dc   :  { %6491 = vmatprep.subr.bf16.mxu1 %v10599_v10  ;;  %6532 = vmatprep.subr.bf16.mxu0 %v10602_v11  ;;  %v10656_v10 = vld [vmem:[#allocation14 + $0x794] ss:$24 sps:$4 sm:$0xff]   ;;  %v10651_v11 = vld [vmem:[#allocation14 + $0x490] ss:$24 sps:$4 sm:$0xff]  }
 0x3df   :  { %6492 = vmatpush1.bf16.msra.mxu1 %v10597_v16  ;;  %6533 = vmatpush1.bf16.msra.mxu0 %v10600_v17  ;;  %v10654_v16 = vld [vmem:[#allocation14 + $0x790] ss:$24 sps:$4 sm:$0xff]   ;;  %v10659_v17 = vld [vmem:[#allocation14 + $0xa64] ss:$24 sps:$4 sm:$0xff]  }
 0x3e0   :  { %6493 = vmatprep.subr.bf16.mxu1 %v10605_v18  ;;  %6534 = vmatprep.subr.bf16.mxu0 %v10608_v28  ;;  %v10662_v18 = vld [vmem:[#allocation14 + $0xd64] ss:$24 sps:$4 sm:$0xff]   ;;  %v10657_v28 = vld [vmem:[#allocation14 + $0xa60] ss:$24 sps:$4 sm:$0xff]  }
 0x3e3   :  { %6494 = vmatpush1.bf16.msra.mxu1 %v10603_v30  ;;  %6535 = vmatpush1.bf16.msra.mxu0 %v10606_v23  ;;  %v10660_v30 = vld [vmem:[#allocation14 + $0xd60] ss:$24 sps:$4 sm:$0xff]   ;;  %v10665_v23 = vld [vmem:[#allocation14 + $0xa34] ss:$24 sps:$4 sm:$0xff]  }
 0x3e4   :  { %6495 = vmatprep.subr.bf16.mxu1 %v10611_v31  ;;  %6536 = vmatprep.subr.bf16.mxu0 %v10614_v34  ;;  %v10668_v31 = vld [vmem:[#allocation14 + $0xd34] ss:$24 sps:$4 sm:$0xff]  }
 0x3e7   :  { %6496 = vmatpush2.bf16.msra.mxu1 %v10609_v38  ;;  %6537 = vmatpush2.bf16.msra.mxu0 %v10612_v37 }
 0x3e8   :  { %6497 = vmatprep.subr.bf16.mxu1 %v10617_v19  ;;  %6538 = vmatprep.subr.bf16.mxu0 %v10620_v29  ;;  %v10663_v19 = vld [vmem:[#allocation14 + $0xa30] ss:$24 sps:$4 sm:$0xff]  }
 0x3e9   :  { %v10666_v29 = vld [vmem:[#allocation14 + $0xd30] ss:$24 sps:$4 sm:$0xff]  }
 0x3eb   :  { %6498 = vmatpush2.bf16.msra.mxu1 %v10615_v50  ;;  %6539 = vmatpush2.bf16.msra.mxu0 %v10618_v51 }
 0x3ec   :  { %6499 = vmatprep.subr.bf16.mxu1 %v10623_v52  ;;  %6540 = vmatprep.subr.bf16.mxu0 %v10626_v53  ;;  %v10671_v52 = vld [vmem:[#allocation14 + $0xa04] ss:$24 sps:$4 sm:$0xff]  }
 0x3ed   :  { %v10674_v53 = vld [vmem:[#allocation14 + $0xd04] ss:$24 sps:$4 sm:$0xff]  }
 0x3ef   :  { %6500 = vmatpush2.bf16.msra.mxu1 %v10621_v49  ;;  %6541 = vmatpush2.bf16.msra.mxu0 %v10624_v54 }
 0x3f0   :  { %6501 = vmatprep.subr.bf16.mxu1 %v10629_v35  ;;  %6542 = vmatprep.subr.bf16.mxu0 %v10632_v55  ;;  %v10669_v35 = vld [vmem:[#allocation14 + $0xa00] ss:$24 sps:$4 sm:$0xff]  }
 0x3f1   :  { %v10672_v55 = vld [vmem:[#allocation14 + $0xd00] ss:$24 sps:$4 sm:$0xff]  }
 0x3f3   :  { %6502 = vmatpush2.bf16.msra.mxu1 %v10627_v44  ;;  %6543 = vmatpush2.bf16.msra.mxu0 %v10630_v56  ;;  %v10677_v56 = vld [vmem:[#allocation14 + $0x9d4] ss:$24 sps:$4 sm:$0xff]  }
 0x3f4   :  { %6503 = vmatprep.subr.bf16.mxu1 %v10635_v57  ;;  %6544 = vmatprep.subr.bf16.mxu0 %v10638_v58  ;;  %v10680_v57 = vld [vmem:[#allocation14 + $0xcd4] ss:$24 sps:$4 sm:$0xff]   ;;  %v10675_v58 = vld [vmem:[#allocation14 + $0x9d0] ss:$24 sps:$4 sm:$0xff]  }
 0x3f7   :  { %6504 = vmatpush2.bf16.msra.mxu1 %v10633_v61  ;;  %6545 = vmatpush2.bf16.msra.mxu0 %v10636_v62  ;;  %v10686_v61 = vld [vmem:[#allocation14 + $0xca4] ss:$24 sps:$4 sm:$0xff]   ;;  %v10681_v62 = vld [vmem:[#allocation14 + $0x9a0] ss:$24 sps:$4 sm:$0xff]  }
 0x3f8   :  { %6505 = vmatprep.subr.bf16.mxu1 %v10641_v59  ;;  %6546 = vmatprep.subr.bf16.mxu0 %v10644_v60  ;;  %v10684_v59 = vld [vmem:[#allocation14 + $0xca0] ss:$24 sps:$4 sm:$0xff]   ;;  %v10689_v60 = vld [vmem:[#allocation14 + $0x974] ss:$24 sps:$4 sm:$0xff]  }
 0x3fb   :  { %6506 = vmatpush2.bf16.msra.mxu1 %v10639_v63  ;;  %6547 = vmatpush2.bf16.msra.mxu0 %v10642_v0  ;;  %v10692_v63 = vld [vmem:[#allocation14 + $0xc74] ss:$24 sps:$4 sm:$0xff]   ;;  %v10687_v0 = vld [vmem:[#allocation14 + $0x970] ss:$24 sps:$4 sm:$0xff]  }
 0x3fc   :  { %6507 = vmatprep.subr.bf16.mxu1 %v10647_v1  ;;  %6548 = vmatprep.subr.bf16.mxu0 %v10650_v3  ;;  %v10690_v1 = vld [vmem:[#allocation14 + $0xc70] ss:$24 sps:$4 sm:$0xff]   ;;  %v10695_v3 = vld [vmem:[#allocation14 + $0x944] ss:$24 sps:$4 sm:$0xff]  }
 0x3ff   :  { %6508 = vmatpush2.bf16.msra.mxu1 %v10645_v4  ;;  %6549 = vmatpush2.bf16.msra.mxu0 %v10648_v5  ;;  %v10698_v4 = vld [vmem:[#allocation14 + $0xc44] ss:$24 sps:$4 sm:$0xff]   ;;  %v10693_v5 = vld [vmem:[#allocation14 + $0x940] ss:$24 sps:$4 sm:$0xff]  }
 0x400   :  { %6509 = vmatprep.subr.bf16.mxu1 %v10653_v7  ;;  %6550 = vmatprep.subr.bf16.mxu0 %v10656_v10  ;;  %v10696_v7 = vld [vmem:[#allocation14 + $0xc40] ss:$24 sps:$4 sm:$0xff]   ;;  %v10701_v10 = vld [vmem:[#allocation14 + $0x914] ss:$24 sps:$4 sm:$0xff]  }
 0x403   :  { %6510 = vmatpush2.bf16.msra.mxu1 %v10651_v11  ;;  %6551 = vmatpush2.bf16.msra.mxu0 %v10654_v16  ;;  %v10704_v11 = vld [vmem:[#allocation14 + $0xc14] ss:$24 sps:$4 sm:$0xff]   ;;  %v10699_v16 = vld [vmem:[#allocation14 + $0x910] ss:$24 sps:$4 sm:$0xff]  }
 0x404   :  { %6561 = vmatprep.subr.bf16.mxu1 %v10659_v17  ;;  %6602 = vmatprep.subr.bf16.mxu0 %v10662_v18  ;;  %v10702_v17 = vld [vmem:[#allocation14 + $0xc10] ss:$24 sps:$4 sm:$0xff]   ;;  %v10707_v18 = vld [vmem:[#allocation14 + $0xbe4] ss:$24 sps:$4 sm:$0xff]  }
 0x406   :  { %v6267_v34 = vpop.f32.mrf.mxu1  ;;  %6512 = vmatmul.mubr.bf16.vlgmr.msra.gmra.mxu1 %v11505_v6  ;;  %6553 = vmatmul.mubr.bf16.vlgmr.msra.gmra.mxu0 %v11507_v8  ;;  %v6308_v38 = vpop.f32.mrf.mxu0 }
 0x407   :  { %v6268_v37 = vadd.f32 %v6267_v34, %v11613_v48  ;;  %6562 = vmatpush1.bf16.msra.mxu1 %v10657_v28  ;;  %6603 = vmatpush1.bf16.msra.mxu0 %v10660_v30  ;;  %v10710_v28 = vld [vmem:[#allocation14 + $0xee4] ss:$24 sps:$4 sm:$0xff]   ;;  %v10705_v30 = vld [vmem:[#allocation14 + $0xbe0] ss:$24 sps:$4 sm:$0xff]   ;;  %v10716_v34 = vld [vmem:[#allocation14 + $0xeb4] ss:$24 sps:$4 sm:$0xff]  }
 0x408   :  { %v6269_v50 = vpop.f32.mrf.mxu1  ;;  %v6310_v51 = vpop.f32.mrf.mxu0  ;;  %6563 = vmatprep.subr.bf16.mxu1 %v10665_v23  ;;  %6604 = vmatprep.subr.bf16.mxu0 %v10668_v31  ;;  %v10708_v23 = vld [vmem:[#allocation14 + $0xee0] ss:$24 sps:$4 sm:$0xff]   ;;  %v10713_v31 = vld [vmem:[#allocation14 + $0xbb4] ss:$24 sps:$4 sm:$0xff]  }
 0x409   :  { %v6270_v49 = vadd.f32 %v6269_v50, %v11617_v47  ;;  %v11623_v54 = vadd.f32 %v6308_v38, %v6268_v37  ;;  %6593 = vmatprep.mubr.bf16.mxu1 %v11509_v13  ;;  %6634 = vmatprep.mubr.bf16.mxu0 %v11511_v14  ;;  %v10678_v13 = vld [vmem:[#allocation14 + $0xcd0] ss:$24 sps:$4 sm:$0xff]   ;;  %v10683_v14 = vld [vmem:[#allocation14 + $0x9a4] ss:$24 sps:$4 sm:$0xff]   ;;  %v10717_v50 = vld [vmem:[#allocation14 + $0xb80] ss:$24 sps:$4 sm:$0xff]  }
 0x40a   :  { %v6271_v6 = vpop.f32.mrf.mxu1  ;;  %v6312_v8 = vpop.f32.mrf.mxu0  ;;  %v10711_v38 = vld [vmem:[#allocation14 + $0xbb0] ss:$24 sps:$4 sm:$0xff]  }
 0x40b   :  { %v11627_v48 = vadd.f32 %v6310_v51, %v6270_v49  ;;  %6564 = vmatpush1.bf16.msra.mxu1 %v10663_v19  ;;  %6605 = vmatpush1.bf16.msra.mxu0 %v10666_v29  ;;  %v10714_v37 = vld [vmem:[#allocation14 + $0xeb0] ss:$24 sps:$4 sm:$0xff]   ;;  %v10719_v19 = vld [vmem:[#allocation14 + $0xb84] ss:$24 sps:$4 sm:$0xff]   ;;  %v10720_v51 = vld [vmem:[#allocation14 + $0xe80] ss:$24 sps:$4 sm:$0xff]  }
 0x40c   :  { %v6272_v44 = vpop.f32.mrf.mxu1  ;;  %6565 = vmatprep.subr.bf16.mxu1 %v10671_v52  ;;  %6606 = vmatprep.subr.bf16.mxu0 %v10674_v53  ;;  %v6313_v47 = vpop.f32.mrf.mxu0  ;;  %v10722_v29 = vld [vmem:[#allocation14 + $0xe84] ss:$24 sps:$4 sm:$0xff]   ;;  %v10725_v52 = vld [vmem:[#allocation14 + $0xb54] ss:$24 sps:$4 sm:$0xff]   ;;  %v10723_v49 = vld [vmem:[#allocation14 + $0xb50] ss:$24 sps:$4 sm:$0xff]  }
 0x40d   :  { %v10728_v53 = vld [vmem:[#allocation14 + $0xe54] ss:$24 sps:$4 sm:$0xff]   ;;  %v10726_v6 = vld [vmem:[#allocation14 + $0xe50] ss:$24 sps:$4 sm:$0xff]   ;;  %v10731_v8 = vld [vmem:[#allocation14 + $0xb24] ss:$24 sps:$4 sm:$0xff]  }
 0x40e   :  { %v10732_v44 = vld [vmem:[#allocation14 + $0xe20] ss:$24 sps:$4 sm:$0xff]   ;;  %v10735_v47 = vld [vmem:[#allocation14 + $0xaf0] ss:$24 sps:$4 sm:$0xff]  }
 0x40f   :  { %6566 = vmatpush1.bf16.msra.mxu1 %v10669_v35  ;;  %6607 = vmatpush1.bf16.msra.mxu0 %v10672_v55  ;;  %v10734_v35 = vld [vmem:[#allocation14 + $0xe24] ss:$24 sps:$4 sm:$0xff]   ;;  %v10729_v55 = vld [vmem:[#allocation14 + $0xb20] ss:$24 sps:$4 sm:$0xff]  }
 0x410   :  { %6567 = vmatprep.subr.bf16.mxu1 %v10677_v56  ;;  %6608 = vmatprep.subr.bf16.mxu0 %v10680_v57  ;;  %v10737_v56 = vld [vmem:[#allocation14 + $0xaf4] ss:$24 sps:$4 sm:$0xff]  }
 0x411   :  { %v10740_v57 = vld [vmem:[#allocation14 + $0xdf4] ss:$24 sps:$4 sm:$0xff]  }
 0x413   :  { %6568 = vmatpush1.bf16.msra.mxu1 %v10675_v58  ;;  %6609 = vmatpush1.bf16.msra.mxu0 %v10678_v13  ;;  %v10738_v58 = vld [vmem:[#allocation14 + $0xdf0] ss:$24 sps:$4 sm:$0xff]   ;;  %v10743_v13 = vld [vmem:[#allocation14 + $0xac4] ss:$24 sps:$4 sm:$0xff]  }
 0x414   :  { %6569 = vmatprep.subr.bf16.mxu1 %v10683_v14  ;;  %6610 = vmatprep.subr.bf16.mxu0 %v10686_v61  ;;  %v10746_v14 = vld [vmem:[#allocation14 + $0xdc4] ss:$24 sps:$4 sm:$0xff]   ;;  %v10741_v61 = vld [vmem:[#allocation14 + $0xac0] ss:$24 sps:$4 sm:$0xff]  }
 0x417   :  { %6570 = vmatpush1.bf16.msra.mxu1 %v10681_v62  ;;  %6611 = vmatpush1.bf16.msra.mxu0 %v10684_v59  ;;  %v10744_v62 = vld [vmem:[#allocation14 + $0xdc0] ss:$24 sps:$4 sm:$0xff]   ;;  %v10749_v59 = vld [vmem:[#allocation14 + $0xa94] ss:$24 sps:$4 sm:$0xff]  }
 0x418   :  { %6571 = vmatprep.subr.bf16.mxu1 %v10689_v60  ;;  %6612 = vmatprep.subr.bf16.mxu0 %v10692_v63  ;;  %v10752_v60 = vld [vmem:[#allocation14 + $0xd94] ss:$24 sps:$4 sm:$0xff]   ;;  %v10747_v63 = vld [vmem:[#allocation14 + $0xa90] ss:$24 sps:$4 sm:$0xff]  }
 0x41b   :  { %6572 = vmatpush1.bf16.msra.mxu1 %v10687_v0  ;;  %6613 = vmatpush1.bf16.msra.mxu0 %v10690_v1  ;;  %v10750_v0 = vld [vmem:[#allocation14 + $0xd90] ss:$24 sps:$4 sm:$0xff]   ;;  %v10755_v1 = vld [vmem:[#allocation14 + $0x1064] ss:$24 sps:$4 sm:$0xff]  }
 0x41c   :  { %6573 = vmatprep.subr.bf16.mxu1 %v10695_v3  ;;  %6614 = vmatprep.subr.bf16.mxu0 %v10698_v4  ;;  %v10758_v3 = vld [vmem:[#allocation14 + $0x1364] ss:$24 sps:$4 sm:$0xff]   ;;  %v10753_v4 = vld [vmem:[#allocation14 + $0x1060] ss:$24 sps:$4 sm:$0xff]  }
 0x41f   :  { %6574 = vmatpush1.bf16.msra.mxu1 %v10693_v5  ;;  %6615 = vmatpush1.bf16.msra.mxu0 %v10696_v7  ;;  %v10756_v5 = vld [vmem:[#allocation14 + $0x1360] ss:$24 sps:$4 sm:$0xff]   ;;  %v10761_v7 = vld [vmem:[#allocation14 + $0x1034] ss:$24 sps:$4 sm:$0xff]  }
 0x420   :  { %6575 = vmatprep.subr.bf16.mxu1 %v10701_v10  ;;  %6616 = vmatprep.subr.bf16.mxu0 %v10704_v11  ;;  %v10764_v10 = vld [vmem:[#allocation14 + $0x1334] ss:$24 sps:$4 sm:$0xff]  }
 0x423   :  { %6576 = vmatpush1.bf16.msra.mxu1 %v10699_v16  ;;  %6617 = vmatpush1.bf16.msra.mxu0 %v10702_v17 }
 0x424   :  { %6577 = vmatprep.subr.bf16.mxu1 %v10707_v18  ;;  %6618 = vmatprep.subr.bf16.mxu0 %v10710_v28  ;;  %v10759_v18 = vld [vmem:[#allocation14 + $0x1030] ss:$24 sps:$4 sm:$0xff]  }
 0x425   :  { %v10762_v28 = vld [vmem:[#allocation14 + $0x1330] ss:$24 sps:$4 sm:$0xff]  }
 0x427   :  { %6578 = vmatpush2.bf16.msra.mxu1 %v10705_v30  ;;  %6619 = vmatpush2.bf16.msra.mxu0 %v10708_v23 }
 0x428   :  { %6579 = vmatprep.subr.bf16.mxu1 %v10713_v31  ;;  %6620 = vmatprep.subr.bf16.mxu0 %v10716_v34  ;;  %v10767_v31 = vld [vmem:[#allocation14 + $0x1004] ss:$24 sps:$4 sm:$0xff]  }
 0x429   :  { %v10770_v34 = vld [vmem:[#allocation14 + $0x1304] ss:$24 sps:$4 sm:$0xff]  }
 0x42b   :  { %6580 = vmatpush2.bf16.msra.mxu1 %v10711_v38  ;;  %6621 = vmatpush2.bf16.msra.mxu0 %v10714_v37 }
 0x42c   :  { %6581 = vmatprep.subr.bf16.mxu1 %v10719_v19  ;;  %6622 = vmatprep.subr.bf16.mxu0 %v10722_v29  ;;  %v10765_v19 = vld [vmem:[#allocation14 + $0x1000] ss:$24 sps:$4 sm:$0xff]  }
 0x42d   :  { %v10768_v29 = vld [vmem:[#allocation14 + $0x1300] ss:$24 sps:$4 sm:$0xff]  }
 0x42f   :  { %6582 = vmatpush2.bf16.msra.mxu1 %v10717_v50  ;;  %6623 = vmatpush2.bf16.msra.mxu0 %v10720_v51  ;;  %v10773_v51 = vld [vmem:[#allocation14 + $0xfd4] ss:$24 sps:$4 sm:$0xff]  }
 0x430   :  { %6583 = vmatprep.subr.bf16.mxu1 %v10725_v52  ;;  %6624 = vmatprep.subr.bf16.mxu0 %v10728_v53  ;;  %v10776_v52 = vld [vmem:[#allocation14 + $0x12d4] ss:$24 sps:$4 sm:$0xff]   ;;  %v10771_v53 = vld [vmem:[#allocation14 + $0xfd0] ss:$24 sps:$4 sm:$0xff]  }
 0x433   :  { %6584 = vmatpush2.bf16.msra.mxu1 %v10723_v49  ;;  %6625 = vmatpush2.bf16.msra.mxu0 %v10726_v6  ;;  %v10782_v49 = vld [vmem:[#allocation14 + $0x12a4] ss:$24 sps:$4 sm:$0xff]   ;;  %v10777_v6 = vld [vmem:[#allocation14 + $0xfa0] ss:$24 sps:$4 sm:$0xff]  }
 0x434   :  { %6585 = vmatprep.subr.bf16.mxu1 %v10731_v8  ;;  %6626 = vmatprep.subr.bf16.mxu0 %v10734_v35  ;;  %v10780_v8 = vld [vmem:[#allocation14 + $0x12a0] ss:$24 sps:$4 sm:$0xff]   ;;  %v10785_v35 = vld [vmem:[#allocation14 + $0xf74] ss:$24 sps:$4 sm:$0xff]  }
 0x437   :  { %6586 = vmatpush2.bf16.msra.mxu1 %v10729_v55  ;;  %6627 = vmatpush2.bf16.msra.mxu0 %v10732_v44  ;;  %v10788_v55 = vld [vmem:[#allocation14 + $0x1274] ss:$24 sps:$4 sm:$0xff]   ;;  %v10783_v44 = vld [vmem:[#allocation14 + $0xf70] ss:$24 sps:$4 sm:$0xff]  }
 0x438   :  { %6587 = vmatprep.subr.bf16.mxu1 %v10737_v56  ;;  %6628 = vmatprep.subr.bf16.mxu0 %v10740_v57  ;;  %v10786_v56 = vld [vmem:[#allocation14 + $0x1270] ss:$24 sps:$4 sm:$0xff]   ;;  %v10791_v57 = vld [vmem:[#allocation14 + $0xf44] ss:$24 sps:$4 sm:$0xff]  }
 0x43b   :  { %6588 = vmatpush2.bf16.msra.mxu1 %v10735_v47  ;;  %6629 = vmatpush2.bf16.msra.mxu0 %v10738_v58  ;;  %v10794_v47 = vld [vmem:[#allocation14 + $0x1244] ss:$24 sps:$4 sm:$0xff]   ;;  %v10789_v58 = vld [vmem:[#allocation14 + $0xf40] ss:$24 sps:$4 sm:$0xff]  }
 0x43c   :  { %6589 = vmatprep.subr.bf16.mxu1 %v10743_v13  ;;  %6630 = vmatprep.subr.bf16.mxu0 %v10746_v14  ;;  %v10792_v13 = vld [vmem:[#allocation14 + $0x1240] ss:$24 sps:$4 sm:$0xff]   ;;  %v10797_v14 = vld [vmem:[#allocation14 + $0xf14] ss:$24 sps:$4 sm:$0xff]  }
 0x43f   :  { %6590 = vmatpush2.bf16.msra.mxu1 %v10741_v61  ;;  %6631 = vmatpush2.bf16.msra.mxu0 %v10744_v62  ;;  %v10800_v61 = vld [vmem:[#allocation14 + $0x1214] ss:$24 sps:$4 sm:$0xff]   ;;  %v10795_v62 = vld [vmem:[#allocation14 + $0xf10] ss:$24 sps:$4 sm:$0xff]  }
 0x440   :  { %6591 = vmatprep.subr.bf16.mxu1 %v10749_v59  ;;  %6632 = vmatprep.subr.bf16.mxu0 %v10752_v60  ;;  %v10798_v59 = vld [vmem:[#allocation14 + $0x1210] ss:$24 sps:$4 sm:$0xff]   ;;  %v10803_v60 = vld [vmem:[#allocation14 + $0x11e4] ss:$24 sps:$4 sm:$0xff]  }
 0x443   :  { %6592 = vmatpush2.bf16.msra.mxu1 %v10747_v63  ;;  %6633 = vmatpush2.bf16.msra.mxu0 %v10750_v0  ;;  %v10806_v63 = vld [vmem:[#allocation14 + $0x14e4] ss:$24 sps:$4 sm:$0xff]   ;;  %v10801_v0 = vld [vmem:[#allocation14 + $0x11e0] ss:$24 sps:$4 sm:$0xff]  }
 0x444   :  { %6643 = vmatprep.subr.bf16.mxu1 %v10755_v1  ;;  %6684 = vmatprep.subr.bf16.mxu0 %v10758_v3  ;;  %v10804_v1 = vld [vmem:[#allocation14 + $0x14e0] ss:$24 sps:$4 sm:$0xff]   ;;  %v10809_v3 = vld [vmem:[#allocation14 + $0x11b4] ss:$24 sps:$4 sm:$0xff]  }
 0x446   :  { %v6349_v11 = vpop.f32.mrf.mxu1  ;;  %6594 = vmatmul.mubr.bf16.vlgmr.msra.gmra.mxu1 %v11517_v32  ;;  %6635 = vmatmul.mubr.bf16.vlgmr.msra.gmra.mxu0 %v11519_v33  ;;  %v6390_v16 = vpop.f32.mrf.mxu0 }
 0x447   :  { %v6350_v17 = vadd.f32 %v6349_v11, %v11623_v54  ;;  %6644 = vmatpush1.bf16.msra.mxu1 %v10753_v4  ;;  %6685 = vmatpush1.bf16.msra.mxu0 %v10756_v5  ;;  %v10812_v4 = vld [vmem:[#allocation14 + $0x14b4] ss:$24 sps:$4 sm:$0xff]   ;;  %v10807_v5 = vld [vmem:[#allocation14 + $0x11b0] ss:$24 sps:$4 sm:$0xff]   ;;  %v10818_v11 = vld [vmem:[#allocation14 + $0x1484] ss:$24 sps:$4 sm:$0xff]  }
 0x448   :  { %v6351_v30 = vpop.f32.mrf.mxu1  ;;  %v6392_v23 = vpop.f32.mrf.mxu0  ;;  %6645 = vmatprep.subr.bf16.mxu1 %v10761_v7  ;;  %6686 = vmatprep.subr.bf16.mxu0 %v10764_v10  ;;  %v10810_v7 = vld [vmem:[#allocation14 + $0x14b0] ss:$24 sps:$4 sm:$0xff]   ;;  %v10815_v10 = vld [vmem:[#allocation14 + $0x1184] ss:$24 sps:$4 sm:$0xff]  }
 0x449   :  { %v6352_v38 = vadd.f32 %v6351_v30, %v11627_v48  ;;  %v11633_v37 = vadd.f32 %v6390_v16, %v6350_v17  ;;  %6675 = vmatprep.mubr.bf16.mxu1 %v11521_v39  ;;  %6716 = vmatprep.mubr.bf16.mxu0 %v11529_v43  ;;  %v10774_v39 = vld [vmem:[#allocation14 + $0x12d0] ss:$24 sps:$4 sm:$0xff]   ;;  %v10779_v43 = vld [vmem:[#allocation14 + $0xfa4] ss:$24 sps:$4 sm:$0xff]   ;;  %v10813_v16 = vld [vmem:[#allocation14 + $0x1180] ss:$24 sps:$4 sm:$0xff]  }
 0x44a   :  { %v6353_v32 = vpop.f32.mrf.mxu1  ;;  %v6394_v33 = vpop.f32.mrf.mxu0  ;;  %v10816_v17 = vld [vmem:[#allocation14 + $0x1480] ss:$24 sps:$4 sm:$0xff]   ;;  %v10819_v30 = vld [vmem:[#allocation14 + $0x1150] ss:$24 sps:$4 sm:$0xff]  }
 0x44b   :  { %v11637_v54 = vadd.f32 %v6392_v23, %v6352_v38  ;;  %6646 = vmatpush1.bf16.msra.mxu1 %v10759_v18  ;;  %6687 = vmatpush1.bf16.msra.mxu0 %v10762_v28  ;;  %v10821_v18 = vld [vmem:[#allocation14 + $0x1154] ss:$24 sps:$4 sm:$0xff]   ;;  %v10822_v23 = vld [vmem:[#allocation14 + $0x1450] ss:$24 sps:$4 sm:$0xff]   ;;  %v10825_v38 = vld [vmem:[#allocation14 + $0x1120] ss:$24 sps:$4 sm:$0xff]  }
 0x44c   :  { %v6354_v50 = vpop.f32.mrf.mxu1  ;;  %6647 = vmatprep.subr.bf16.mxu1 %v10767_v31  ;;  %6688 = vmatprep.subr.bf16.mxu0 %v10770_v34  ;;  %v6395_v48 = vpop.f32.mrf.mxu0  ;;  %v10824_v28 = vld [vmem:[#allocation14 + $0x1454] ss:$24 sps:$4 sm:$0xff]   ;;  %v10827_v31 = vld [vmem:[#allocation14 + $0x1124] ss:$24 sps:$4 sm:$0xff]   ;;  %v10828_v32 = vld [vmem:[#allocation14 + $0x1420] ss:$24 sps:$4 sm:$0xff]  }
 0x44d   :  { %v10830_v34 = vld [vmem:[#allocation14 + $0x1424] ss:$24 sps:$4 sm:$0xff]   ;;  %v10833_v33 = vld [vmem:[#allocation14 + $0x10f4] ss:$24 sps:$4 sm:$0xff]   ;;  %v10834_v50 = vld [vmem:[#allocation14 + $0x13f0] ss:$24 sps:$4 sm:$0xff]  }
 0x44e   :  { %v10837_v48 = vld [vmem:[#allocation14 + $0x10c0] ss:$24 sps:$4 sm:$0xff]  }
 0x44f   :  { %6648 = vmatpush1.bf16.msra.mxu1 %v10765_v19  ;;  %6689 = vmatpush1.bf16.msra.mxu0 %v10768_v29  ;;  %v10836_v19 = vld [vmem:[#allocation14 + $0x13f4] ss:$24 sps:$4 sm:$0xff]   ;;  %v10831_v29 = vld [vmem:[#allocation14 + $0x10f0] ss:$24 sps:$4 sm:$0xff]  }
 0x450   :  { %6649 = vmatprep.subr.bf16.mxu1 %v10773_v51  ;;  %6690 = vmatprep.subr.bf16.mxu0 %v10776_v52  ;;  %v10839_v51 = vld [vmem:[#allocation14 + $0x10c4] ss:$24 sps:$4 sm:$0xff]  }
 0x451   :  { %v10842_v52 = vld [vmem:[#allocation14 + $0x13c4] ss:$24 sps:$4 sm:$0xff]  }
 0x453   :  { %6650 = vmatpush1.bf16.msra.mxu1 %v10771_v53  ;;  %6691 = vmatpush1.bf16.msra.mxu0 %v10774_v39  ;;  %v10840_v53 = vld [vmem:[#allocation14 + $0x13c0] ss:$24 sps:$4 sm:$0xff]   ;;  %v10845_v39 = vld [vmem:[#allocation14 + $0x1094] ss:$24 sps:$4 sm:$0xff]  }
 0x454   :  { %6651 = vmatprep.subr.bf16.mxu1 %v10779_v43  ;;  %6692 = vmatprep.subr.bf16.mxu0 %v10782_v49  ;;  %v10848_v43 = vld [vmem:[#allocation14 + $0x1394] ss:$24 sps:$4 sm:$0xff]   ;;  %v11639_v49 = vld [vmem:[#allocation13] sm:$0x3f] }
 0x457   :  { %6652 = vmatpush1.bf16.msra.mxu1 %v10777_v6  ;;  %6693 = vmatpush1.bf16.msra.mxu0 %v10780_v8  ;;  %v468_v6 = vrot.slane %v11639_v49, %v11484_v25  ;;  %v10843_v8 = vld [vmem:[#allocation14 + $0x1090] ss:$24 sps:$4 sm:$0xff]  }
 0x458   :  { %6653 = vmatprep.subr.bf16.mxu1 %v10785_v35  ;;  %6694 = vmatprep.subr.bf16.mxu0 %v10788_v55  ;;  %v10846_v35 = vld [vmem:[#allocation14 + $0x1390] ss:$24 sps:$4 sm:$0xff]   ;;  %v10851_v55 = vld [vmem:[#allocation14 + $0x1664] ss:$24 sps:$4 sm:$0xff]  }
 0x45b   :  { %6654 = vmatpush1.bf16.msra.mxu1 %v10783_v44  ;;  %6695 = vmatpush1.bf16.msra.mxu0 %v10786_v56  ;;  %v10852_v44 = vld [vmem:[#allocation19 + $0x78] sm:$0xff]   ;;  %v1008_v56 = vadd.f32 %v11531_v45, %v468_v6  ;;  %v10854_v45 = vld [vmem:[#allocation14 + $0x1630] ss:$24 sps:$4 sm:$0xff]  }
 0x45c   :  { %6655 = vmatprep.subr.bf16.mxu1 %v10791_v57  ;;  %6696 = vmatprep.subr.bf16.mxu0 %v10794_v47  ;;  %v10849_v57 = vld [vmem:[#allocation14 + $0x1660] ss:$24 sps:$4 sm:$0xff]  }
 0x45d   :  { %v10853_v47 = vld [vmem:[#allocation19 + $0x38] sm:$0xff]  }
 0x45e   :  { %v10892_v6 = vld [vmem:[#allocation19 + $0xf8] sm:$0xff]  }
 0x45f   :  { %6656 = vmatpush1.bf16.msra.mxu1 %v10789_v58  ;;  %6697 = vmatpush1.bf16.msra.mxu0 %v10792_v13  ;;  %v10856_v58 = vld [vmem:[#allocation14 + $0x1634] ss:$24 sps:$4 sm:$0xff]  }
 0x460   :  { %6657 = vmatprep.subr.bf16.mxu1 %v10797_v14  ;;  %6698 = vmatprep.subr.bf16.mxu0 %v10800_v61  ;;  %v10857_v13 = vld [vmem:[#allocation19 + $0x70] sm:$0xff]   ;;  %v6875_v14 = vpack.c.bf16 %v1008_v56, %v1008_v56 }
 0x463   :  { %6658 = vmatpush1.bf16.msra.mxu1 %v10795_v62  ;;  %6699 = vmatpush1.bf16.msra.mxu0 %v10798_v59  ;;  %v10858_v59 = vld [vmem:[#allocation19 + $0x30] sm:$0xff]  }
 0x464   :  { %6659 = vmatprep.subr.bf16.mxu1 %v10803_v60  ;;  %6700 = vmatprep.subr.bf16.mxu0 %v10806_v63  ;;  %v10861_v63 = vld [vmem:[#allocation14 + $0x1604] ss:$24 sps:$4 sm:$0xff]  }
 0x467   :  { %6660 = vmatpush2.bf16.msra.mxu1 %v10801_v0  ;;  %6701 = vmatpush2.bf16.msra.mxu0 %v10804_v1  ;;  %v10862_v0 = vld [vmem:[#allocation19 + $0x68] sm:$0xff]  }
 0x468   :  { %6661 = vmatprep.subr.bf16.mxu1 %v10809_v3  ;;  %6702 = vmatprep.subr.bf16.mxu0 %v10812_v4  ;;  %v10859_v3 = vld [vmem:[#allocation14 + $0x1600] ss:$24 sps:$4 sm:$0xff]   ;;  %v10863_v4 = vld [vmem:[#allocation19 + $0x28] sm:$0xff]  }
 0x46b   :  { %6662 = vmatpush2.bf16.msra.mxu1 %v10807_v5  ;;  %6703 = vmatpush2.bf16.msra.mxu0 %v10810_v7  ;;  %v10866_v7 = vld [vmem:[#allocation14 + $0x15d4] ss:$24 sps:$4 sm:$0xff]  }
 0x46c   :  { %6663 = vmatprep.subr.bf16.mxu1 %v10815_v10  ;;  %6704 = vmatprep.subr.bf16.mxu0 %v10818_v11  ;;  %v10867_v10 = vld [vmem:[#allocation19 + $0x60] sm:$0xff]  }
 0x46f   :  { %6664 = vmatpush2.bf16.msra.mxu1 %v10813_v16  ;;  %6705 = vmatpush2.bf16.msra.mxu0 %v10816_v17  ;;  %v10864_v16 = vld [vmem:[#allocation14 + $0x15d0] ss:$24 sps:$4 sm:$0xff]   ;;  %v10871_v17 = vld [vmem:[#allocation14 + $0x15a4] ss:$24 sps:$4 sm:$0xff]  }
 0x470   :  { %6665 = vmatprep.subr.bf16.mxu1 %v10821_v18  ;;  %6706 = vmatprep.subr.bf16.mxu0 %v10824_v28  ;;  %v10869_v18 = vld [vmem:[#allocation14 + $0x15a0] ss:$24 sps:$4 sm:$0xff]  }
 0x471   :  { %v10873_v28 = vld [vmem:[#allocation19 + $0x18] sm:$0xff]  }
 0x473   :  { %6666 = vmatpush2.bf16.msra.mxu1 %v10819_v30  ;;  %6707 = vmatpush2.bf16.msra.mxu0 %v10822_v23  ;;  %v10876_v30 = vld [vmem:[#allocation14 + $0x1574] ss:$24 sps:$4 sm:$0xff]  }
 0x474   :  { %6667 = vmatprep.subr.bf16.mxu1 %v10827_v31  ;;  %6708 = vmatprep.subr.bf16.mxu0 %v10830_v34  ;;  %v10877_v23 = vld [vmem:[#allocation19 + $0x50] sm:$0xff]   ;;  %v10874_v31 = vld [vmem:[#allocation14 + $0x1570] ss:$24 sps:$4 sm:$0xff]  }
 0x475   :  { %v10878_v34 = vld [vmem:[#allocation19 + $0x10] sm:$0xff]  }
 0x477   :  { %6668 = vmatpush2.bf16.msra.mxu1 %v10825_v38  ;;  %6709 = vmatpush2.bf16.msra.mxu0 %v10828_v32  ;;  %v10881_v38 = vld [vmem:[#allocation14 + $0x1544] ss:$24 sps:$4 sm:$0xff]   ;;  %v10882_v32 = vld [vmem:[#allocation19 + $0x48] sm:$0xff]  }
 0x478   :  { %6669 = vmatprep.subr.bf16.mxu1 %v10833_v33  ;;  %6710 = vmatprep.subr.bf16.mxu0 %v10836_v19  ;;  %v10879_v33 = vld [vmem:[#allocation14 + $0x1540] ss:$24 sps:$4 sm:$0xff]   ;;  %v10883_v19 = vld [vmem:[#allocation19 + $0x8] sm:$0xff]  }
 0x47b   :  { %6670 = vmatpush2.bf16.msra.mxu1 %v10831_v29  ;;  %6711 = vmatpush2.bf16.msra.mxu0 %v10834_v50  ;;  %v464_v29 = vrot.slane %v11639_v49, %v11481_v24  ;;  %v10886_v50 = vld [vmem:[#allocation14 + $0x1514] ss:$24 sps:$4 sm:$0xff]  }
 0x47c   :  { %6671 = vmatprep.subr.bf16.mxu1 %v10839_v51  ;;  %6712 = vmatprep.subr.bf16.mxu0 %v10842_v52  ;;  %v10887_v51 = vld [vmem:[#allocation19 + $0x40] sm:$0xff]   ;;  %v476_v52 = vrot.slane %v11639_v49, %v475_v2 }
 0x47d   :  { %v10896_v2 = vld [vmem:[#allocation14 + $0x17b4] ss:$24 sps:$4 sm:$0xff]  }
 0x47e   :  { %v1049_v24 = vadd.f32 %v11533_v46, %v476_v52  ;;  %v10899_v46 = vld [vmem:[#allocation14 + $0x1780] ss:$24 sps:$4 sm:$0xff]  }
 0x47f   :  { %6672 = vmatpush2.bf16.msra.mxu1 %v10837_v48  ;;  %6713 = vmatpush2.bf16.msra.mxu0 %v10840_v53  ;;  %v10884_v48 = vld [vmem:[#allocation14 + $0x1510] ss:$24 sps:$4 sm:$0xff]  }
 0x480   :  { %6673 = vmatprep.subr.bf16.mxu1 %v10845_v39  ;;  %6714 = vmatprep.subr.bf16.mxu0 %v10848_v43  ;;  %v10888_v53 = vld [vmem:[#allocation19] sm:$0xff]   ;;  %v1006_v39 = vadd.f32 %v11524_v40, %v464_v29  ;;  %v6877_v56 = vpack.c.bf16 %v1049_v24, %v1049_v24 }
 0x481   :  { %v10891_v43 = vld [vmem:[#allocation14 + $0x17e4] ss:$24 sps:$4 sm:$0xff]   ;;  %v10894_v40 = vld [vmem:[#allocation14 + $0x17b0] ss:$24 sps:$4 sm:$0xff]  }
 0x483   :  { %6674 = vmatpush2.bf16.msra.mxu1 %v10843_v8  ;;  %6715 = vmatpush2.bf16.msra.mxu0 %v10846_v35  ;;  %v10889_v8 = vld [vmem:[#allocation14 + $0x17e0] ss:$24 sps:$4 sm:$0xff]  }
 0x484   :  { %6725 = vmatprep.subr.bf16.mxu1 %v10851_v55  ;;  %9358 = vmatprep.subr.bf16.mxu0 %v10852_v44  ;;  %v10893_v35 = vld [vmem:[#allocation19 + $0xb8] sm:$0xff]   ;;  %v6874_v55 = vpack.c.bf16 %v1006_v39, %v1006_v39  ;;  %v10897_v44 = vld [vmem:[#allocation19 + $0xf0] sm:$0xff]  }
 0x486   :  { %v6431_v25 = vpop.f32.mrf.mxu1  ;;  %6676 = vmatmul.mubr.bf16.vlgmr.msra.gmra.mxu1 %v11537_v12  ;;  %6717 = vmatmul.mubr.bf16.vlgmr.msra.gmra.mxu0 %v11539_v15  ;;  %v11646_v61 = vpop.f32.mrf.mxu0 }
 0x487   :  { %v11649_v62 = vadd.f32 %v6431_v25, %v11633_v37  ;;  %6726 = vmatpush1.bf16.msra.mxu1 %v10849_v57  ;;  %9359 = vmatpush3.bf16.msra.mxu0 %v10853_v47  ;;  %v10898_v57 = vld [vmem:[#allocation19 + $0xb0] sm:$0xff]   ;;  %v10907_v25 = vld [vmem:[#allocation19 + $0xe0] sm:$0xff]  }
 0x488   :  { %7296 = vmatprep.mubr.bf16.mxu0 %v6875_v14  ;;  %v6433_v60 = vpop.f32.mrf.mxu1  ;;  %6727 = vmatprep.subr.bf16.mxu1 %v10856_v58  ;;  %v11651_v1 = vpop.f32.mrf.mxu0  ;;  %v10901_v47 = vld [vmem:[#allocation14 + $0x1784] ss:$24 sps:$4 sm:$0xff]   ;;  %v10902_v58 = vld [vmem:[#allocation19 + $0xe8] sm:$0xff]  }
 0x489   :  { %v11654_v12 = vadd.f32 %v6433_v60, %v11637_v54  ;;  %9360 = vmatprep.subr.bf16.mxu0 %v10857_v13  ;;  %6757 = vmatprep.mubr.bf16.mxu1 %v11541_v20  ;;  %v10868_v54 = vld [vmem:[#allocation19 + $0x20] sm:$0xff]   ;;  %v10872_v20 = vld [vmem:[#allocation19 + $0x58] sm:$0xff]   ;;  %v10903_v13 = vld [vmem:[#allocation19 + $0xa8] sm:$0xff]  }
 0x48a   :  { %v6435_v15 = vpop.f32.mrf.mxu1  ;;  %v6476_v37 = vpop.f32.mrf.mxu0  ;;  %v10906_v14 = vld [vmem:[#allocation14 + $0x1754] ss:$24 sps:$4 sm:$0xff]   ;;  %v10911_v60 = vld [vmem:[#allocation14 + $0x1724] ss:$24 sps:$4 sm:$0xff]  }
 0x48b   :  { %6728 = vmatpush1.bf16.msra.mxu1 %v10854_v45  ;;  %9361 = vmatpush3.bf16.msra.mxu0 %v10858_v59  ;;  %v10904_v45 = vld [vmem:[#allocation14 + $0x1750] ss:$24 sps:$4 sm:$0xff]   ;;  %v10913_v15 = vld [vmem:[#allocation19 + $0x98] sm:$0xff]   ;;  %v10916_v37 = vld [vmem:[#allocation14 + $0x16f4] ss:$24 sps:$4 sm:$0xff]  }
 0x48c   :  { %v6436_v5 = vpop.f32.mrf.mxu1  ;;  %6729 = vmatprep.subr.bf16.mxu1 %v10861_v63  ;;  %9362 = vmatprep.subr.bf16.mxu0 %v10862_v0  ;;  %v6477_v11 = vpop.f32.mrf.mxu0  ;;  %v10908_v59 = vld [vmem:[#allocation19 + $0xa0] sm:$0xff]   ;;  %v10912_v63 = vld [vmem:[#allocation19 + $0xd8] sm:$0xff]  }
 0x48d   :  { %v10909_v0 = vld [vmem:[#allocation14 + $0x1720] ss:$24 sps:$4 sm:$0xff]   ;;  %v483_v11 = vsub.s32 5, %v11478_v22 }
 0x48e   :  { %v10918_v5 = vld [vmem:[#allocation19 + $0x90] sm:$0xff]  }
 0x48f   :  { %6730 = vmatpush1.bf16.msra.mxu1 %v10859_v3  ;;  %9363 = vmatpush3.bf16.msra.mxu0 %v10863_v4  ;;  %v10917_v3 = vld [vmem:[#allocation19 + $0xd0] sm:$0xff]   ;;  %v10914_v4 = vld [vmem:[#allocation14 + $0x16f0] ss:$24 sps:$4 sm:$0xff]  }
 0x490   :  { %6731 = vmatprep.subr.bf16.mxu1 %v10866_v7  ;;  %9364 = vmatprep.subr.bf16.mxu0 %v10867_v10  ;;  %v10921_v7 = vld [vmem:[#allocation14 + $0x16c4] ss:$24 sps:$4 sm:$0xff]   ;;  %v10922_v10 = vld [vmem:[#allocation19 + $0xc8] sm:$0xff]  }
 0x493   :  { %6732 = vmatpush1.bf16.msra.mxu1 %v10864_v16  ;;  %9365 = vmatpush3.bf16.msra.mxu0 %v10868_v54  ;;  %v10919_v16 = vld [vmem:[#allocation14 + $0x16c0] ss:$24 sps:$4 sm:$0xff]   ;;  %v10923_v54 = vld [vmem:[#allocation19 + $0x88] sm:$0xff]  }
 0x494   :  { %6733 = vmatprep.subr.bf16.mxu1 %v10871_v17  ;;  %9366 = vmatprep.subr.bf16.mxu0 %v10872_v20  ;;  %v472_v17 = vrot.slane %v11639_v49, %v471_v41  ;;  %v10926_v20 = vld [vmem:[#allocation14 + $0x1694] ss:$24 sps:$4 sm:$0xff]   ;;  %v10929_v41 = vld [vmem:[#allocation19 + $0x178] sm:$0xff]  }
 0x497   :  { %6734 = vmatpush1.bf16.msra.mxu1 %v10869_v18  ;;  %9367 = vmatpush3.bf16.msra.mxu0 %v10873_v28  ;;  %v10927_v18 = vld [vmem:[#allocation19 + $0xc0] sm:$0xff]   ;;  %v479_v28 = vsub.s32 4, %v11478_v22 }
 0x498   :  { %6735 = vmatprep.subr.bf16.mxu1 %v10876_v30  ;;  %9368 = vmatprep.subr.bf16.mxu0 %v10877_v23  ;;  %v484_v30 = vrot.slane %v11639_v49, %v483_v11  ;;  %v11042_v23 = vld [vmem:[#allocation16] sm:$0x3f] }
 0x499   :  { %v1935_v29 = vrot.slane %v11042_v23, %v483_v11  ;;  %v10955_v11 = vld [vmem:[#allocation19 + $0x108] sm:$0xff]  }
 0x49b   :  { %6736 = vmatpush1.bf16.msra.mxu1 %v10874_v31  ;;  %9369 = vmatpush3.bf16.msra.mxu0 %v10878_v34  ;;  %v1931_v31 = vrot.slane %v11042_v23, %v479_v28  ;;  %v10924_v34 = vld [vmem:[#allocation14 + $0x1690] ss:$24 sps:$4 sm:$0xff]   ;;  %v6475_v39 = vadd.f32 %v11651_v1, %v1935_v29  ;;  %v10981_v29 = vld [vmem:[#allocation17 + $0x138] sm:$0xff]  }
 0x49c   :  { %6737 = vmatprep.subr.bf16.mxu1 %v10881_v38  ;;  %9370 = vmatprep.subr.bf16.mxu0 %v10882_v32  ;;  %v10928_v38 = vld [vmem:[#allocation19 + $0x80] sm:$0xff]   ;;  %v1047_v32 = vadd.f32 %v11526_v42, %v472_v17  ;;  %v10933_v42 = vld [vmem:[#allocation19 + $0x170] sm:$0xff]   ;;  %v10937_v1 = vld [vmem:[#allocation19 + $0x168] sm:$0xff]  }
 0x49d   :  { %v10957_v17 = vld [vmem:[#allocation19 + $0x140] sm:$0xff]  }
 0x49e   :  { %v6876_v52 = vpack.c.bf16 %v1047_v32, %v1047_v32  ;;  %v10960_v23 = vld [vmem:[#allocation17] sm:$0xff]   ;;  %v10965_v32 = vld [vmem:[#allocation17 + $0xe8] sm:$0xff]  }
 0x49f   :  { %6738 = vmatpush1.bf16.msra.mxu1 %v10879_v33  ;;  %9371 = vmatpush3.bf16.msra.mxu0 %v10883_v19  ;;  %v10930_v33 = vld [vmem:[#allocation17 + $0x78] sm:$0xff]   ;;  %v1090_v19 = vadd.f32 %v11549_v26, %v484_v30 }
 0x4a0   :  { %6739 = vmatprep.subr.bf16.mxu1 %v10886_v50  ;;  %9372 = vmatprep.subr.bf16.mxu0 %v10887_v51  ;;  %v6473_v50 = vadd.f32 %v11646_v61, %v1931_v31  ;;  %v10931_v51 = vld [vmem:[#allocation19 + $0x138] sm:$0xff]  }
 0x4a1   :  { %v10961_v31 = vld [vmem:[#allocation17 + $0xf8] sm:$0xff]  }
 0x4a3   :  { %6740 = vmatpush1.bf16.msra.mxu1 %v10884_v48  ;;  %9373 = vmatpush3.bf16.msra.mxu0 %v10888_v53  ;;  %v10932_v48 = vld [vmem:[#allocation17 + $0x38] sm:$0xff]   ;;  %v6879_v53 = vpack.c.bf16 %v1090_v19, %v1090_v19 }
 0x4a4   :  { %6741 = vmatprep.subr.bf16.mxu1 %v10891_v43  ;;  %9380 = vmatprep.subr.bf16.mxu0 %v10892_v6  ;;  %v10934_v43 = vld [vmem:[#allocation17 + $0x70] sm:$0xff]   ;;  %v6773_v6 = vpack.c.bf16 %v11599_v36, %v11599_v36  ;;  %v10938_v36 = vld [vmem:[#allocation17 + $0x68] sm:$0xff]   ;;  %v10979_v19 = vld [vmem:[#allocation17 + $0x178] sm:$0xff]  }
 0x4a6   :  { %7297 = vmatmul.mubr.bf16.vlgmr.msra.gmra.mxu0 %v6874_v55 }
 0x4a7   :  { %6742 = vmatpush2.bf16.msra.mxu1 %v10889_v8  ;;  %9381 = vmatpush3.bf16.msra.mxu0 %v10893_v35  ;;  %v10935_v8 = vld [vmem:[#allocation19 + $0x130] sm:$0xff]  }
 0x4a8   :  { %7336 = vmatprep.mubr.bf16.mxu0 %v6877_v56  ;;  %6743 = vmatprep.subr.bf16.mxu1 %v10896_v2  ;;  %v10936_v2 = vld [vmem:[#allocation17 + $0x30] sm:$0xff]  }
 0x4a9   :  { %9382 = vmatprep.subr.bf16.mxu0 %v10897_v44 }
 0x4ab   :  { %6744 = vmatpush2.bf16.msra.mxu1 %v10894_v40  ;;  %9383 = vmatpush3.bf16.msra.mxu0 %v10898_v57 }
 0x4ac   :  { %6745 = vmatprep.subr.bf16.mxu1 %v10901_v47  ;;  %9384 = vmatprep.subr.bf16.mxu0 %v10902_v58  ;;  %v10939_v47 = vld [vmem:[#allocation19 + $0x128] sm:$0xff]  }
 0x4af   :  { %6746 = vmatpush2.bf16.msra.mxu1 %v10899_v46  ;;  %9385 = vmatpush3.bf16.msra.mxu0 %v10903_v13  ;;  %v10940_v46 = vld [vmem:[#allocation17 + $0x28] sm:$0xff]   ;;  %v10941_v13 = vld [vmem:[#allocation19 + $0x160] sm:$0xff]  }
 0x4b0   :  { %6747 = vmatprep.subr.bf16.mxu1 %v10906_v14  ;;  %9386 = vmatprep.subr.bf16.mxu0 %v10907_v25  ;;  %v10942_v25 = vld [vmem:[#allocation17 + $0x60] sm:$0xff]  }
 0x4b3   :  { %6748 = vmatpush2.bf16.msra.mxu1 %v10904_v45  ;;  %9387 = vmatpush3.bf16.msra.mxu0 %v10908_v59  ;;  %v10943_v45 = vld [vmem:[#allocation19 + $0x120] sm:$0xff]  }
 0x4b4   :  { %6749 = vmatprep.subr.bf16.mxu1 %v10911_v60  ;;  %9388 = vmatprep.subr.bf16.mxu0 %v10912_v63  ;;  %v10944_v59 = vld [vmem:[#allocation17 + $0x20] sm:$0xff]   ;;  %v10945_v60 = vld [vmem:[#allocation19 + $0x158] sm:$0xff]  }
 0x4b5   :  { %v10946_v63 = vld [vmem:[#allocation17 + $0x58] sm:$0xff]  }
 0x4b7   :  { %6750 = vmatpush2.bf16.msra.mxu1 %v10909_v0  ;;  %9389 = vmatpush3.bf16.msra.mxu0 %v10913_v15  ;;  %v10947_v0 = vld [vmem:[#allocation19 + $0x118] sm:$0xff]  }
 0x4b8   :  { %6751 = vmatprep.subr.bf16.mxu1 %v10916_v37  ;;  %9390 = vmatprep.subr.bf16.mxu0 %v10917_v3  ;;  %v10948_v15 = vld [vmem:[#allocation17 + $0x18] sm:$0xff]   ;;  %v10949_v37 = vld [vmem:[#allocation19 + $0x150] sm:$0xff]  }
 0x4b9   :  { %v10950_v3 = vld [vmem:[#allocation17 + $0x50] sm:$0xff]  }
 0x4bb   :  { %6752 = vmatpush2.bf16.msra.mxu1 %v10914_v4  ;;  %9391 = vmatpush3.bf16.msra.mxu0 %v10918_v5  ;;  %v10951_v4 = vld [vmem:[#allocation19 + $0x110] sm:$0xff]  }
 0x4bc   :  { %6753 = vmatprep.subr.bf16.mxu1 %v10921_v7  ;;  %9392 = vmatprep.subr.bf16.mxu0 %v10922_v10  ;;  %v10952_v5 = vld [vmem:[#allocation17 + $0x10] sm:$0xff]   ;;  %v10953_v7 = vld [vmem:[#allocation19 + $0x148] sm:$0xff]  }
 0x4bd   :  { %v10954_v10 = vld [vmem:[#allocation17 + $0x48] sm:$0xff]  }
 0x4bf   :  { %6754 = vmatpush2.bf16.msra.mxu1 %v10919_v16  ;;  %9393 = vmatpush3.bf16.msra.mxu0 %v10923_v54  ;;  %v480_v16 = vrot.slane %v11639_v49, %v479_v28  ;;  %v10956_v54 = vld [vmem:[#allocation17 + $0x8] sm:$0xff]   ;;  %v10963_v49 = vld [vmem:[#allocation17 + $0xf0] sm:$0xff]   ;;  %v6772_v28 = vpack.c.bf16 %v11594_v27, %v11594_v27  ;;  %v10968_v27 = vld [vmem:[#allocation17 + $0xa0] sm:$0xff]  }
 0x4c0   :  { %6755 = vmatprep.subr.bf16.mxu1 %v10926_v20  ;;  %9394 = vmatprep.subr.bf16.mxu0 %v10927_v18  ;;  %v10958_v20 = vld [vmem:[#allocation17 + $0x40] sm:$0xff]  }
 0x4c1   :  { %v10959_v18 = vld [vmem:[#allocation19 + $0x100] sm:$0xff]   ;;  %v1088_v30 = vadd.f32 %v11543_v21, %v480_v16  ;;  %v10964_v21 = vld [vmem:[#allocation17 + $0xb0] sm:$0xff]  }
 0x4c2   :  { %v10988_v16 = vld [vmem:[#allocation20 + $0x60] sm:$0xff]  }
 0x4c3   :  { %6756 = vmatpush2.bf16.msra.mxu1 %v10924_v34  ;;  %9395 = vmatpush3.bf16.msra.mxu0 %v10928_v38  ;;  %v10962_v34 = vld [vmem:[#allocation17 + $0xb8] sm:$0xff]   ;;  %v6878_v22 = vpack.c.bf16 %v1088_v30, %v1088_v30  ;;  %v6775_v38 = vpack.c.bf16 %v11654_v12, %v11654_v12  ;;  %v10998_v30 = vld [vmem:[#allocation20 + $0x10] sm:$0xff]  }
 0x4c4   :  { %9402 = vmatprep.subr.bf16.mxu1 %v10929_v41  ;;  %9424 = vmatprep.subr.bf16.mxu0 %v10930_v33  ;;  %v10966_v41 = vld [vmem:[#allocation17 + $0xa8] sm:$0xff]   ;;  %v10967_v33 = vld [vmem:[#allocation17 + $0xe0] sm:$0xff]   ;;  %v10969_v12 = vld [vmem:[#allocation17 + $0xd8] sm:$0xff]  }
 0x4c6   :  { %v6513_v24 = vpop.f32.mrf.mxu1  ;;  %6758 = vmatmul.mubr.bf16.vlgmr.msra.gmra.mxu1 %v11557_v9  ;;  %7337 = vmatmul.mubr.bf16.vlgmr.msra.gmra.mxu0 %v6876_v52  ;;  %v6554_v26 = vpop.f32.mrf.mxu0  ;;  %v10987_v52 = vld [vmem:[#allocation17 + $0x168] sm:$0xff]  }
 0x4c7   :  { %v6514_v61 = vadd.f32 %v6513_v24, %v6473_v50  ;;  %9403 = vmatpush3.bf16.msra.mxu1 %v10931_v51  ;;  %7376 = vmatprep.mubr.bf16.mxu1 %v6879_v53  ;;  %v10983_v50 = vld [vmem:[#allocation17 + $0x170] sm:$0xff]   ;;  %v10989_v53 = vld [vmem:[#allocation17 + $0x128] sm:$0xff]  }
 0x4c8   :  { %9425 = vmatpush3.bf16.msra.mxu0 %v10932_v48  ;;  %7704 = vmatprep.mubr.bf16.mxu0 %v6773_v6  ;;  %v6515_v35 = vpop.f32.mrf.mxu1  ;;  %v6556_v55 = vpop.f32.mrf.mxu0  ;;  %v10985_v51 = vld [vmem:[#allocation17 + $0x130] sm:$0xff]   ;;  %v10970_v48 = vld [vmem:[#allocation17 + $0x98] sm:$0xff]   ;;  %v10993_v6 = vld [vmem:[#allocation17 + $0x120] sm:$0xff]  }
 0x4c9   :  { %v6516_v44 = vadd.f32 %v6515_v35, %v6475_v39  ;;  %v11679_v56 = vadd.f32 %v6554_v26, %v6514_v61  ;;  %9404 = vmatprep.subr.bf16.mxu1 %v10933_v42  ;;  %9426 = vmatprep.subr.bf16.mxu0 %v10934_v43  ;;  %v10971_v39 = vld [vmem:[#allocation17 + $0xd0] sm:$0xff]   ;;  %v10991_v42 = vld [vmem:[#allocation17 + $0x160] sm:$0xff]   ;;  %v10973_v24 = vld [vmem:[#allocation17 + $0xc8] sm:$0xff]  }
 0x4ca   :  { %v6517_v40 = vpop.f32.mrf.mxu1  ;;  %v6558_v9 = vpop.f32.mrf.mxu0  ;;  %v10972_v43 = vld [vmem:[#allocation17 + $0x90] sm:$0xff]   ;;  %v10995_v26 = vld [vmem:[#allocation17 + $0x158] sm:$0xff]   ;;  %v10974_v61 = vld [vmem:[#allocation17 + $0x88] sm:$0xff]  }
 0x4cb   :  { %v11681_v57 = vadd.f32 %v6556_v55, %v6516_v44  ;;  %9405 = vmatpush3.bf16.msra.mxu1 %v10935_v8  ;;  %v10997_v8 = vld [vmem:[#allocation17 + $0x118] sm:$0xff]   ;;  %v10975_v35 = vld [vmem:[#allocation17 + $0xc0] sm:$0xff]   ;;  %v10999_v55 = vld [vmem:[#allocation17 + $0x150] sm:$0xff]   ;;  %v6774_v9 = vpack.c.bf16 %v11649_v62, %v11649_v62 }
 0x4cc   :  { %9427 = vmatpush3.bf16.msra.mxu0 %v10936_v2  ;;  %v6518_v58 = vpop.f32.mrf.mxu1  ;;  %9406 = vmatprep.subr.bf16.mxu1 %v10937_v1  ;;  %v6559_v14 = vpop.f32.mrf.mxu0  ;;  %v10976_v2 = vld [vmem:[#allocation17 + $0x80] sm:$0xff]   ;;  %v11001_v1 = vld [vmem:[#allocation17 + $0x110] sm:$0xff]   ;;  %v10977_v44 = vld [vmem:[#allocation20 + $0x78] sm:$0xff]  }
 0x4cd   :  { %9428 = vmatprep.subr.bf16.mxu0 %v10938_v36  ;;  %v11003_v36 = vld [vmem:[#allocation17 + $0x148] sm:$0xff]   ;;  %v10978_v40 = vld [vmem:[#allocation20 + $0x38] sm:$0xff]  }
 0x4ce   :  { %v11005_v58 = vld [vmem:[#allocation17 + $0x108] sm:$0xff]  }
 0x4cf   :  { %9407 = vmatpush3.bf16.msra.mxu1 %v10939_v47  ;;  %v10980_v47 = vld [vmem:[#allocation20 + $0x70] sm:$0xff]  }
 0x4d0   :  { %9429 = vmatpush3.bf16.msra.mxu0 %v10940_v46  ;;  %9408 = vmatprep.subr.bf16.mxu1 %v10941_v13 }
 0x4d1   :  { %9430 = vmatprep.subr.bf16.mxu0 %v10942_v25  ;;  %v10982_v25 = vld [vmem:[#allocation20 + $0x30] sm:$0xff]  }
 0x4d3   :  { %9409 = vmatpush3.bf16.msra.mxu1 %v10943_v45  ;;  %v6767_v45 = vld [vmem:[#allocation7 + $0x8] sm:$0xff] }
 0x4d4   :  { %9431 = vmatpush3.bf16.msra.mxu0 %v10944_v59  ;;  %9410 = vmatprep.subr.bf16.mxu1 %v10945_v60 }
 0x4d5   :  { %9432 = vmatprep.subr.bf16.mxu0 %v10946_v63  ;;  %v10984_v63 = vld [vmem:[#allocation20 + $0x68] sm:$0xff]  }
 0x4d7   :  { %9411 = vmatpush3.bf16.msra.mxu1 %v10947_v0  ;;  %v11007_v0 = vld [vmem:[#allocation17 + $0x140] sm:$0xff]  }
 0x4d8   :  { %9433 = vmatpush3.bf16.msra.mxu0 %v10948_v15  ;;  %9412 = vmatprep.subr.bf16.mxu1 %v10949_v37  ;;  %v7793_v15 = vpack.c.bf16 %v6767_v45, %v6767_v45 }
 0x4d9   :  { %9434 = vmatprep.subr.bf16.mxu0 %v10950_v3  ;;  %v11009_v3 = vld [vmem:[#allocation17 + $0x100] sm:$0xff]  }
 0x4db   :  { %9413 = vmatpush3.bf16.msra.mxu1 %v10951_v4 }
 0x4dc   :  { %9435 = vmatpush3.bf16.msra.mxu0 %v10952_v5  ;;  %9414 = vmatprep.subr.bf16.mxu1 %v10953_v7  ;;  %v10986_v7 = vld [vmem:[#allocation20 + $0x28] sm:$0xff]  }
 0x4dd   :  { %9436 = vmatprep.subr.bf16.mxu0 %v10954_v10 }
 0x4df   :  { %9415 = vmatpush3.bf16.msra.mxu1 %v10955_v11 }
 0x4e0   :  { %9437 = vmatpush3.bf16.msra.mxu0 %v10956_v54  ;;  %9416 = vmatprep.subr.bf16.mxu1 %v10957_v17  ;;  %v11011_v54 = vld [vmem:[#allocation20 + $0xf8] sm:$0xff]  }
 0x4e1   :  { %9438 = vmatprep.subr.bf16.mxu0 %v10958_v20  ;;  %v10992_v17 = vld [vmem:[#allocation20 + $0x58] sm:$0xff]  }
 0x4e2   :  { %v10994_v20 = vld [vmem:[#allocation20 + $0x18] sm:$0xff]  }
 0x4e3   :  { %9417 = vmatpush3.bf16.msra.mxu1 %v10959_v18  ;;  %v10996_v18 = vld [vmem:[#allocation20 + $0x50] sm:$0xff]  }
 0x4e4   :  { %9439 = vmatpush3.bf16.msra.mxu0 %v10960_v23  ;;  %9446 = vmatprep.subr.bf16.mxu1 %v10961_v31  ;;  %v11000_v23 = vld [vmem:[#allocation20 + $0x48] sm:$0xff]  }
 0x4e5   :  { %9468 = vmatprep.subr.bf16.mxu0 %v10979_v19  ;;  %v11002_v31 = vld [vmem:[#allocation20 + $0x8] sm:$0xff]  }
 0x4e6   :  { %7377 = vmatmul.mubr.bf16.vlgmr.msra.gmra.mxu1 %v6878_v22  ;;  %v11006_v22 = vld [vmem:[#allocation20] sm:$0xff]  }
 0x4e7   :  { %7705 = vmatmul.mubr.bf16.vlgmr.msra.gmra.mxu0 %v6772_v28  ;;  %9447 = vmatpush3.bf16.msra.mxu1 %v10962_v34  ;;  %v11004_v34 = vld [vmem:[#allocation20 + $0x40] sm:$0xff]   ;;  %v11008_v28 = vld [vmem:[#allocation20 + $0x178] sm:$0xff]  }
 0x4e8   :  { %7744 = vmatprep.mubr.bf16.mxu1 %v6775_v38  ;;  %9448 = vmatprep.subr.bf16.mxu1 %v10963_v49  ;;  %v6766_v49 = vld [vmem:[#allocation7] sm:$0xff] }
 0x4e9   :  { %9469 = vmatpush3.bf16.msra.mxu0 %v10981_v29  ;;  %v7792_v38 = vpack.c.bf16 %v6766_v49, %v6766_v49  ;;  %v11016_v29 = vld [vmem:[#allocation20 + $0x168] sm:$0xff]   ;;  %v11031_v49 = vld [vmem:[#allocation20 + $0xd0] sm:$0xff]  }
 0x4ea   :  { %9470 = vmatprep.subr.bf16.mxu0 %v10983_v50  ;;  %v11018_v50 = vld [vmem:[#allocation20 + $0x128] sm:$0xff]  }
 0x4eb   :  { %9449 = vmatpush3.bf16.msra.mxu1 %v10964_v21  ;;  %v11010_v21 = vld [vmem:[#allocation20 + $0x138] sm:$0xff]  }
 0x4ec   :  { %9450 = vmatprep.subr.bf16.mxu1 %v10965_v32  ;;  %v11012_v32 = vld [vmem:[#allocation20 + $0x170] sm:$0xff]  }
 0x4ed   :  { %9471 = vmatpush3.bf16.msra.mxu0 %v10985_v51  ;;  %v11022_v51 = vld [vmem:[#allocation20 + $0x120] sm:$0xff]  }
 0x4ee   :  { %9472 = vmatprep.subr.bf16.mxu0 %v10987_v52  ;;  %v11026_v52 = vld [vmem:[#allocation20 + $0x118] sm:$0xff]  }
 0x4ef   :  { %9451 = vmatpush3.bf16.msra.mxu1 %v10966_v41  ;;  %v6771_v41 = vld [vmem:[#allocation7 + $0x28] sm:$0xff] }
 0x4f0   :  { %9452 = vmatprep.subr.bf16.mxu1 %v10967_v33  ;;  %v11014_v33 = vld [vmem:[#allocation20 + $0x130] sm:$0xff]   ;;  %v7797_v19 = vpack.c.bf16 %v6771_v41, %v6771_v41 }
 0x4f1   :  { %9473 = vmatpush3.bf16.msra.mxu0 %v10989_v53  ;;  %v11030_v53 = vld [vmem:[#allocation20 + $0x110] sm:$0xff]  }
 0x4f2   :  { %9474 = vmatprep.subr.bf16.mxu0 %v10991_v42  ;;  %v11034_v42 = vld [vmem:[#allocation20 + $0x108] sm:$0xff]  }
 0x4f3   :  { %9453 = vmatpush3.bf16.msra.mxu1 %v10968_v27  ;;  %v11020_v27 = vld [vmem:[#allocation20 + $0x160] sm:$0xff]  }
 0x4f4   :  { %9454 = vmatprep.subr.bf16.mxu1 %v10969_v12  ;;  %v11024_v12 = vld [vmem:[#allocation20 + $0x158] sm:$0xff]  }
 0x4f5   :  { %9475 = vmatpush3.bf16.msra.mxu0 %v10993_v6  ;;  %v11038_v6 = vld [vmem:[#allocation20 + $0x100] sm:$0xff]  }
 0x4f6   :  { %9476 = vmatprep.subr.bf16.mxu0 %v10995_v26 }
 0x4f7   :  { %9455 = vmatpush3.bf16.msra.mxu1 %v10970_v48  ;;  %v11028_v48 = vld [vmem:[#allocation20 + $0x150] sm:$0xff]  }
 0x4f8   :  { %9456 = vmatprep.subr.bf16.mxu1 %v10971_v39  ;;  %v11032_v39 = vld [vmem:[#allocation20 + $0x148] sm:$0xff]  }
 0x4f9   :  { %9477 = vmatpush3.bf16.msra.mxu0 %v10997_v8 }
 0x4fa   :  { %9478 = vmatprep.subr.bf16.mxu0 %v10999_v55 }
 0x4fb   :  { %9457 = vmatpush3.bf16.msra.mxu1 %v10972_v43  ;;  %v11036_v43 = vld [vmem:[#allocation20 + $0x140] sm:$0xff]  }
 0x4fc   :  { %9458 = vmatprep.subr.bf16.mxu1 %v10973_v24  ;;  %v6770_v24 = vld [vmem:[#allocation7 + $0x20] sm:$0xff] }
 0x4fd   :  { %9479 = vmatpush3.bf16.msra.mxu0 %v11001_v1  ;;  %v7796_v26 = vpack.c.bf16 %v6770_v24, %v6770_v24 }
 0x4fe   :  { %9480 = vmatprep.subr.bf16.mxu0 %v11003_v36 }
 0x4ff   :  { %9459 = vmatpush3.bf16.msra.mxu1 %v10974_v61 }
 0x500   :  { %9460 = vmatprep.subr.bf16.mxu1 %v10975_v35 }
 0x501   :  { %9481 = vmatpush3.bf16.msra.mxu0 %v11005_v58 }
 0x502   :  { %9482 = vmatprep.subr.bf16.mxu0 %v11007_v0 }
 0x503   :  { %9461 = vmatpush3.bf16.msra.mxu1 %v10976_v2 }
 0x504   :  { %9490 = vmatprep.subr.bf16.mxu1 %v10977_v44 }
 0x505   :  { %9483 = vmatpush3.bf16.msra.mxu0 %v11009_v3 }
 0x506   :  { %v6595_v46 = vpop.f32.mrf.mxu1  ;;  %7745 = vmatmul.mubr.bf16.vlgmr.msra.gmra.mxu1 %v6774_v9  ;;  %v6636_v13 = vpop.f32.mrf.mxu0  ;;  %9512 = vmatprep.subr.bf16.mxu0 %v11011_v54 }
 0x507   :  { %v6596_v14 = vadd.f32 %v6595_v46, %v11679_v56  ;;  %9491 = vmatpush3.bf16.msra.mxu1 %v10978_v40  ;;  %8214 = vmatprep.mubr.bf16.mxu1 %v7793_v15 }
 0x508   :  { %v6597_v59 = vpop.f32.mrf.mxu1  ;;  %v6638_v60 = vpop.f32.mrf.mxu0  ;;  %9492 = vmatprep.subr.bf16.mxu1 %v10980_v47 }
 0x509   :  { %v6598_v62 = vadd.f32 %v6597_v59, %v11681_v57  ;;  %v11695_v37 = vadd.f32 %v6636_v13, %v6596_v14  ;;  %v10990_v57 = vld [vmem:[#allocation20 + $0x20] sm:$0xff]  }
 0x50a   :  { %v6599_v4 = vpop.f32.mrf.mxu1  ;;  %v6640_v5 = vpop.f32.mrf.mxu0 }
 0x50b   :  { %v11697_v56 = vadd.f32 %v6638_v60, %v6598_v62  ;;  %9493 = vmatpush3.bf16.msra.mxu1 %v10982_v25  ;;  %v6769_v62 = vld [vmem:[#allocation7 + $0x18] sm:$0xff] }
 0x50c   :  { %v6600_v10 = vpop.f32.mrf.mxu1  ;;  %v6641_v11 = vpop.f32.mrf.mxu0  ;;  %9494 = vmatprep.subr.bf16.mxu1 %v10984_v63 }
 0x50d   :  { %v11013_v11 = vld [vmem:[#allocation20 + $0xb8] sm:$0xff]  }
 0x50f   :  { %9495 = vmatpush3.bf16.msra.mxu1 %v10986_v7 }
 0x510   :  { %9496 = vmatprep.subr.bf16.mxu1 %v10988_v16  ;;  %v7795_v16 = vpack.c.bf16 %v6769_v62, %v6769_v62 }
 0x513   :  { %9497 = vmatpush3.bf16.msra.mxu1 %v10990_v57 }
 0x514   :  { %9498 = vmatprep.subr.bf16.mxu1 %v10992_v17 }
 0x517   :  { %9499 = vmatpush3.bf16.msra.mxu1 %v10994_v20  ;;  %v11015_v20 = vld [vmem:[#allocation20 + $0xf0] sm:$0xff]  }
 0x518   :  { %9500 = vmatprep.subr.bf16.mxu1 %v10996_v18  ;;  %v11019_v18 = vld [vmem:[#allocation20 + $0xe8] sm:$0xff]  }
 0x51b   :  { %9501 = vmatpush3.bf16.msra.mxu1 %v10998_v30  ;;  %v11021_v30 = vld [vmem:[#allocation20 + $0xa8] sm:$0xff]  }
 0x51c   :  { %9502 = vmatprep.subr.bf16.mxu1 %v11000_v23  ;;  %v11023_v23 = vld [vmem:[#allocation20 + $0xe0] sm:$0xff]  }
 0x51f   :  { %9503 = vmatpush3.bf16.msra.mxu1 %v11002_v31  ;;  %v11025_v31 = vld [vmem:[#allocation20 + $0xa0] sm:$0xff]  }
 0x520   :  { %9504 = vmatprep.subr.bf16.mxu1 %v11004_v34  ;;  %v11027_v34 = vld [vmem:[#allocation20 + $0xd8] sm:$0xff]  }
 0x523   :  { %9505 = vmatpush3.bf16.msra.mxu1 %v11006_v22  ;;  %v11029_v22 = vld [vmem:[#allocation20 + $0x98] sm:$0xff]  }
 0x524   :  { %9534 = vmatprep.subr.bf16.mxu1 %v11008_v28  ;;  %v11033_v28 = vld [vmem:[#allocation20 + $0x90] sm:$0xff]  }
 0x526   :  { %8215 = vmatmul.mubr.bf16.vlgmr.msra.gmra.mxu1 %v7792_v38  ;;  %v11035_v38 = vld [vmem:[#allocation20 + $0xc8] sm:$0xff]  }
 0x527   :  { %9535 = vmatpush3.bf16.msra.mxu1 %v11010_v21  ;;  %8294 = vmatprep.mubr.bf16.mxu1 %v7797_v19  ;;  %v11037_v21 = vld [vmem:[#allocation20 + $0x88] sm:$0xff]   ;;  %v11040_v19 = vld [vmem:[#allocation20 + $0x80] sm:$0xff]  }
 0x528   :  { %9536 = vmatprep.subr.bf16.mxu1 %v11012_v32  ;;  %v11039_v32 = vld [vmem:[#allocation20 + $0xc0] sm:$0xff]  }
 0x52b   :  { %9537 = vmatpush3.bf16.msra.mxu1 %v11014_v33 }
 0x52c   :  { %9538 = vmatprep.subr.bf16.mxu1 %v11016_v29  ;;  %v6768_v29 = vld [vmem:[#allocation7 + $0x10] sm:$0xff] }
 0x52f   :  { %9539 = vmatpush3.bf16.msra.mxu1 %v11018_v50 }
 0x530   :  { %9540 = vmatprep.subr.bf16.mxu1 %v11020_v27 }
 0x533   :  { %9541 = vmatpush3.bf16.msra.mxu1 %v11022_v51 }
 0x534   :  { %9542 = vmatprep.subr.bf16.mxu1 %v11024_v12 }
 0x537   :  { %9543 = vmatpush3.bf16.msra.mxu1 %v11026_v52 }
 0x538   :  { %9544 = vmatprep.subr.bf16.mxu1 %v11028_v48  ;;  %v7794_v48 = vpack.c.bf16 %v6768_v29, %v6768_v29 }
 0x53b   :  { %9545 = vmatpush3.bf16.msra.mxu1 %v11030_v53 }
 0x53c   :  { %9546 = vmatprep.subr.bf16.mxu1 %v11032_v39 }
 0x53f   :  { %9547 = vmatpush3.bf16.msra.mxu1 %v11034_v42 }
 0x540   :  { %9548 = vmatprep.subr.bf16.mxu1 %v11036_v43 }
 0x543   :  { %9549 = vmatpush3.bf16.msra.mxu1 %v11038_v6 }
 0x546   :  { %v6677_v61 = vpop.f32.mrf.mxu1  ;;  %v6718_v8 = vpop.f32.mrf.mxu0  ;;  %8295 = vmatmul.mubr.bf16.vlgmr.msra.gmra.mxu1 %v7796_v26 }
 0x547   :  { %v6678_v35 = vadd.f32 %v6677_v61, %v11695_v37 }
 0x548   :  { %v6679_v55 = vpop.f32.mrf.mxu1  ;;  %v6720_v2 = vpop.f32.mrf.mxu0 }
 0x549   :  { %v6719_v1 = vadd.f32 %v6718_v8, %v6678_v35  ;;  %v6680_v25 = vadd.f32 %v6679_v55, %v11697_v56  ;;  %v11017_v56 = vld [vmem:[#allocation20 + $0xb0] sm:$0xff]  }
 0x54a   :  { %v6681_v44 = vpop.f32.mrf.mxu1  ;;  %v6722_v36 = vpop.f32.mrf.mxu0 }
 0x54b   :  { %v6721_v60 = vadd.f32 %v6720_v2, %v6680_v25 }
 0x54c   :  { %v6682_v40 = vpop.f32.mrf.mxu1  ;;  %v6723_v9 = vpop.f32.mrf.mxu0 }
 0x566   :  { %v9374_v47 = vpop.f32.mrf.mxu0 }
 0x568   :  { %v9375_v58 = vpop.f32.mrf.mxu0 }
 0x569   :  { %v9376_v46 = vadd.f32 %v9375_v58, %v9374_v47 }
 0x56a   :  { %v9377_v13 = vpop.f32.mrf.mxu0 }
 0x56c   :  { %v9378_v14 = vpop.f32.mrf.mxu0 }
 0x586   :  { %v6759_v45 = vpop.f32.mrf.mxu1  ;;  %v9396_v59 = vpop.f32.mrf.mxu0 }
 0x587   :  { %v6760_v63 = vadd.f32 %v6759_v45, %v6719_v1 }
 0x588   :  { %v6761_v0 = vpop.f32.mrf.mxu1  ;;  %v9397_v15 = vpop.f32.mrf.mxu0 }
 0x589   :  { %v6762_v37 = vadd.f32 %v6761_v0, %v6721_v60  ;;  %v9398_v3 = vadd.f32 %v9397_v15, %v9396_v59  ;;  %v6776_v54 = vpack.c.bf16 %v6760_v63, %v6760_v63 }
 0x58a   :  { %v6763_v4 = vpop.f32.mrf.mxu1  ;;  %v9399_v5 = vpop.f32.mrf.mxu0 }
 0x58b   :  { %v6777_v7 = vpack.c.bf16 %v6762_v37, %v6762_v37  ;;  %v7339_v10 = vadd.f32 %v9398_v3, %v9376_v46 }
 0x58c   :  { %v6764_v57 = vpop.f32.mrf.mxu1  ;;  %v9400_v17 = vpop.f32.mrf.mxu0 }
 0x58d   :  { %7784 = vmatprep.mubr.bf16.mxu0 %v6777_v7  ;;  %v9357_v7 = vld [vmem:[#allocation22] ss:$0 sm:$0xff] }
 0x58e   :  { %7785 = vmatmul.mubr.bf16.vlgmr.msra.gmra.mxu0 %v6776_v54 }
 0x58f   :  { %9513 = vmatpush3.bf16.msra.mxu0 %v11013_v11  ;;  %8254 = vmatprep.mubr.bf16.mxu0 %v7795_v16 }
 0x590   :  { %9514 = vmatprep.subr.bf16.mxu0 %v11015_v20 }
 0x593   :  { %9515 = vmatpush3.bf16.msra.mxu0 %v11017_v56 }
 0x594   :  { %9516 = vmatprep.subr.bf16.mxu0 %v11019_v18 }
 0x597   :  { %9517 = vmatpush3.bf16.msra.mxu0 %v11021_v30 }
 0x598   :  { %9518 = vmatprep.subr.bf16.mxu0 %v11023_v23 }
 0x59b   :  { %9519 = vmatpush3.bf16.msra.mxu0 %v11025_v31 }
 0x59c   :  { %9520 = vmatprep.subr.bf16.mxu0 %v11027_v34 }
 0x59f   :  { %9521 = vmatpush3.bf16.msra.mxu0 %v11029_v22 }
 0x5a0   :  { %9522 = vmatprep.subr.bf16.mxu0 %v11031_v49 }
 0x5a3   :  { %9523 = vmatpush3.bf16.msra.mxu0 %v11033_v28 }
 0x5a4   :  { %9524 = vmatprep.subr.bf16.mxu0 %v11035_v38 }
 0x5a6   :  { %v9418_v41 = vpop.f32.mrf.mxu1 }
 0x5a7   :  { %v9440_v33 = vpop.f32.mrf.mxu0  ;;  %9525 = vmatpush3.bf16.msra.mxu0 %v11037_v21 }
 0x5a8   :  { %v9419_v50 = vpop.f32.mrf.mxu1  ;;  %9526 = vmatprep.subr.bf16.mxu0 %v11039_v32 }
 0x5a9   :  { %v9420_v27 = vadd.f32 %v9419_v50, %v9418_v41  ;;  %v9441_v51 = vpop.f32.mrf.mxu0 }
 0x5aa   :  { %v9442_v12 = vadd.f32 %v9441_v51, %v9440_v33  ;;  %v9421_v52 = vpop.f32.mrf.mxu1 }
 0x5ab   :  { %v7379_v53 = vadd.f32 %v9420_v27, %v7339_v10  ;;  %v9443_v39 = vpop.f32.mrf.mxu0  ;;  %9527 = vmatpush3.bf16.msra.mxu0 %v11040_v19 }
 0x5ac   :  { %v9422_v42 = vpop.f32.mrf.mxu1 }
 0x5ad   :  { %v7707_v43 = vadd.f32 %v9442_v12, %v7379_v53  ;;  %v9444_v6 = vpop.f32.mrf.mxu0 }
 0x5ae   :  { %8255 = vmatmul.mubr.bf16.vlgmr.msra.gmra.mxu0 %v7794_v48 }
 0x5c6   :  { %v9462_v24 = vpop.f32.mrf.mxu1 }
 0x5c8   :  { %v9463_v26 = vpop.f32.mrf.mxu1 }
 0x5c9   :  { %v9464_v61 = vadd.f32 %v9463_v26, %v9462_v24 }
 0x5ca   :  { %v9465_v8 = vpop.f32.mrf.mxu1 }
 0x5cb   :  { %v7747_v35 = vadd.f32 %v9464_v61, %v7707_v43 }
 0x5cc   :  { %v9466_v55 = vpop.f32.mrf.mxu1 }
 0x5e6   :  { %v9506_v2 = vpop.f32.mrf.mxu1 }
 0x5e8   :  { %v9507_v1 = vpop.f32.mrf.mxu1 }
 0x5e9   :  { %v9508_v44 = vadd.f32 %v9507_v1, %v9506_v2 }
 0x5ea   :  { %v9509_v36 = vpop.f32.mrf.mxu1 }
 0x5ec   :  { %v9510_v40 = vpop.f32.mrf.mxu1 }
 0x606   :  { %v9550_v9 = vpop.f32.mrf.mxu1 }
 0x608   :  { %v9551_v47 = vpop.f32.mrf.mxu1 }
 0x609   :  { %v9552_v58 = vadd.f32 %v9551_v47, %v9550_v9 }
 0x60a   :  { %v9553_v46 = vpop.f32.mrf.mxu1 }
 0x60c   :  { %v9554_v13 = vpop.f32.mrf.mxu1 }
 0x64e   :  { %v9484_v14 = vpop.f32.mrf.mxu0 }
 0x650   :  { %v9485_v25 = vpop.f32.mrf.mxu0 }
 0x651   :  { %v9486_v0 = vadd.f32 %v9485_v25, %v9484_v14 }
 0x652   :  { %v9487_v45 = vpop.f32.mrf.mxu0 }
 0x653   :  { %v7787_v4 = vadd.f32 %v9486_v0, %v7747_v35 }
 0x654   :  { %v9488_v59 = vpop.f32.mrf.mxu0 }
 0x66e   :  { %v9528_v60 = vpop.f32.mrf.mxu0 }
 0x670   :  { %v9529_v63 = vpop.f32.mrf.mxu0 }
 0x671   :  { %v9530_v15 = vadd.f32 %v9529_v63, %v9528_v60 }
 0x672   :  { %v9531_v62 = vpop.f32.mrf.mxu0 }
 0x673   :  { %v8257_v37 = vadd.f32 %v9530_v15, %v9508_v44 }
 0x674   :  { %v9532_v3 = vpop.f32.mrf.mxu0 }
 0x675   :  { %v8297_v5 = vadd.f32 %v9552_v58, %v8257_v37 }
 0x677   :  { %v8302_v10 = vadd.f32 %v8297_v5, %v7787_v4 }
 0x679   :  { %v8310_v11 = vadd.f32 %v9357_v7, %v8302_v10 }
 0x67b   :  { %8311 = vst [vmem:[#allocation23] sm:$0xff] %v8310_v11 }
 0x67c   :  { %11314 = shalt.err (!%p11311_p13)
}
 0x67d   :  { %8321 = dma.vmem_to_hbm [thread:$0]  %s8319_s12, 128, %s11717_s13, [#allocation4]  }
 0x67e   :  { %11337 = dma.done.wait [#allocation4], 128  }
 0x67f   :  { %11338 = vsyncadd [#allocation4], 4294967168 }
 0x680   :  { %8325 = vsyncpa [#allocation3], 1 }
 0x681   :  { %8326 = vsyncpa [#allocation6], 1 }
 0x682   :  { %8327 = vsyncpa [#allocation9], 1 }
 0x683   :  { %8328 = vsyncpa [#allocation12], 1 }
 0x684   :  { %8329 = vsyncpa [#allocation15], 1 }
 0x685   :  { %8330 = vsyncpa [#allocation18], 1 }
 0x686   :  { %8331 = vsyncpa [#allocation21], 1 }
 0x687   :  { %8332 = vsyncpa [#allocation4], 1 }

</bundles_post_ra>
